<compile_context>
chip_gen: v7x
topology: tpu7x:2x2x1
jax: 0.10.0
libtpu: 0.0.40
codegen_flags: <defaults>
</compile_context>

<pallas_src>
import math

import jax
import jax.numpy as jnp
import numpy as np
from jax import lax
from jax.experimental import pallas as pl
from jax.experimental.pallas import tpu as pltpu

N_CLASSES = 42
NODE_IN = N_CLASSES + 2        # 44
OUT = 64                       # out_size
H = 2 * OUT                    # 128 = merge width = TPU lane width


def _round_up(x, m):
    return ((x + m - 1) // m) * m


def _make_kernel(n_r, n_total, tile, q0, nq_steps, nr_blocks):
    """Build the fused forward kernel (all sizes baked in as Python ints)."""
    last_step = nq_steps + nr_blocks - 1

    def kernel(x_ref,                                          # streamed node tile (tile, 44)
               wq_ref, bq_ref,                                 # query_proj (outputs in lanes 0..63)
               a_ref, w1b_ref, c_ref,                          # fused ref_proj+merge[0] pieces
               w2_ref, b2_ref,                                 # merge[2]
               wr1_ref, br1_ref, wr2_ref, br2_ref, wr3_ref, br3_ref,   # regress MLP
               out_ref,                                        # (8, 128) lane-dense output slab
               acc_ref, b1e_ref):                              # VMEM scratch
        i = pl.program_id(0)

        @pl.when(i == 0)
        def _init():
            acc_ref[...] = jnp.full(acc_ref.shape, -jnp.inf, dtype=acc_ref.dtype)

        # ---- phase 1: running elementwise max of query projections (lanes 0..63) ----
        @pl.when(i < nq_steps)
        def _query_phase():
            x = x_ref[...].astype(jnp.float32)                                   # (tile, 44)
            proj = jnp.dot(x, wq_ref[...], preferred_element_type=jnp.float32)   # (tile, 128)
            rows = (q0 + i) * tile + lax.broadcasted_iota(jnp.int32, (tile, 1), 0)
            valid = (rows >= n_r) & (rows < n_total)                             # query rows only
            proj = jnp.where(valid, proj, -jnp.inf)
            acc_ref[...] = jnp.maximum(acc_ref[...], proj)

        # ---- transition: finalize query_feat; fold it + ref/merge biases into ONE bias row ----
        @pl.when(i == nq_steps)
        def _transition():
            qmax = jnp.max(acc_ref[...], axis=0, keepdims=True)                  # (1, 128)
            qfeat = jnp.broadcast_to(qmax + bq_ref[...], (8, H))                 # lanes 0..63 valid
            qcontrib = jnp.dot(qfeat, w1b_ref[...], preferred_element_type=jnp.float32)
            # b1_eff = b1 + br @ W1_top^T + query_feat @ W1_bot^T   (= bias of merge[0] on cat)
            b1e_ref[...] = c_ref[...] + qcontrib[0:1, :]
            acc_ref[...] = jnp.full(acc_ref.shape, -jnp.inf, dtype=acc_ref.dtype)

        # ---- phase 2: fused ref_proj+merge[0] (one 44->128 matmul), merge[2], running max ----
        @pl.when(i >= nq_steps)
        def _ref_phase():
            x = x_ref[...].astype(jnp.float32)                                   # (tile, 44)
            h = jnp.maximum(
                jnp.dot(x, a_ref[...], preferred_element_type=jnp.float32) + b1e_ref[...], 0.0)
            h = jnp.maximum(
                jnp.dot(h, w2_ref[...], preferred_element_type=jnp.float32) + b2_ref[...], 0.0)
            rows = (i - nq_steps) * tile + lax.broadcasted_iota(jnp.int32, (tile, 1), 0)
            h = jnp.where(rows < n_r, h, -jnp.inf)                               # ref rows only
            acc_ref[...] = jnp.maximum(acc_ref[...], h)

        # ---- epilogue: single cross-sublane reduce + regress head, lane-dense output ----
        @pl.when(i == last_step)
        def _epilogue():
            feat = jnp.max(acc_ref[...], axis=0, keepdims=True)                  # (1, 128)
            feat = jnp.broadcast_to(feat, (8, H))                                # MXU/store friendly
            h = jnp.maximum(
                jnp.dot(feat, wr1_ref[...], preferred_element_type=jnp.float32) + br1_ref[...], 0.0)
            h = jnp.maximum(
                jnp.dot(h, wr2_ref[...], preferred_element_type=jnp.float32) + br2_ref[...], 0.0)
            loc = jnp.dot(h, wr3_ref[...], preferred_element_type=jnp.float32) + br3_ref[...]
            out_ref[...] = loc                                # row 0, lanes 0..2 hold the result

    return kernel


def pack_params(params):
    """Pre-transpose / pre-fold / zero-pad all weights into lane-dense (., 128) layouts."""
    f32 = jnp.float32
    p = {k: jnp.asarray(v, f32) for k, v in params.items()}
    wq_p = jnp.zeros((NODE_IN, H), f32).at[:, :OUT].set(p["wq"].T)   # query proj -> lanes 0..63
    bq_row = jnp.zeros((1, H), f32).at[0, :OUT].set(p["bq"])
    w1t = p["w1"].T                                                  # (128 in, 128 out)
    # ref_proj fused into merge[0]:  A = Wr^T @ W1_top^T  (44, 128)
    a_p = jnp.dot(p["wr"].T, w1t[:OUT, :])
    # query half of merge[0] (applied once at the transition): W1_bot^T padded to (128, 128)
    w1b_p = jnp.zeros((H, H), f32).at[:OUT, :].set(w1t[OUT:, :])
    # constant part of the fused bias: b1 + br @ W1_top^T
    c_row = (p["b1"] + jnp.dot(p["br"], w1t[:OUT, :])).reshape(1, H)
    w2_p = p["w2"].T
    b2 = p["b2"].reshape(1, H)
    wr1_p = jnp.zeros((H, H), f32).at[:, :OUT].set(p["wr1"].T)
    br1 = jnp.zeros((1, H), f32).at[0, :OUT].set(p["br1"])
    wr2_p = jnp.zeros((H, H), f32).at[:OUT, :OUT].set(p["wr2"].T)
    br2 = jnp.zeros((1, H), f32).at[0, :OUT].set(p["br2"])
    wr3_p = jnp.zeros((H, H), f32).at[:OUT, :3].set(p["wr3"].T)
    br3 = jnp.zeros((1, H), f32).at[0, :3].set(p["br3"])
    return (wq_p, bq_row, a_p, w1b_p, c_row, w2_p, b2,
            wr1_p, br1, wr2_p, br2, wr3_p, br3)


def mlp_module_forward(params, g_all, all_node_data, all_edge_data, n_r,
                       *, tile_rows=1024, interpret=False):
    """Pallas TPU implementation of MLPModule.forward. Returns (None, None, loc)."""
    del g_all, all_edge_data                    # unused by the reference forward pass
    n_total, d = all_node_data.shape
    assert d == NODE_IN, f"expected node feature dim {NODE_IN}, got {d}"
    n_r = int(n_r)
    n_q = n_total - n_r
    assert n_r >= 1 and n_q >= 1

    # Node data is streamed straight from HBM (no slice/pad copies). Phase-aware index_map
    # plus in-kernel -inf row masks handle the ref/query split and ragged edge tiles.
    tile_rows = max(8, _round_up(int(tile_rows), 8))
    tile = min(tile_rows, _round_up(n_total, 8))
    nt = pl.cdiv(n_total, tile)                 # total row tiles covering all_node_data
    q0 = n_r // tile                            # first tile containing any query row
    nq_steps = nt - q0                          # query-phase grid steps
    nr_blocks = pl.cdiv(n_r, tile)              # ref-phase grid steps

    packed = pack_params(params)
    kernel = _make_kernel(n_r, n_total, tile, q0, nq_steps, nr_blocks)

    def node_idx(i):                            # query tiles first, then ref tiles
        return (jnp.where(i < nq_steps, q0 + i, i - nq_steps), 0)

    const = lambda *_: (0, 0)                   # weights: fetched once, resident in VMEM
    in_specs = [pl.BlockSpec((tile, NODE_IN), node_idx)] + \
               [pl.BlockSpec(w.shape, const) for w in packed]

    out = pl.pallas_call(
        kernel,
        out_shape=jax.ShapeDtypeStruct((8, H), jnp.float32),
        grid_spec=pltpu.PrefetchScalarGridSpec(
            num_scalar_prefetch=0,
            grid=(nq_steps + nr_blocks,),
            in_specs=in_specs,
            out_specs=pl.BlockSpec((8, H), const),
            scratch_shapes=[
                pltpu.VMEM((tile, H), jnp.float32),   # elementwise running-max accumulator
                pltpu.VMEM((1, H), jnp.float32),      # fused merge[0] bias row (b1_eff)
            ],
        ),
        compiler_params=pltpu.CompilerParams(
            dimension_semantics=("arbitrary",),       # sequential: query max feeds ref phase
        ),
        interpret=interpret,
    )(all_node_data, *packed)

    loc = out[0:1, 0:3]
    return None, None, loc


def init_params(key):
    """Deterministic parameters matching the PyTorch layer shapes / default Linear init."""
    def linear(k, fan_in, fan_out):
        kw, kb = jax.random.split(k)
        bound = 1.0 / math.sqrt(fan_in)
        w = jax.random.uniform(kw, (fan_out, fan_in), jnp.float32, -bound, bound)
        b = jax.random.uniform(kb, (fan_out,), jnp.float32, -bound, bound)
        return w, b

    ks = jax.random.split(key, 7)
    p = {}
    p["wq"], p["bq"] = linear(ks[0], NODE_IN, OUT)    # query_proj
    p["wr"], p["br"] = linear(ks[1], NODE_IN, OUT)    # ref_proj
    p["w1"], p["b1"] = linear(ks[2], H, H)            # merge[0]
    p["w2"], p["b2"] = linear(ks[3], H, H)            # merge[2]
    p["wr1"], p["br1"] = linear(ks[4], H, OUT)        # regress[0]
    p["wr2"], p["br2"] = linear(ks[5], OUT, OUT)      # regress[2]
    p["wr3"], p["br3"] = linear(ks[6], OUT, 3)        # regress[4]
    return p


def reference_forward(params, all_node_data, n_r):
    """float64 NumPy reference with the exact PyTorch forward semantics."""
    p = {k: np.asarray(v, np.float64) for k, v in params.items()}
    x = np.asarray(all_node_data, np.float64)
    ref, query = x[:n_r], x[n_r:]
    query_data = query @ p["wq"].T + p["bq"]
    ref_data = ref @ p["wr"].T + p["br"]
    query_feat = np.tile(query_data.max(axis=0, keepdims=True), (ref_data.shape[0], 1))
    rq = np.concatenate([ref_data, query_feat], axis=1)
    rq = np.maximum(rq @ p["w1"].T + p["b1"], 0.0)
    rq = np.maximum(rq @ p["w2"].T + p["b2"], 0.0)
    feat = rq.max(axis=0, keepdims=True)
    h = np.maximum(feat @ p["wr1"].T + p["br1"], 0.0)
    h = np.maximum(h @ p["wr2"].T + p["br2"], 0.0)
    return h @ p["wr3"].T + p["br3"]


if __name__ == "__main__":
    key = jax.random.PRNGKey(0)
    k_param, k_data = jax.random.split(key)
    params = init_params(k_param)

    n_r, n_q = 600, 424                          # small, deliberately non-tile-aligned counts
    all_node_data = jax.random.normal(k_data, (n_r + n_q, NODE_IN), jnp.float32)
    g_all, all_edge_data = None, None            # unused by the forward pass

    _, _, loc = mlp_module_forward(params, g_all, all_node_data, all_edge_data, n_r,
                                   tile_rows=512)
    loc = jax.block_until_ready(loc)

    expected = reference_forward(params, all_node_data, n_r)
    np.testing.assert_allclose(np.asarray(loc, np.float64), expected, rtol=2e-2, atol=2e-2)
    print("KERNEL_OK")
</pallas_src>

<mosaic_0001>
module attributes {stable_mosaic.version = 11 : i64} {
  func.func @kernel(%arg0: i32, %arg1: memref<512x44xf32, #tpu.memory_space<vmem>>, %arg2: memref<44x128xf32, #tpu.memory_space<vmem>>, %arg3: memref<1x128xf32, #tpu.memory_space<vmem>>, %arg4: memref<44x128xf32, #tpu.memory_space<vmem>>, %arg5: memref<128x128xf32, #tpu.memory_space<vmem>>, %arg6: memref<1x128xf32, #tpu.memory_space<vmem>>, %arg7: memref<128x128xf32, #tpu.memory_space<vmem>>, %arg8: memref<1x128xf32, #tpu.memory_space<vmem>>, %arg9: memref<128x128xf32, #tpu.memory_space<vmem>>, %arg10: memref<1x128xf32, #tpu.memory_space<vmem>>, %arg11: memref<128x128xf32, #tpu.memory_space<vmem>>, %arg12: memref<1x128xf32, #tpu.memory_space<vmem>>, %arg13: memref<128x128xf32, #tpu.memory_space<vmem>>, %arg14: memref<1x128xf32, #tpu.memory_space<vmem>>, %arg15: memref<8x128xf32, #tpu.memory_space<vmem>>, %arg16: memref<512x128xf32, #tpu.memory_space<vmem>>, %arg17: memref<1x128xf32, #tpu.memory_space<vmem>>) attributes {dimension_semantics = [#tpu.dimension_semantics<arbitrary>], iteration_bounds = array<i64: 3>, scalar_prefetch = 0 : i64, scratch_operands = 2 : i64, tpu.core_type = #tpu.core_type<tc>, window_params = [{transform_indices = @transform_0, window_bounds = array<i64: 512, 44>}, {pipeline_mode = #tpu.pipeline_mode<synchronous>, transform_indices = @transform_1, window_bounds = array<i64: 44, 128>}, {pipeline_mode = #tpu.pipeline_mode<synchronous>, transform_indices = @transform_2, window_bounds = array<i64: 1, 128>}, {pipeline_mode = #tpu.pipeline_mode<synchronous>, transform_indices = @transform_3, window_bounds = array<i64: 44, 128>}, {pipeline_mode = #tpu.pipeline_mode<synchronous>, transform_indices = @transform_4, window_bounds = array<i64: 128, 128>}, {pipeline_mode = #tpu.pipeline_mode<synchronous>, transform_indices = @transform_5, window_bounds = array<i64: 1, 128>}, {pipeline_mode = #tpu.pipeline_mode<synchronous>, transform_indices = @transform_6, window_bounds = array<i64: 128, 128>}, {pipeline_mode = #tpu.pipeline_mode<synchronous>, transform_indices = @transform_7, window_bounds = array<i64: 1, 128>}, {pipeline_mode = #tpu.pipeline_mode<synchronous>, transform_indices = @transform_8, window_bounds = array<i64: 128, 128>}, {pipeline_mode = #tpu.pipeline_mode<synchronous>, transform_indices = @transform_9, window_bounds = array<i64: 1, 128>}, {pipeline_mode = #tpu.pipeline_mode<synchronous>, transform_indices = @transform_10, window_bounds = array<i64: 128, 128>}, {pipeline_mode = #tpu.pipeline_mode<synchronous>, transform_indices = @transform_11, window_bounds = array<i64: 1, 128>}, {pipeline_mode = #tpu.pipeline_mode<synchronous>, transform_indices = @transform_12, window_bounds = array<i64: 128, 128>}, {pipeline_mode = #tpu.pipeline_mode<synchronous>, transform_indices = @transform_13, window_bounds = array<i64: 1, 128>}, {pipeline_mode = #tpu.pipeline_mode<synchronous>, transform_indices = @transform_14, window_bounds = array<i64: 8, 128>}]} {
    %c0_i32 = arith.constant 0 : i32
    %0 = arith.cmpi eq, %arg0, %c0_i32 : i32
    %1 = arith.extui %0 : i1 to i32
    %c0_i32_0 = arith.constant 0 : i32
    %2 = arith.cmpi ne, %1, %c0_i32_0 : i32
    scf.if %2 {
      %cst = arith.constant 0xFF800000 : f32
      %15 = vector.broadcast %cst : f32 to vector<512x128xf32>
      %c0 = arith.constant 0 : index
      %c0_7 = arith.constant 0 : index
      %16 = vector.load %arg16[%c0, %c0_7] : memref<512x128xf32, #tpu.memory_space<vmem>>, vector<512x128xf32>
      tpu.vector_store %arg16[%c0, %c0_7], %15 {strides = array<i32>} : memref<512x128xf32, #tpu.memory_space<vmem>>, vector<512x128xf32>,
    } else {
    }
    %c1_i32 = arith.constant 1 : i32
    %3 = arith.cmpi slt, %arg0, %c1_i32 : i32
    %4 = arith.extui %3 : i1 to i32
    %c0_i32_1 = arith.constant 0 : i32
    %5 = arith.cmpi ne, %4, %c0_i32_1 : i32
    scf.if %5 {
      %c0 = arith.constant 0 : index
      %c0_7 = arith.constant 0 : index
      %15 = vector.load %arg1[%c0, %c0_7] : memref<512x44xf32, #tpu.memory_space<vmem>>, vector<512x44xf32>
      %c0_8 = arith.constant 0 : index
      %c0_9 = arith.constant 0 : index
      %16 = vector.load %arg2[%c0_8, %c0_9] : memref<44x128xf32, #tpu.memory_space<vmem>>, vector<44x128xf32>
      %cst = arith.constant dense<0.000000e+00> : vector<512x128xf32>
      %17 = tpu.matmul %15, %16, %cst {dimension_numbers = #tpu.dot_dimension_numbers<[1], [0], [0], [1], [0, 0, 1, 1], [], []>} : vector<512x44xf32>, vector<44x128xf32>, vector<512x128xf32> -> vector<512x128xf32>
      %c1_i32_10 = arith.constant 1 : i32
      %18 = arith.addi %c1_i32_10, %arg0 : i32
      %c512_i32 = arith.constant 512 : i32
      %19 = arith.muli %18, %c512_i32 : i32
      %20 = tpu.iota {dimensions = array<i32: 0>} : vector<512x1xi32>
      %21 = vector.broadcast %19 : i32 to vector<512x1xi32>
      %22 = arith.addi %21, %20 : vector<512x1xi32>
      %c600_i32 = arith.constant 600 : i32
      %23 = vector.broadcast %c600_i32 : i32 to vector<512x1xi32>
      %24 = arith.cmpi sge, %22, %23 : vector<512x1xi32>
      %c1024_i32 = arith.constant 1024 : i32
      %25 = vector.broadcast %c1024_i32 : i32 to vector<512x1xi32>
      %26 = arith.cmpi slt, %22, %25 : vector<512x1xi32>
      %27 = arith.andi %24, %26 : vector<512x1xi1>
      %cst_11 = arith.constant 0xFF800000 : f32
      %28 = vector.shape_cast %27 : vector<512x1xi1> to vector<512x1xi1>
      %29 = vector.broadcast %28 : vector<512x1xi1> to vector<512x128xi1>
      %30 = vector.broadcast %cst_11 : f32 to vector<512x128xf32>
      %31 = arith.select %29, %17, %30 : vector<512x128xi1>, vector<512x128xf32>
      %c0_12 = arith.constant 0 : index
      %c0_13 = arith.constant 0 : index
      %32 = vector.load %arg16[%c0_12, %c0_13] : memref<512x128xf32, #tpu.memory_space<vmem>>, vector<512x128xf32>
      %33 = arith.maximumf %32, %31 : vector<512x128xf32>
      %c0_14 = arith.constant 0 : index
      %c0_15 = arith.constant 0 : index
      %34 = vector.load %arg16[%c0_14, %c0_15] : memref<512x128xf32, #tpu.memory_space<vmem>>, vector<512x128xf32>
      tpu.vector_store %arg16[%c0_14, %c0_15], %33 {strides = array<i32>} : memref<512x128xf32, #tpu.memory_space<vmem>>, vector<512x128xf32>,
    } else {
    }
    %c1_i32_2 = arith.constant 1 : i32
    %6 = arith.cmpi eq, %arg0, %c1_i32_2 : i32
    %7 = arith.extui %6 : i1 to i32
    %c0_i32_3 = arith.constant 0 : i32
    %8 = arith.cmpi ne, %7, %c0_i32_3 : i32
    scf.if %8 {
      %c0 = arith.constant 0 : index
      %c0_7 = arith.constant 0 : index
      %15 = vector.load %arg16[%c0, %c0_7] : memref<512x128xf32, #tpu.memory_space<vmem>>, vector<512x128xf32>
      %cst = arith.constant dense<0xFF800000> : vector<128xf32>
      %16 = vector.multi_reduction <maximumf>, %15, %cst [0] : vector<512x128xf32> to vector<128xf32>
      %17 = vector.shape_cast %16 : vector<128xf32> to vector<1x128xf32>
      %c0_8 = arith.constant 0 : index
      %c0_9 = arith.constant 0 : index
      %18 = vector.load %arg3[%c0_8, %c0_9] : memref<1x128xf32, #tpu.memory_space<vmem>>, vector<1x128xf32>
      %19 = arith.addf %17, %18 : vector<1x128xf32>
      %20 = vector.shape_cast %19 : vector<1x128xf32> to vector<1x128xf32>
      %21 = vector.broadcast %20 : vector<1x128xf32> to vector<8x128xf32>
      %c0_10 = arith.constant 0 : index
      %c0_11 = arith.constant 0 : index
      %22 = vector.load %arg5[%c0_10, %c0_11] : memref<128x128xf32, #tpu.memory_space<vmem>>, vector<128x128xf32>
      %cst_12 = arith.constant dense<0.000000e+00> : vector<8x128xf32>
      %23 = tpu.matmul %21, %22, %cst_12 {dimension_numbers = #tpu.dot_dimension_numbers<[1], [0], [0], [1], [0, 0, 1, 1], [], []>} : vector<8x128xf32>, vector<128x128xf32>, vector<8x128xf32> -> vector<8x128xf32>
      %c0_13 = arith.constant 0 : index
      %c0_14 = arith.constant 0 : index
      %24 = vector.load %arg6[%c0_13, %c0_14] : memref<1x128xf32, #tpu.memory_space<vmem>>, vector<1x128xf32>
      %25 = vector.extract_strided_slice %23 {offsets = [0, 0], sizes = [1, 128], strides = [1, 1]} : vector<8x128xf32> to vector<1x128xf32>
      %26 = arith.addf %24, %25 : vector<1x128xf32>
      %c0_15 = arith.constant 0 : index
      %c0_16 = arith.constant 0 : index
      %27 = vector.load %arg17[%c0_15, %c0_16] : memref<1x128xf32, #tpu.memory_space<vmem>>, vector<1x128xf32>
      tpu.vector_store %arg17[%c0_15, %c0_16], %26 {strides = array<i32>} : memref<1x128xf32, #tpu.memory_space<vmem>>, vector<1x128xf32>,
      %cst_17 = arith.constant 0xFF800000 : f32
      %28 = vector.broadcast %cst_17 : f32 to vector<512x128xf32>
      %c0_18 = arith.constant 0 : index
      %c0_19 = arith.constant 0 : index
      %29 = vector.load %arg16[%c0_18, %c0_19] : memref<512x128xf32, #tpu.memory_space<vmem>>, vector<512x128xf32>
      tpu.vector_store %arg16[%c0_18, %c0_19], %28 {strides = array<i32>} : memref<512x128xf32, #tpu.memory_space<vmem>>, vector<512x128xf32>,
    } else {
    }
    %c1_i32_4 = arith.constant 1 : i32
    %9 = arith.cmpi sge, %arg0, %c1_i32_4 : i32
    %10 = arith.extui %9 : i1 to i32
    %c0_i32_5 = arith.constant 0 : i32
    %11 = arith.cmpi ne, %10, %c0_i32_5 : i32
    scf.if %11 {
      %c0 = arith.constant 0 : index
      %c0_7 = arith.constant 0 : index
      %15 = vector.load %arg1[%c0, %c0_7] : memref<512x44xf32, #tpu.memory_space<vmem>>, vector<512x44xf32>
      %c0_8 = arith.constant 0 : index
      %c0_9 = arith.constant 0 : index
      %16 = vector.load %arg4[%c0_8, %c0_9] : memref<44x128xf32, #tpu.memory_space<vmem>>, vector<44x128xf32>
      %cst = arith.constant dense<0.000000e+00> : vector<512x128xf32>
      %17 = tpu.matmul %15, %16, %cst {dimension_numbers = #tpu.dot_dimension_numbers<[1], [0], [0], [1], [0, 0, 1, 1], [], []>} : vector<512x44xf32>, vector<44x128xf32>, vector<512x128xf32> -> vector<512x128xf32>
      %c0_10 = arith.constant 0 : index
      %c0_11 = arith.constant 0 : index
      %18 = vector.load %arg17[%c0_10, %c0_11] : memref<1x128xf32, #tpu.memory_space<vmem>>, vector<1x128xf32>
      %19 = vector.broadcast %18 : vector<1x128xf32> to vector<512x128xf32>
      %20 = arith.addf %17, %19 : vector<512x128xf32>
      %cst_12 = arith.constant 0.000000e+00 : f32
      %21 = vector.broadcast %cst_12 : f32 to vector<512x128xf32>
      %22 = arith.maximumf %20, %21 : vector<512x128xf32>
      %c0_13 = arith.constant 0 : index
      %c0_14 = arith.constant 0 : index
      %23 = vector.load %arg7[%c0_13, %c0_14] : memref<128x128xf32, #tpu.memory_space<vmem>>, vector<128x128xf32>
      %cst_15 = arith.constant dense<0.000000e+00> : vector<512x128xf32>
      %24 = tpu.matmul %22, %23, %cst_15 {dimension_numbers = #tpu.dot_dimension_numbers<[1], [0], [0], [1], [0, 0, 1, 1], [], []>} : vector<512x128xf32>, vector<128x128xf32>, vector<512x128xf32> -> vector<512x128xf32>
      %c0_16 = arith.constant 0 : index
      %c0_17 = arith.constant 0 : index
      %25 = vector.load %arg8[%c0_16, %c0_17] : memref<1x128xf32, #tpu.memory_space<vmem>>, vector<1x128xf32>
      %26 = vector.broadcast %25 : vector<1x128xf32> to vector<512x128xf32>
      %27 = arith.addf %24, %26 : vector<512x128xf32>
      %cst_18 = arith.constant 0.000000e+00 : f32
      %28 = vector.broadcast %cst_18 : f32 to vector<512x128xf32>
      %29 = arith.maximumf %27, %28 : vector<512x128xf32>
      %c1_i32_19 = arith.constant 1 : i32
      %30 = arith.subi %arg0, %c1_i32_19 : i32
      %c512_i32 = arith.constant 512 : i32
      %31 = arith.muli %30, %c512_i32 : i32
      %32 = tpu.iota {dimensions = array<i32: 0>} : vector<512x1xi32>
      %33 = vector.broadcast %31 : i32 to vector<512x1xi32>
      %34 = arith.addi %33, %32 : vector<512x1xi32>
      %c600_i32 = arith.constant 600 : i32
      %35 = vector.broadcast %c600_i32 : i32 to vector<512x1xi32>
      %36 = arith.cmpi slt, %34, %35 : vector<512x1xi32>
      %cst_20 = arith.constant 0xFF800000 : f32
      %37 = vector.shape_cast %36 : vector<512x1xi1> to vector<512x1xi1>
      %38 = vector.broadcast %37 : vector<512x1xi1> to vector<512x128xi1>
      %39 = vector.broadcast %cst_20 : f32 to vector<512x128xf32>
      %40 = arith.select %38, %29, %39 : vector<512x128xi1>, vector<512x128xf32>
      %c0_21 = arith.constant 0 : index
      %c0_22 = arith.constant 0 : index
      %41 = vector.load %arg16[%c0_21, %c0_22] : memref<512x128xf32, #tpu.memory_space<vmem>>, vector<512x128xf32>
      %42 = arith.maximumf %41, %40 : vector<512x128xf32>
      %c0_23 = arith.constant 0 : index
      %c0_24 = arith.constant 0 : index
      %43 = vector.load %arg16[%c0_23, %c0_24] : memref<512x128xf32, #tpu.memory_space<vmem>>, vector<512x128xf32>
      tpu.vector_store %arg16[%c0_23, %c0_24], %42 {strides = array<i32>} : memref<512x128xf32, #tpu.memory_space<vmem>>, vector<512x128xf32>,
    } else {
    }
    %c2_i32 = arith.constant 2 : i32
    %12 = arith.cmpi eq, %arg0, %c2_i32 : i32
    %13 = arith.extui %12 : i1 to i32
    %c0_i32_6 = arith.constant 0 : i32
    %14 = arith.cmpi ne, %13, %c0_i32_6 : i32
    scf.if %14 {
      %c0 = arith.constant 0 : index
      %c0_7 = arith.constant 0 : index
      %15 = vector.load %arg16[%c0, %c0_7] : memref<512x128xf32, #tpu.memory_space<vmem>>, vector<512x128xf32>
      %cst = arith.constant dense<0xFF800000> : vector<128xf32>
      %16 = vector.multi_reduction <maximumf>, %15, %cst [0] : vector<512x128xf32> to vector<128xf32>
      %17 = vector.shape_cast %16 : vector<128xf32> to vector<1x128xf32>
      %18 = vector.shape_cast %17 : vector<1x128xf32> to vector<1x128xf32>
      %19 = vector.broadcast %18 : vector<1x128xf32> to vector<8x128xf32>
      %c0_8 = arith.constant 0 : index
      %c0_9 = arith.constant 0 : index
      %20 = vector.load %arg9[%c0_8, %c0_9] : memref<128x128xf32, #tpu.memory_space<vmem>>, vector<128x128xf32>
      %cst_10 = arith.constant dense<0.000000e+00> : vector<8x128xf32>
      %21 = tpu.matmul %19, %20, %cst_10 {dimension_numbers = #tpu.dot_dimension_numbers<[1], [0], [0], [1], [0, 0, 1, 1], [], []>} : vector<8x128xf32>, vector<128x128xf32>, vector<8x128xf32> -> vector<8x128xf32>
      %c0_11 = arith.constant 0 : index
      %c0_12 = arith.constant 0 : index
      %22 = vector.load %arg10[%c0_11, %c0_12] : memref<1x128xf32, #tpu.memory_space<vmem>>, vector<1x128xf32>
      %23 = vector.broadcast %22 : vector<1x128xf32> to vector<8x128xf32>
      %24 = arith.addf %21, %23 : vector<8x128xf32>
      %cst_13 = arith.constant 0.000000e+00 : f32
      %25 = vector.broadcast %cst_13 : f32 to vector<8x128xf32>
      %26 = arith.maximumf %24, %25 : vector<8x128xf32>
      %c0_14 = arith.constant 0 : index
      %c0_15 = arith.constant 0 : index
      %27 = vector.load %arg11[%c0_14, %c0_15] : memref<128x128xf32, #tpu.memory_space<vmem>>, vector<128x128xf32>
      %cst_16 = arith.constant dense<0.000000e+00> : vector<8x128xf32>
      %28 = tpu.matmul %26, %27, %cst_16 {dimension_numbers = #tpu.dot_dimension_numbers<[1], [0], [0], [1], [0, 0, 1, 1], [], []>} : vector<8x128xf32>, vector<128x128xf32>, vector<8x128xf32> -> vector<8x128xf32>
      %c0_17 = arith.constant 0 : index
      %c0_18 = arith.constant 0 : index
      %29 = vector.load %arg12[%c0_17, %c0_18] : memref<1x128xf32, #tpu.memory_space<vmem>>, vector<1x128xf32>
      %30 = vector.broadcast %29 : vector<1x128xf32> to vector<8x128xf32>
      %31 = arith.addf %28, %30 : vector<8x128xf32>
      %cst_19 = arith.constant 0.000000e+00 : f32
      %32 = vector.broadcast %cst_19 : f32 to vector<8x128xf32>
      %33 = arith.maximumf %31, %32 : vector<8x128xf32>
      %c0_20 = arith.constant 0 : index
      %c0_21 = arith.constant 0 : index
      %34 = vector.load %arg13[%c0_20, %c0_21] : memref<128x128xf32, #tpu.memory_space<vmem>>, vector<128x128xf32>
      %cst_22 = arith.constant dense<0.000000e+00> : vector<8x128xf32>
      %35 = tpu.matmul %33, %34, %cst_22 {dimension_numbers = #tpu.dot_dimension_numbers<[1], [0], [0], [1], [0, 0, 1, 1], [], []>} : vector<8x128xf32>, vector<128x128xf32>, vector<8x128xf32> -> vector<8x128xf32>
      %c0_23 = arith.constant 0 : index
      %c0_24 = arith.constant 0 : index
      %36 = vector.load %arg14[%c0_23, %c0_24] : memref<1x128xf32, #tpu.memory_space<vmem>>, vector<1x128xf32>
      %37 = vector.broadcast %36 : vector<1x128xf32> to vector<8x128xf32>
      %38 = arith.addf %35, %37 : vector<8x128xf32>
      %c0_25 = arith.constant 0 : index
      %c0_26 = arith.constant 0 : index
      %39 = vector.load %arg15[%c0_25, %c0_26] : memref<8x128xf32, #tpu.memory_space<vmem>>, vector<8x128xf32>
      tpu.vector_store %arg15[%c0_25, %c0_26], %38 {strides = array<i32>} : memref<8x128xf32, #tpu.memory_space<vmem>>, vector<8x128xf32>,
    } else {
    }
    return
  }
  func.func @transform_0(%arg0: i32) -> (i32, i32) {
    %c1_i32 = arith.constant 1 : i32
    %0 = arith.cmpi slt, %arg0, %c1_i32 : i32
    %c1_i32_0 = arith.constant 1 : i32
    %1 = arith.addi %c1_i32_0, %arg0 : i32
    %c1_i32_1 = arith.constant 1 : i32
    %2 = arith.subi %arg0, %c1_i32_1 : i32
    %3 = arith.select %0, %1, %2 : i32
    %c0_i32 = arith.constant 0 : i32
    %c0_i32_2 = arith.constant 0 : i32
    return %3, %c0_i32 : i32, i32
  }
  func.func @transform_1(%arg0: i32) -> (i32, i32) {
    %c0_i32 = arith.constant 0 : i32
    %c0_i32_0 = arith.constant 0 : i32
    %c0_i32_1 = arith.constant 0 : i32
    return %c0_i32, %c0_i32_0 : i32, i32
  }
  func.func @transform_2(%arg0: i32) -> (i32, i32) {
    %c0_i32 = arith.constant 0 : i32
    %c0_i32_0 = arith.constant 0 : i32
    %c0_i32_1 = arith.constant 0 : i32
    return %c0_i32, %c0_i32_0 : i32, i32
  }
  func.func @transform_3(%arg0: i32) -> (i32, i32) {
    %c0_i32 = arith.constant 0 : i32
    %c0_i32_0 = arith.constant 0 : i32
    %c0_i32_1 = arith.constant 0 : i32
    return %c0_i32, %c0_i32_0 : i32, i32
  }
  func.func @transform_4(%arg0: i32) -> (i32, i32) {
    %c0_i32 = arith.constant 0 : i32
    %c0_i32_0 = arith.constant 0 : i32
    %c0_i32_1 = arith.constant 0 : i32
    return %c0_i32, %c0_i32_0 : i32, i32
  }
  func.func @transform_5(%arg0: i32) -> (i32, i32) {
    %c0_i32 = arith.constant 0 : i32
    %c0_i32_0 = arith.constant 0 : i32
    %c0_i32_1 = arith.constant 0 : i32
    return %c0_i32, %c0_i32_0 : i32, i32
  }
  func.func @transform_6(%arg0: i32) -> (i32, i32) {
    %c0_i32 = arith.constant 0 : i32
    %c0_i32_0 = arith.constant 0 : i32
    %c0_i32_1 = arith.constant 0 : i32
    return %c0_i32, %c0_i32_0 : i32, i32
  }
  func.func @transform_7(%arg0: i32) -> (i32, i32) {
    %c0_i32 = arith.constant 0 : i32
    %c0_i32_0 = arith.constant 0 : i32
    %c0_i32_1 = arith.constant 0 : i32
    return %c0_i32, %c0_i32_0 : i32, i32
  }
  func.func @transform_8(%arg0: i32) -> (i32, i32) {
    %c0_i32 = arith.constant 0 : i32
    %c0_i32_0 = arith.constant 0 : i32
    %c0_i32_1 = arith.constant 0 : i32
    return %c0_i32, %c0_i32_0 : i32, i32
  }
  func.func @transform_9(%arg0: i32) -> (i32, i32) {
    %c0_i32 = arith.constant 0 : i32
    %c0_i32_0 = arith.constant 0 : i32
    %c0_i32_1 = arith.constant 0 : i32
    return %c0_i32, %c0_i32_0 : i32, i32
  }
  func.func @transform_10(%arg0: i32) -> (i32, i32) {
    %c0_i32 = arith.constant 0 : i32
    %c0_i32_0 = arith.constant 0 : i32
    %c0_i32_1 = arith.constant 0 : i32
    return %c0_i32, %c0_i32_0 : i32, i32
  }
  func.func @transform_11(%arg0: i32) -> (i32, i32) {
    %c0_i32 = arith.constant 0 : i32
    %c0_i32_0 = arith.constant 0 : i32
    %c0_i32_1 = arith.constant 0 : i32
    return %c0_i32, %c0_i32_0 : i32, i32
  }
  func.func @transform_12(%arg0: i32) -> (i32, i32) {
    %c0_i32 = arith.constant 0 : i32
    %c0_i32_0 = arith.constant 0 : i32
    %c0_i32_1 = arith.constant 0 : i32
    return %c0_i32, %c0_i32_0 : i32, i32
  }
  func.func @transform_13(%arg0: i32) -> (i32, i32) {
    %c0_i32 = arith.constant 0 : i32
    %c0_i32_0 = arith.constant 0 : i32
    %c0_i32_1 = arith.constant 0 : i32
    return %c0_i32, %c0_i32_0 : i32, i32
  }
  func.func @transform_14(%arg0: i32) -> (i32, i32) {
    %c0_i32 = arith.constant 0 : i32
    %c0_i32_0 = arith.constant 0 : i32
    %c0_i32_1 = arith.constant 0 : i32
    return %c0_i32, %c0_i32_0 : i32, i32
  }
}

</mosaic_0001>

<bundles_post_ra>
// kernel: tpu_custom_call.1
= control target key start
LH: loop header
LB: loop body
LE: loop exit
PB: predicated region body
PF: predicated region fallthrough
CT: control target
= control target key end

     0   :  { %19 = vsyncpa [#allocation5], 0  ;;  %s5714_s29 = smov 0   ;;  %s7844_s0 = inlined_call_operand.vmem [shape: f32[1024,44], index: 0, kind: input, shape index: {}]   ;;  %s7845_s1 = inlined_call_operand.vmem [shape: f32[44,128], index: 1, kind: input, shape index: {}]   ;;  %s7846_s2 = inlined_call_operand.vmem [shape: f32[1,128], index: 2, kind: input, shape index: {}]   ;;  %s7847_s3 = inlined_call_operand.vmem [shape: f32[44,128], index: 3, kind: input, shape index: {}]   ;;  %s7848_s4 = inlined_call_operand.vmem [shape: f32[128,128], index: 4, kind: input, shape index: {}]   ;;  %s7849_s5 = inlined_call_operand.vmem [shape: f32[1,128], index: 5, kind: input, shape index: {}]   ;;  %s7850_s6 = inlined_call_operand.vmem [shape: f32[128,128], index: 6, kind: input, shape index: {}]   ;;  %s7851_s7 = inlined_call_operand.vmem [shape: f32[1,128], index: 7, kind: input, shape index: {}]   ;;  %s7852_s8 = inlined_call_operand.vmem [shape: f32[128,128], index: 8, kind: input, shape index: {}]   ;;  %s7853_s9 = inlined_call_operand.vmem [shape: f32[1,128], index: 9, kind: input, shape index: {}]   ;;  %s7854_s10 = inlined_call_operand.vmem [shape: f32[128,128], index: 10, kind: input, shape index: {}]   ;;  %s7855_s11 = inlined_call_operand.vmem [shape: f32[1,128], index: 11, kind: input, shape index: {}]   ;;  %s7856_s12 = inlined_call_operand.vmem [shape: f32[128,128], index: 12, kind: input, shape index: {}]   ;;  %s7857_s13 = inlined_call_operand.vmem [shape: f32[1,128], index: 13, kind: input, shape index: {}]   ;;  %s7858_s14 = inlined_call_operand.hbm [shape: f32[8,128], index: 14, kind: output, shape index: {}]  }
   0x1 LB: > { %s5720_s30 = sadd.s32 4294967295, %s5626_s29   ;;  %p4461_p0 = scmp.ge.s32.totalorder %s5626_s29, 1  ;;  %s5626_s29 = sphi %s5714_s29, %s25_s29  }
   0x2   : > { %p425_p1 = scmp.lt.s32.totalorder %s5626_s29, 4 }
   0x4   : > { %p426_p2 = pnand %p4461_p0, %p425_p1 }
   0x5   : > { %p470_p3 = scmp.lt.s32.totalorder (!%p426_p2), %s5720_s30, 1  ;;  %s471_s15 = sadd.s32 (!%p426_p2), 1, %s5720_s30 }
   0x6   : > { %429 = sbr.rel (%p426_p2) target bundleno = 1937 (0x791), region = 76  ;;  %s4462_s16 = sadd.s32 (!%p426_p2), 4294967295, %s5720_s30 }
   0x7   : > { %p4465_p5 = scmp.ne.s32.totalorder (!%p426_p2), %s5720_s30, 0 }
   0xd   : > { %s8057_s15 = smov (!%p470_p3, %s471_s15), %s4462_s16  ;;  %487 = sbr.rel (%p4465_p5) target bundleno = 47 (0x2f), region = 80 }
   0xe   : > { %s4463_s17 = sshll.u32 %s8057_s15, 6  ;;  %v5628_v0 = vmov (!%p4465_p5), -inf  }
   0xf   : > { %p475_p4 = scmp.lt.s32.totalorder %s4463_s17, 127  ;;  %488 = vst [vmem:[#allocation2] sm:$0xff] (!%p4465_p5), %v5628_v0  ;;  %489 = vst [vmem:[#allocation2 + $0x8] sm:$0xff] (!%p4465_p5), %v5628_v0 }
  0x10   : > { %490 = vst [vmem:[#allocation2 + $0x10] sm:$0xff] (!%p4465_p5), %v5628_v0  ;;  %491 = vst [vmem:[#allocation2 + $0x18] sm:$0xff] (!%p4465_p5), %v5628_v0 }
  0x11   : > { %s8059_s17 = smov (!%p475_p4, %s4463_s17), 127  ;;  %492 = vst [vmem:[#allocation2 + $0x20] sm:$0xff] (!%p4465_p5), %v5628_v0  ;;  %493 = vst [vmem:[#allocation2 + $0x28] sm:$0xff] (!%p4465_p5), %v5628_v0 }
  0x12   : > { %s4464_s18 = sshll.u32 %s8059_s17, 3  ;;  %494 = vst [vmem:[#allocation2 + $0x30] sm:$0xff] (!%p4465_p5), %v5628_v0  ;;  %495 = vst [vmem:[#allocation2 + $0x38] sm:$0xff] (!%p4465_p5), %v5628_v0 }
  0x13   : > { %s5734_s21 = scalar_lea.vmem %s7844_s0, %s4464_s18  ;;  %496 = vst [vmem:[#allocation2 + $0x40] sm:$0xff] (!%p4465_p5), %v5628_v0  ;;  %497 = vst [vmem:[#allocation2 + $0x48] sm:$0xff] (!%p4465_p5), %v5628_v0 }
  0x14   : > { %498 = vst [vmem:[#allocation2 + $0x50] sm:$0xff] %v5628_v0  ;;  %499 = vst [vmem:[#allocation2 + $0x58] sm:$0xff] %v5628_v0 }
  0x15   : > { %500 = vst [vmem:[#allocation2 + $0x60] sm:$0xff] %v5628_v0  ;;  %501 = vst [vmem:[#allocation2 + $0x68] sm:$0xff] %v5628_v0 }
  0x16   : > { %502 = vst [vmem:[#allocation2 + $0x70] sm:$0xff] %v5628_v0  ;;  %503 = vst [vmem:[#allocation2 + $0x78] sm:$0xff] %v5628_v0 }
  0x17   : > { %504 = vst [vmem:[#allocation2 + $0x80] sm:$0xff] %v5628_v0  ;;  %505 = vst [vmem:[#allocation2 + $0x88] sm:$0xff] %v5628_v0 }
  0x18   : > { %506 = vst [vmem:[#allocation2 + $0x90] sm:$0xff] %v5628_v0  ;;  %507 = vst [vmem:[#allocation2 + $0x98] sm:$0xff] %v5628_v0 }
  0x19   : > { %508 = vst [vmem:[#allocation2 + $0xa0] sm:$0xff] %v5628_v0  ;;  %509 = vst [vmem:[#allocation2 + $0xa8] sm:$0xff] %v5628_v0 }
  0x1a   : > { %510 = vst [vmem:[#allocation2 + $0xb0] sm:$0xff] %v5628_v0  ;;  %511 = vst [vmem:[#allocation2 + $0xb8] sm:$0xff] %v5628_v0 }
  0x1b   : > { %512 = vst [vmem:[#allocation2 + $0xc0] sm:$0xff] %v5628_v0  ;;  %513 = vst [vmem:[#allocation2 + $0xc8] sm:$0xff] %v5628_v0 }
  0x1c   : > { %514 = vst [vmem:[#allocation2 + $0xd0] sm:$0xff] %v5628_v0  ;;  %515 = vst [vmem:[#allocation2 + $0xd8] sm:$0xff] %v5628_v0 }
  0x1d   : > { %516 = vst [vmem:[#allocation2 + $0xe0] sm:$0xff] %v5628_v0  ;;  %517 = vst [vmem:[#allocation2 + $0xe8] sm:$0xff] %v5628_v0 }
  0x1e   : > { %518 = vst [vmem:[#allocation2 + $0xf0] sm:$0xff] %v5628_v0  ;;  %519 = vst [vmem:[#allocation2 + $0xf8] sm:$0xff] %v5628_v0 }
  0x1f   : > { %520 = vst [vmem:[#allocation2 + $0x100] sm:$0xff] %v5628_v0  ;;  %521 = vst [vmem:[#allocation2 + $0x108] sm:$0xff] %v5628_v0 }
  0x20   : > { %522 = vst [vmem:[#allocation2 + $0x110] sm:$0xff] %v5628_v0  ;;  %523 = vst [vmem:[#allocation2 + $0x118] sm:$0xff] %v5628_v0 }
  0x21   : > { %524 = vst [vmem:[#allocation2 + $0x120] sm:$0xff] %v5628_v0  ;;  %525 = vst [vmem:[#allocation2 + $0x128] sm:$0xff] %v5628_v0 }
  0x22   : > { %526 = vst [vmem:[#allocation2 + $0x130] sm:$0xff] %v5628_v0  ;;  %527 = vst [vmem:[#allocation2 + $0x138] sm:$0xff] %v5628_v0 }
  0x23   : > { %528 = vst [vmem:[#allocation2 + $0x140] sm:$0xff] %v5628_v0  ;;  %529 = vst [vmem:[#allocation2 + $0x148] sm:$0xff] %v5628_v0 }
  0x24   : > { %530 = vst [vmem:[#allocation2 + $0x150] sm:$0xff] %v5628_v0  ;;  %531 = vst [vmem:[#allocation2 + $0x158] sm:$0xff] %v5628_v0 }
  0x25   : > { %532 = vst [vmem:[#allocation2 + $0x160] sm:$0xff] %v5628_v0  ;;  %533 = vst [vmem:[#allocation2 + $0x168] sm:$0xff] %v5628_v0 }
  0x26   : > { %534 = vst [vmem:[#allocation2 + $0x170] sm:$0xff] %v5628_v0  ;;  %535 = vst [vmem:[#allocation2 + $0x178] sm:$0xff] %v5628_v0 }
  0x27   : > { %536 = vst [vmem:[#allocation2 + $0x180] sm:$0xff] %v5628_v0  ;;  %537 = vst [vmem:[#allocation2 + $0x188] sm:$0xff] %v5628_v0 }
  0x28   : > { %538 = vst [vmem:[#allocation2 + $0x190] sm:$0xff] %v5628_v0  ;;  %539 = vst [vmem:[#allocation2 + $0x198] sm:$0xff] %v5628_v0 }
  0x29   : > { %540 = vst [vmem:[#allocation2 + $0x1a0] sm:$0xff] %v5628_v0  ;;  %541 = vst [vmem:[#allocation2 + $0x1a8] sm:$0xff] %v5628_v0 }
  0x2a   : > { %542 = vst [vmem:[#allocation2 + $0x1b0] sm:$0xff] %v5628_v0  ;;  %543 = vst [vmem:[#allocation2 + $0x1b8] sm:$0xff] %v5628_v0 }
  0x2b   : > { %544 = vst [vmem:[#allocation2 + $0x1c0] sm:$0xff] %v5628_v0  ;;  %545 = vst [vmem:[#allocation2 + $0x1c8] sm:$0xff] %v5628_v0 }
  0x2c   : > { %546 = vst [vmem:[#allocation2 + $0x1d0] sm:$0xff] %v5628_v0  ;;  %547 = vst [vmem:[#allocation2 + $0x1d8] sm:$0xff] %v5628_v0 }
  0x2d   : > { %548 = vst [vmem:[#allocation2 + $0x1e0] sm:$0xff] %v5628_v0  ;;  %549 = vst [vmem:[#allocation2 + $0x1e8] sm:$0xff] %v5628_v0 }
  0x2e   : > { %550 = vst [vmem:[#allocation2 + $0x1f0] sm:$0xff] %v5628_v0  ;;  %551 = vst [vmem:[#allocation2 + $0x1f8] sm:$0xff] %v5628_v0 }
  0x2f PF: > { %p4466_p6 = scmp.ge.s32.totalorder %s5720_s30, 1 }
  0x30   : > { %v620_v1 = vld [vmem:[%s7845_s1] sm:$0xff] (!%p4466_p6)  ;;  %v621_v2 = vld [vmem:[%s7845_s1 + $0x8] sm:$0xff] (!%p4466_p6)  ;;  %v622_v3 = vld [vmem:[%s7845_s1 + $0x10] sm:$0xff] (!%p4466_p6)  ;;  %vm819_vm0 = vcmask (!%p4466_p6), 1043456   ;;  %vm626_vm1 = vcmask (!%p4466_p6), 359424   ;;  %vm5629_vm2 = vmmov (!%p4466_p6), 1  }
  0x31   : > { %555 = sbr.rel (%p4466_p6) target bundleno = 357 (0x165), region = 84  ;;  %v5386_v4 = vpack.c.bf16 (!%p4466_p6), %v621_v2, %v620_v1  ;;  %v623_v5 = vld [vmem:[%s7845_s1 + $0x18] sm:$0xff] (!%p4466_p6)  ;;  %v624_v7 = vld [vmem:[%s7845_s1 + $0x20] sm:$0xff] (!%p4466_p6)  ;;  %v625_v8 = vld [vmem:[%s7845_s1 + $0x28] sm:$0xf] (!%p4466_p6)  ;;  %s4612_s22 = sshll.u32 (!%p4466_p6), %s5720_s30, 9 }
  0x32   : > { %v5390_v6 = vpack.c.bf16 (!%p4466_p6), %v623_v5, %v622_v3  ;;  %v556_v9 = vld [vmem:[%s5734_s21] sm:$0xff] (!%p4466_p6)  ;;  %v5394_v11 = vpack.c.bf16 (!%p4466_p6), %v625_v8, %v624_v7  ;;  %vm5395_vm3 = vmpackc.low (!%p4466_p6), %vm819_vm0, %vm5629_vm2  ;;  %v557_v12 = vld [vmem:[%s5734_s21 + $0x8] sm:$0xff] (!%p4466_p6)  ;;  %s4613_s23 = sadd.s32 (!%p4466_p6), 512, %s4612_s22 }
  0x33   : > { %5387 = vmatprep.subr.bf16.mxu0 (!%p4466_p6), %v5386_v4  ;;  %5542 = vmatprep.subr.bf16.mxu1 (!%p4466_p6), %v5386_v4  ;;  %v588_v10 = vld [vmem:[%s5734_s21 + $0x100] sm:$0xff] (!%p4466_p6)  ;;  %v589_v13 = vld [vmem:[%s5734_s21 + $0x108] sm:$0xff] (!%p4466_p6)  ;;  %v558_v14 = vld [vmem:[%s5734_s21 + $0x10] sm:$0xff] (!%p4466_p6) }
  0x34   : > { %5389 = vmatpush3.bf16.msra.mxu0 (!%p4466_p6), %v5386_v4  ;;  %5545 = vmatpush3.bf16.msra.mxu1 (!%p4466_p6), %v5386_v4  ;;  %v590_v15 = vld [vmem:[%s5734_s21 + $0x110] sm:$0xff] (!%p4466_p6)  ;;  %v559_v16 = vld [vmem:[%s5734_s21 + $0x18] sm:$0xff] (!%p4466_p6)  ;;  %v560_v18 = vld [vmem:[%s5734_s21 + $0x20] sm:$0xff] (!%p4466_p6) }
  0x35   : > { %5391 = vmatprep.subr.bf16.mxu0 (!%p4466_p6), %v5390_v6  ;;  %5543 = vmatprep.subr.bf16.mxu1 (!%p4466_p6), %v5390_v6  ;;  %v591_v17 = vld [vmem:[%s5734_s21 + $0x118] sm:$0xff] (!%p4466_p6)  ;;  %v592_v19 = vld [vmem:[%s5734_s21 + $0x120] sm:$0xff] (!%p4466_p6)  ;;  %v561_v20 = vld [vmem:[%s5734_s21 + $0x28] sm:$0xff] (!%p4466_p6) }
  0x36   : > { %4914 = vmatprep.mubr.msk.f32.mxu0 (!%p4466_p6), %vm626_vm1, %v556_v9  ;;  %4962 = vmatprep.mubr.msk.f32.mxu1 (!%p4466_p6), %vm626_vm1, %v588_v10  ;;  %v593_v21 = vld [vmem:[%s5734_s21 + $0x128] sm:$0xff] (!%p4466_p6)  ;;  %v562_v22 = vld [vmem:[%s5734_s21 + $0x30] sm:$0xff] (!%p4466_p6)  ;;  %v563_v24 = vld [vmem:[%s5734_s21 + $0x38] sm:$0xff] (!%p4466_p6)  ;;  %v1210_v10 = vlaneseq (!%p4466_p6) }
  0x37   : > { %v594_v23 = vld [vmem:[%s5734_s21 + $0x130] sm:$0xff] (!%p4466_p6)  ;;  %v595_v25 = vld [vmem:[%s5734_s21 + $0x138] sm:$0xff] (!%p4466_p6)  ;;  %v564_v26 = vld [vmem:[%s5734_s21 + $0x40] sm:$0xff] (!%p4466_p6) }
  0x38   : > { %5393 = vmatpush3.bf16.msra.mxu0 %v5390_v6  ;;  %5546 = vmatpush3.bf16.msra.mxu1 %v5390_v6  ;;  %v596_v27 = vld [vmem:[%s5734_s21 + $0x140] sm:$0xff]  ;;  %v565_v28 = vld [vmem:[%s5734_s21 + $0x48] sm:$0xff]  ;;  %v566_v30 = vld [vmem:[%s5734_s21 + $0x50] sm:$0xff] }
  0x39   : > { %5396 = vmatprep.subr.msk.bf16.mxu0 %vm5395_vm3, %v5394_v11  ;;  %5544 = vmatprep.subr.msk.bf16.mxu1 %vm5395_vm3, %v5394_v11  ;;  %v597_v29 = vld [vmem:[%s5734_s21 + $0x148] sm:$0xff]  ;;  %v598_v31 = vld [vmem:[%s5734_s21 + $0x150] sm:$0xff]  ;;  %v567_v32 = vld [vmem:[%s5734_s21 + $0x58] sm:$0xff] }
  0x3a   : > { %v599_v33 = vld [vmem:[%s5734_s21 + $0x158] sm:$0xff]  ;;  %v568_v34 = vld [vmem:[%s5734_s21 + $0x60] sm:$0xff]  ;;  %v569_v36 = vld [vmem:[%s5734_s21 + $0x68] sm:$0xff] }
  0x3b   : > { %v600_v35 = vld [vmem:[%s5734_s21 + $0x160] sm:$0xff]  ;;  %v601_v37 = vld [vmem:[%s5734_s21 + $0x168] sm:$0xff]  ;;  %v570_v38 = vld [vmem:[%s5734_s21 + $0x70] sm:$0xff] }
  0x3c   : > { %5399 = vmatpush3.bf16.msk.msra.mxu0 %vm5395_vm3, %v5394_v11  ;;  %5547 = vmatpush3.bf16.msk.msra.mxu1 %vm5395_vm3, %v5394_v11  ;;  %v602_v39 = vld [vmem:[%s5734_s21 + $0x170] sm:$0xff]  ;;  %v571_v40 = vld [vmem:[%s5734_s21 + $0x78] sm:$0xff]  ;;  %v572_v42 = vld [vmem:[%s5734_s21 + $0x80] sm:$0xff]  ;;  %v5949_v11 = vshrl.u32 %v1210_v10, 7 }
  0x3d   : > { %v603_v41 = vld [vmem:[%s5734_s21 + $0x178] sm:$0xff]  ;;  %v604_v43 = vld [vmem:[%s5734_s21 + $0x180] sm:$0xff]  ;;  %v573_v44 = vld [vmem:[%s5734_s21 + $0x88] sm:$0xff] }
  0x3e   : > { %v605_v45 = vld [vmem:[%s5734_s21 + $0x188] sm:$0xff]  ;;  %v574_v46 = vld [vmem:[%s5734_s21 + $0x90] sm:$0xff]  ;;  %v575_v48 = vld [vmem:[%s5734_s21 + $0x98] sm:$0xff] }
  0x3f   : > { %4915 = vmatmul.mubr.msk.f32.vlgmr.msra.gmra.mrb[0].mxu0 %vm626_vm1, %v557_v12  ;;  %4963 = vmatmul.mubr.msk.f32.vlgmr.msra.gmra.mrb[0].mxu1 %vm626_vm1, %v589_v13  ;;  %v606_v47 = vld [vmem:[%s5734_s21 + $0x190] sm:$0xff]  ;;  %v607_v49 = vld [vmem:[%s5734_s21 + $0x198] sm:$0xff]  ;;  %v576_v50 = vld [vmem:[%s5734_s21 + $0xa0] sm:$0xff]  ;;  %v1212_v12 = vadd.s32 8, %v5949_v11  ;;  %v5952_v13 = vstv %s4613_s23 }
  0x40   : > { %4917 = vmatprep.mubr.msk.f32.mxu0 %vm626_vm1, %v558_v14  ;;  %4965 = vmatprep.mubr.msk.f32.mxu1 %vm626_vm1, %v590_v15  ;;  %v608_v51 = vld [vmem:[%s5734_s21 + $0x1a0] sm:$0xff]  ;;  %v577_v52 = vld [vmem:[%s5734_s21 + $0xa8] sm:$0xff]  ;;  %v578_v54 = vld [vmem:[%s5734_s21 + $0xb0] sm:$0xff]  ;;  %v1244_v14 = vadd.s32 264, %v5949_v11  ;;  %v1243_v15 = vadd.s32 256, %v5949_v11 }
  0x41   : > { %v609_v53 = vld [vmem:[%s5734_s21 + $0x1a8] sm:$0xff]  ;;  %v610_v55 = vld [vmem:[%s5734_s21 + $0x1b0] sm:$0xff]  ;;  %v579_v56 = vld [vmem:[%s5734_s21 + $0xb8] sm:$0xff] }
  0x42   : > { %v611_v57 = vld [vmem:[%s5734_s21 + $0x1b8] sm:$0xff]  ;;  %v580_v58 = vld [vmem:[%s5734_s21 + $0xc0] sm:$0xff]  ;;  %v581_v60 = vld [vmem:[%s5734_s21 + $0xc8] sm:$0xff] }
  0x43   : > { %4918 = vmatmul.mubr.msk.f32.gmra.mrb[2].mxu0 %vm626_vm1, %v559_v16  ;;  %4966 = vmatmul.mubr.msk.f32.gmra.mrb[2].mxu1 %vm626_vm1, %v591_v17  ;;  %v612_v59 = vld [vmem:[%s5734_s21 + $0x1c0] sm:$0xff]  ;;  %v613_v61 = vld [vmem:[%s5734_s21 + $0x1c8] sm:$0xff]  ;;  %v582_v62 = vld [vmem:[%s5734_s21 + $0xd0] sm:$0xff]  ;;  %v1277_v16 = vadd.s32 %v5952_v13, %v1212_v12  ;;  %v1214_v17 = vadd.s32 24, %v5949_v11  ;;  %v1256_v12 = vadd.s32 360, %v5949_v11 }
  0x44   : > { %4920 = vmatprep.mubr.msk.f32.mxu0 %vm626_vm1, %v560_v18  ;;  %4968 = vmatprep.mubr.msk.f32.mxu1 %vm626_vm1, %v592_v19  ;;  %v614_v63 = vld [vmem:[%s5734_s21 + $0x1d0] sm:$0xff]  ;;  %v583_v0 = vld [vmem:[%s5734_s21 + $0xd8] sm:$0xff]  ;;  %v584_v2 = vld [vmem:[%s5734_s21 + $0xe0] sm:$0xff]  ;;  %v1309_v18 = vadd.s32 %v5952_v13, %v1244_v14  ;;  %v1246_v19 = vadd.s32 280, %v5949_v11  ;;  %v1223_v14 = vadd.s32 96, %v5949_v11 }
  0x45   : > { %v615_v1 = vld [vmem:[%s5734_s21 + $0x1d8] sm:$0xff]  ;;  %v616_v3 = vld [vmem:[%s5734_s21 + $0x1e0] sm:$0xff]  ;;  %v585_v4 = vld [vmem:[%s5734_s21 + $0xe8] sm:$0xff]  ;;  %vm1341_vm4 = vcmp.ge.s32.totalorder %v1277_v16, 600  ;;  %vm1405_vm5 = vcmp.lt.s32.totalorder %v1277_v16, 1024 }
  0x46   : > { %v617_v5 = vld [vmem:[%s5734_s21 + $0x1e8] sm:$0xff]  ;;  %v586_v6 = vld [vmem:[%s5734_s21 + $0xf0] sm:$0xff]  ;;  %v587_v8 = vld [vmem:[%s5734_s21 + $0xf8] sm:$0xff]  ;;  %vm1373_vm6 = vcmp.ge.s32.totalorder %v1309_v18, 600  ;;  %vm1437_vm7 = vcmp.lt.s32.totalorder %v1309_v18, 1024 }
  0x47   : > { %4921 = vmatmul.mubr.msk.f32.gmra.mrb[4].mxu0 %vm626_vm1, %v561_v20  ;;  %4969 = vmatmul.mubr.msk.f32.gmra.mrb[4].mxu1 %vm626_vm1, %v593_v21  ;;  %v618_v7 = vld [vmem:[%s5734_s21 + $0x1f0] sm:$0xff]  ;;  %v619_v9 = vld [vmem:[%s5734_s21 + $0x1f8] sm:$0xff]  ;;  %v1276_v20 = vadd.s32 %v5952_v13, %v5949_v11  ;;  %v1213_v21 = vadd.s32 16, %v5949_v11  ;;  %vm6029_vm14 = vmand %vm1341_vm4, %vm1405_vm5 }
  0x48   : > { %4923 = vmatprep.mubr.msk.f32.mxu0 %vm626_vm1, %v562_v22  ;;  %4971 = vmatprep.mubr.msk.f32.mxu1 %vm626_vm1, %v594_v23  ;;  %v5964_v22 = vadd.s32 %v5952_v13, %v1243_v15  ;;  %v1245_v23 = vadd.s32 272, %v5949_v11  ;;  %vm6041_vm3 = vmand %vm1373_vm6, %vm1437_vm7 }
  0x49   : > { %vm1340_vm8 = vcmp.ge.s32.totalorder %v1276_v20, 600  ;;  %vm1404_vm9 = vcmp.lt.s32.totalorder %v1276_v20, 1024 }
  0x4a   : > { %vm1372_vm10 = vcmp.ge.s32.totalorder %v5964_v22, 600  ;;  %vm1436_vm11 = vcmp.lt.s32.totalorder %v5964_v22, 1024  ;;  %v1727_v22 = vld [vmem:[#allocation2 + $0x18] sm:$0xff] }
  0x4b   : > { %4924 = vmatmul.mubr.msk.f32.gmra.mrb[6].mxu0 %vm626_vm1, %v563_v24  ;;  %4972 = vmatmul.mubr.msk.f32.gmra.mrb[6].mxu1 %vm626_vm1, %v595_v25  ;;  %v5968_v24 = vadd.s32 %v5952_v13, %v1214_v17  ;;  %v1216_v25 = vadd.s32 40, %v5949_v11  ;;  %vm6067_vm2 = vmand %vm1372_vm10, %vm1436_vm11 }
  0x4c   : > { %4926 = vmatprep.mubr.msk.f32.mxu0 %vm626_vm1, %v564_v26  ;;  %4974 = vmatprep.mubr.msk.f32.mxu1 %vm626_vm1, %v596_v27  ;;  %v5972_v26 = vadd.s32 %v5952_v13, %v1246_v19  ;;  %v1248_v27 = vadd.s32 296, %v5949_v11 }
  0x4d   : > { %vm1343_vm12 = vcmp.ge.s32.totalorder %v5968_v24, 600  ;;  %vm1407_vm13 = vcmp.lt.s32.totalorder %v5968_v24, 1024  ;;  %v1731_v24 = vld [vmem:[#allocation2 + $0x38] sm:$0xff] }
  0x4e   : > { %vm1439_vm15 = vcmp.lt.s32.totalorder %v5972_v26, 1024  ;;  %vm6084_vm10 = vmand %vm1343_vm12, %vm1407_vm13  ;;  %vm7869_vm12 = vcmp.ge.s32.totalorder %v5972_v26, 600  ;;  %v1255_v26 = vadd.s32 352, %v5949_v11 }
  0x4f   : > { %4927 = vmatmul.mubr.msk.f32.gmra.mrb[8].mxu0 %vm626_vm1, %v565_v28  ;;  %4975 = vmatmul.mubr.msk.f32.gmra.mrb[8].mxu1 %vm626_vm1, %v597_v29  ;;  %v5976_v28 = vadd.s32 %v5952_v13, %v1213_v21  ;;  %v1215_v29 = vadd.s32 32, %v5949_v11  ;;  %vm6106_vm13 = vmand %vm7869_vm12, %vm1439_vm15 }
  0x50   : > { %4929 = vmatprep.mubr.msk.f32.mxu0 %vm626_vm1, %v566_v30  ;;  %4977 = vmatprep.mubr.msk.f32.mxu1 %vm626_vm1, %v598_v31  ;;  %v5982_v30 = vadd.s32 %v5952_v13, %v1245_v23  ;;  %v1247_v31 = vadd.s32 288, %v5949_v11  ;;  %v1759_v23 = vld [vmem:[#allocation2 + $0x118] sm:$0xff] }
  0x51   : > { %vm7873_vm15 = vcmp.ge.s32.totalorder %v5976_v28, 600 }
  0x53   : > { %4930 = vmatmul.mubr.msk.f32.gmra.mrb[10].mxu0 %vm626_vm1, %v567_v32  ;;  %4978 = vmatmul.mubr.msk.f32.gmra.mrb[10].mxu1 %vm626_vm1, %v599_v33  ;;  %v5988_v32 = vadd.s32 %v5952_v13, %v1216_v25  ;;  %v1218_v33 = vadd.s32 56, %v5949_v11 }
  0x54   : > { %4932 = vmatprep.mubr.msk.f32.mxu0 %vm626_vm1, %v568_v34  ;;  %4980 = vmatprep.mubr.msk.f32.mxu1 %vm626_vm1, %v600_v35  ;;  %v5994_v34 = vadd.s32 %v5952_v13, %v1248_v27  ;;  %v1250_v35 = vadd.s32 312, %v5949_v11 }
  0x57   : > { %4933 = vmatmul.mubr.msk.f32.gmra.mrb[12].mxu0 %vm626_vm1, %v569_v36  ;;  %4981 = vmatmul.mubr.msk.f32.gmra.mrb[12].mxu1 %vm626_vm1, %v601_v37  ;;  %v6000_v36 = vadd.s32 %v5952_v13, %v1215_v29  ;;  %v1217_v37 = vadd.s32 48, %v5949_v11  ;;  %v1726_v29 = vld [vmem:[#allocation2 + $0x10] sm:$0xff] }
  0x58   : > { %4935 = vmatprep.mubr.msk.f32.mxu0 %vm626_vm1, %v570_v38  ;;  %4983 = vmatprep.mubr.msk.f32.mxu1 %vm626_vm1, %v602_v39  ;;  %v6006_v38 = vadd.s32 %v5952_v13, %v1247_v31  ;;  %v1249_v39 = vadd.s32 304, %v5949_v11  ;;  %v1758_v31 = vld [vmem:[#allocation2 + $0x110] sm:$0xff] }
  0x5a   : > { %vm1376_vm4 = vcmp.ge.s32.totalorder %v6006_v38, 600  ;;  %vm1440_vm5 = vcmp.lt.s32.totalorder %v6006_v38, 1024 }
  0x5b   : > { %4936 = vmatmul.mubr.msk.f32.gmra.mrb[14].mxu0 %vm626_vm1, %v571_v40  ;;  %4984 = vmatmul.mubr.msk.f32.gmra.mrb[14].mxu1 %vm626_vm1, %v603_v41  ;;  %v6012_v40 = vadd.s32 %v5952_v13, %v1218_v33  ;;  %v1220_v41 = vadd.s32 72, %v5949_v11 }
  0x5c   : > { %4938 = vmatprep.mubr.msk.f32.mxu0 %vm626_vm1, %v572_v42  ;;  %4986 = vmatprep.mubr.msk.f32.mxu1 %vm626_vm1, %v604_v43  ;;  %v6018_v42 = vadd.s32 %v5952_v13, %v1250_v35  ;;  %v1252_v43 = vadd.s32 328, %v5949_v11 }
  0x5d   : > { %vm1411_vm6 = vcmp.lt.s32.totalorder %v6012_v40, 1024 }
  0x5e   : > { %vm1379_vm7 = vcmp.ge.s32.totalorder %v6018_v42, 600  ;;  %vm1443_vm0 = vcmp.lt.s32.totalorder %v6018_v42, 1024 }
  0x5f   : > { %4939 = vmatmul.mubr.msk.f32.gmra.mrb[16].mxu0 %vm626_vm1, %v573_v44  ;;  %4987 = vmatmul.mubr.msk.f32.gmra.mrb[16].mxu1 %vm626_vm1, %v605_v45  ;;  %v6023_v44 = vadd.s32 %v5952_v13, %v1217_v37  ;;  %v1219_v45 = vadd.s32 64, %v5949_v11  ;;  %v1226_v37 = vadd.s32 120, %v5949_v11 }
  0x60   : > { %4941 = vmatprep.mubr.msk.f32.mxu0 %vm626_vm1, %v574_v46  ;;  %4989 = vmatprep.mubr.msk.f32.mxu1 %vm626_vm1, %v606_v47  ;;  %v1251_v46 = vadd.s32 320, %v5949_v11  ;;  %v6175_v47 = vadd.s32 %v5952_v13, %v1256_v12 }
  0x63   : > { %4942 = vmatmul.mubr.msk.f32.gmra.mrb[18].mxu0 %vm626_vm1, %v575_v48  ;;  %4990 = vmatmul.mubr.msk.f32.gmra.mrb[18].mxu1 %vm626_vm1, %v607_v49  ;;  %v6035_v48 = vadd.s32 %v5952_v13, %v1249_v39  ;;  %v1222_v49 = vadd.s32 88, %v5949_v11  ;;  %v1258_v39 = vadd.s32 376, %v5949_v11 }
  0x64   : > { %4944 = vmatprep.mubr.msk.f32.mxu0 %vm626_vm1, %v576_v50  ;;  %4992 = vmatprep.mubr.msk.f32.mxu1 %vm626_vm1, %v608_v51  ;;  %v1254_v50 = vadd.s32 344, %v5949_v11 }
  0x67   : > { %4945 = vmatmul.mubr.msk.f32.gmra.mrb[20].mxu0 %vm626_vm1, %v577_v52  ;;  %4993 = vmatmul.mubr.msk.f32.gmra.mrb[20].mxu1 %vm626_vm1, %v609_v53  ;;  %v6049_v52 = vadd.s32 %v5952_v13, %v1220_v41 }
  0x68   : > { %4947 = vmatprep.mubr.msk.f32.mxu0 %vm626_vm1, %v578_v54  ;;  %4995 = vmatprep.mubr.msk.f32.mxu1 %vm626_vm1, %v610_v55  ;;  %v6061_v54 = vadd.s32 %v5952_v13, %v1252_v43  ;;  %v1725_v55 = vld [vmem:[#allocation2 + $0x8] sm:$0xff] }
  0x6b   : > { %4948 = vmatmul.mubr.msk.f32.gmra.mrb[22].mxu0 %vm626_vm1, %v579_v56  ;;  %4996 = vmatmul.mubr.msk.f32.gmra.mrb[22].mxu1 %vm626_vm1, %v611_v57  ;;  %v1757_v56 = vld [vmem:[#allocation2 + $0x108] sm:$0xff] }
  0x6c   : > { %4950 = vmatprep.mubr.msk.f32.mxu0 %vm626_vm1, %v580_v58  ;;  %4998 = vmatprep.mubr.msk.f32.mxu1 %vm626_vm1, %v612_v59  ;;  %v6074_v58 = vadd.s32 %v5952_v13, %v1219_v45  ;;  %v6077_v59 = vadd.s32 %v5952_v13, %v1251_v46 }
  0x6f   : > { %4951 = vmatmul.mubr.msk.f32.gmra.mrb[24].mxu0 %vm626_vm1, %v581_v60  ;;  %4999 = vmatmul.mubr.msk.f32.gmra.mrb[24].mxu1 %vm626_vm1, %v613_v61  ;;  %v1221_v60 = vadd.s32 80, %v5949_v11 }
  0x70   : > { %4953 = vmatprep.mubr.msk.f32.mxu0 %vm626_vm1, %v582_v62  ;;  %5001 = vmatprep.mubr.msk.f32.mxu1 %vm626_vm1, %v614_v63  ;;  %v1724_v63 = vld [vmem:[#allocation2] sm:$0xff] }
  0x71   : > { %v6139_v25 = vadd.s32 %v5952_v13, %v1221_v60  ;;  %v1729_v60 = vld [vmem:[#allocation2 + $0x28] sm:$0xff] }
  0x73   : > { %4954 = vmatmul.mubr.msk.f32.gmra.mrb[26].mxu0 %vm626_vm1, %v583_v0  ;;  %5002 = vmatmul.mubr.msk.f32.gmra.mrb[26].mxu1 %vm626_vm1, %v615_v1  ;;  %v1756_v0 = vld [vmem:[#allocation2 + $0x100] sm:$0xff] }
  0x74   : > { %4956 = vmatprep.mubr.msk.f32.mxu0 %vm626_vm1, %v584_v2  ;;  %5004 = vmatprep.mubr.msk.f32.mxu1 %vm626_vm1, %v616_v3  ;;  %v6091_v2 = vadd.s32 %v5952_v13, %v1222_v49  ;;  %v6094_v3 = vadd.s32 %v5952_v13, %v1254_v50  ;;  %v6178_v49 = vadd.s32 %v5952_v13, %v1223_v14 }
  0x76   : > { %vm1415_vm11 = vcmp.lt.s32.totalorder %v6091_v2, 1024 }
  0x77   : > { %4957 = vmatmul.mubr.msk.f32.gmra.mrb[28].mxu0 %vm626_vm1, %v585_v4  ;;  %5005 = vmatmul.mubr.msk.f32.gmra.mrb[28].mxu1 %vm626_vm1, %v617_v5  ;;  %v1253_v4 = vadd.s32 336, %v5949_v11  ;;  %v1224_v5 = vadd.s32 104, %v5949_v11 }
  0x78   : > { %4959 = vmatprep.mubr.msk.f32.mxu0 %vm626_vm1, %v586_v6  ;;  %5007 = vmatprep.mubr.msk.f32.mxu1 %vm626_vm1, %v618_v7 }
  0x79   : > { %v6153_v33 = vadd.s32 %v5952_v13, %v1253_v4  ;;  %v6156_v35 = vadd.s32 %v5952_v13, %v1224_v5  ;;  %v1728_v4 = vld [vmem:[#allocation2 + $0x20] sm:$0xff] }
  0x7a   : > { %v1760_v5 = vld [vmem:[#allocation2 + $0x120] sm:$0xff] }
  0x7b   : > { %4960 = vmatmul.mubr.msk.f32.gmra.mrb[30].mxu0 %vm626_vm1, %v587_v8  ;;  %5008 = vmatmul.mubr.msk.f32.gmra.mrb[30].mxu1 %vm626_vm1, %v619_v9  ;;  %vm6053_vm1 = vmand %vm1340_vm8, %vm1404_vm9  ;;  %vm1410_vm9 = vcmp.lt.s32.totalorder %v6023_v44, 1024 }
 0x112   : > { %v4916_v61 = vpop.f32.mrb[0].mxu0  ;;  %v4964_v62 = vpop.f32.mrb[0].mxu1 }
 0x113   : > { %v1661_v6 = vsel %vm6029_vm14, %v4916_v61, -inf  ;;  %v1693_v7 = vsel %vm6041_vm3, %v4964_v62, -inf  ;;  %v889_v8 = vpop.f32.mrb[1].mxu0  ;;  %v1049_v9 = vpop.f32.mrb[1].mxu1  ;;  %vm7872_vm14 = vcmp.lt.s32.totalorder %v5976_v28, 1024  ;;  %v1761_v61 = vld [vmem:[#allocation2 + $0x128] sm:$0xff] }
 0x114   : > { %v1789_v15 = vmax.f32 %v1725_v55, %v1661_v6  ;;  %v1821_v16 = vmax.f32 %v1757_v56, %v1693_v7  ;;  %v1660_v17 = vsel %vm6053_vm1, %v889_v8, -inf  ;;  %v1692_v18 = vsel %vm6067_vm2, %v1049_v9, -inf  ;;  %vm6122_vm3 = vmand %vm7873_vm15, %vm7872_vm14 }
 0x115   : > { %v1788_v20 = vmax.f32 %v1724_v63, %v1660_v17  ;;  %v1820_v21 = vmax.f32 %v1756_v0, %v1692_v18  ;;  %vm7876_vm1 = vcmp.lt.s32.totalorder %v5982_v30, 1024  ;;  %vm7877_vm2 = vcmp.ge.s32.totalorder %v5982_v30, 600  ;;  %v1730_v30 = vld [vmem:[#allocation2 + $0x30] sm:$0xff] }
 0x116   : > { %vm6132_vm8 = vmand %vm7877_vm2, %vm7876_vm1  ;;  %1853 = vst [vmem:[#allocation2 + $0x8] sm:$0xff] %v1789_v15  ;;  %v4919_v27 = vpop.f32.mrb[2].mxu0  ;;  %v4967_v28 = vpop.f32.mrb[2].mxu1  ;;  %vm7880_vm1 = vcmp.lt.s32.totalorder %v5988_v32, 1024  ;;  %vm7881_vm2 = vcmp.ge.s32.totalorder %v5988_v32, 600  ;;  %vm1447_vm15 = vcmp.lt.s32.totalorder %v6094_v3, 1024  ;;  %v6219_v6 = vadd.s32 %v5952_v13, %v1226_v37 }
 0x117   : > { %1885 = vst [vmem:[#allocation2 + $0x108] sm:$0xff] %v1821_v16  ;;  %vm6146_vm12 = vmand %vm7881_vm2, %vm7880_vm1  ;;  %v1663_v32 = vsel %vm6084_vm10, %v4919_v27, -inf  ;;  %v1695_v41 = vsel %vm6106_vm13, %v4967_v28, -inf  ;;  %v899_v43 = vpop.f32.mrb[3].mxu0  ;;  %v1059_v45 = vpop.f32.mrb[3].mxu1  ;;  %vm7884_vm1 = vcmp.lt.s32.totalorder %v5994_v34, 1024  ;;  %v6222_v7 = vadd.s32 %v5952_v13, %v1258_v39 }
 0x118   : > { %1852 = vst [vmem:[#allocation2] sm:$0xff] %v1788_v20  ;;  %1884 = vst [vmem:[#allocation2 + $0x100] sm:$0xff] %v1820_v21  ;;  %vm7885_vm2 = vcmp.ge.s32.totalorder %v5994_v34, 600  ;;  %v1791_v50 = vmax.f32 %v1727_v22, %v1663_v32  ;;  %v1823_v51 = vmax.f32 %v1759_v23, %v1695_v41  ;;  %v1662_v53 = vsel %vm6122_vm3, %v899_v43, -inf  ;;  %v1762_v37 = vld [vmem:[#allocation2 + $0x130] sm:$0xff]  ;;  %v1735_v27 = vld [vmem:[#allocation2 + $0x58] sm:$0xff] }
 0x119   : > { %vm6168_vm14 = vmand %vm7885_vm2, %vm7884_vm1  ;;  %v1694_v34 = vsel %vm6132_vm8, %v1059_v45, -inf  ;;  %vm7888_vm10 = vcmp.lt.s32.totalorder %v6000_v36, 1024  ;;  %vm7889_vm13 = vcmp.ge.s32.totalorder %v6000_v36, 600  ;;  %vm1383_vm2 = vcmp.ge.s32.totalorder %v6094_v3, 600 }
 0x11a   : > { %vm6188_vm1 = vmand %vm7889_vm13, %vm7888_vm10  ;;  %v1790_v56 = vmax.f32 %v1726_v29, %v1662_v53  ;;  %v1822_v57 = vmax.f32 %v1758_v31, %v1694_v34  ;;  %vm1414_vm10 = vcmp.lt.s32.totalorder %v6139_v25, 1024  ;;  %v6205_v36 = vadd.s32 %v5952_v13, %v1255_v26  ;;  %1855 = vst [vmem:[#allocation2 + $0x18] sm:$0xff] %v1791_v50  ;;  %v4922_v0 = vpop.f32.mrb[4].mxu0  ;;  %v4970_v1 = vpop.f32.mrb[4].mxu1  ;;  %v1763_v26 = vld [vmem:[#allocation2 + $0x138] sm:$0xff] }
 0x11b   : > { %vm6198_vm8 = vmand %vm1376_vm4, %vm1440_vm5  ;;  %v1225_v63 = vadd.s32 112, %v5949_v11  ;;  %1887 = vst [vmem:[#allocation2 + $0x118] sm:$0xff] %v1823_v51  ;;  %vm7894_vm4 = vcmp.ge.s32.totalorder %v6012_v40, 600  ;;  %vm1446_vm3 = vcmp.lt.s32.totalorder %v6153_v33, 1024  ;;  %v1257_v8 = vadd.s32 368, %v5949_v11  ;;  %v909_v12 = vpop.f32.mrb[5].mxu0 }
 0x11c   : > { %vm6212_vm5 = vmand %vm7894_vm4, %vm1411_vm6  ;;  %v1228_v9 = vadd.s32 136, %v5949_v11  ;;  %1854 = vst [vmem:[#allocation2 + $0x10] sm:$0xff] %v1790_v56  ;;  %v1665_v40 = vsel %vm6146_vm12, %v4922_v0, -inf  ;;  %v1697_v10 = vsel %vm6168_vm14, %v4970_v1, -inf  ;;  %v1069_v14 = vpop.f32.mrb[5].mxu1  ;;  %vm1417_vm13 = vcmp.lt.s32.totalorder %v6156_v35, 1024 }
 0x11d   : > { %1886 = vst [vmem:[#allocation2 + $0x110] sm:$0xff] %v1822_v57  ;;  %vm6234_vm6 = vmand %vm1379_vm7, %vm1443_vm0  ;;  %v1260_v16 = vadd.s32 392, %v5949_v11  ;;  %v1227_v17 = vadd.s32 128, %v5949_v11  ;;  %v1793_v18 = vmax.f32 %v1729_v60, %v1665_v40  ;;  %v1825_v19 = vmax.f32 %v1761_v61, %v1697_v10  ;;  %v1765_v0 = vld [vmem:[#allocation2 + $0x148] sm:$0xff] }
 0x11e   : > { %v1664_v20 = vsel %vm6188_vm1, %v909_v12, -inf  ;;  %v1696_v42 = vsel %vm6198_vm8, %v1069_v14, -inf  ;;  %vm7899_vm0 = vcmp.ge.s32.totalorder %v6023_v44, 600  ;;  %vm7902_vm1 = vcmp.lt.s32.totalorder %v6035_v48, 1024  ;;  %v4925_v29 = vpop.f32.mrb[6].mxu0  ;;  %v4973_v31 = vpop.f32.mrb[6].mxu1 }
 0x11f   : > { %vm6250_vm7 = vmand %vm7899_vm0, %vm1410_vm9  ;;  %v1792_v22 = vmax.f32 %v1728_v4, %v1664_v20  ;;  %v1824_v23 = vmax.f32 %v1760_v5, %v1696_v42  ;;  %vm7903_vm8 = vcmp.ge.s32.totalorder %v6035_v48, 600  ;;  %v6267_v44 = vadd.s32 %v5952_v13, %v1225_v63  ;;  %1857 = vst [vmem:[#allocation2 + $0x28] sm:$0xff] %v1793_v18  ;;  %v919_v46 = vpop.f32.mrb[7].mxu0  ;;  %v1079_v50 = vpop.f32.mrb[7].mxu1  ;;  %v1733_v63 = vld [vmem:[#allocation2 + $0x48] sm:$0xff]  ;;  %v1734_v48 = vld [vmem:[#allocation2 + $0x50] sm:$0xff] }
 0x120   : > { %vm6260_vm4 = vmand %vm7903_vm8, %vm7902_vm1  ;;  %v1259_v28 = vadd.s32 384, %v5949_v11  ;;  %1889 = vst [vmem:[#allocation2 + $0x128] sm:$0xff] %v1825_v19  ;;  %vm7906_vm1 = vcmp.lt.s32.totalorder %v6049_v52, 1024  ;;  %vm7907_vm8 = vcmp.ge.s32.totalorder %v6049_v52, 600  ;;  %v6281_v39 = vadd.s32 %v5952_v13, %v1257_v8  ;;  %v1732_v8 = vld [vmem:[#allocation2 + $0x40] sm:$0xff] }
 0x121   : > { %vm6274_vm12 = vmand %vm7907_vm8, %vm7906_vm1  ;;  %v6284_v32 = vadd.s32 %v5952_v13, %v1228_v9  ;;  %v1230_v41 = vadd.s32 152, %v5949_v11  ;;  %v1262_v43 = vadd.s32 408, %v5949_v11  ;;  %1856 = vst [vmem:[#allocation2 + $0x20] sm:$0xff] %v1792_v22  ;;  %v1667_v52 = vsel %vm6212_vm5, %v4925_v29, -inf  ;;  %v1764_v9 = vld [vmem:[#allocation2 + $0x140] sm:$0xff]  ;;  %v1739_v29 = vld [vmem:[#allocation2 + $0x78] sm:$0xff] }
 0x122   : > { %1888 = vst [vmem:[#allocation2 + $0x120] sm:$0xff] %v1824_v23  ;;  %v1699_v45 = vsel %vm6234_vm6, %v4973_v31, -inf  ;;  %vm7910_vm1 = vcmp.lt.s32.totalorder %v6061_v54, 1024  ;;  %vm7911_vm8 = vcmp.ge.s32.totalorder %v6061_v54, 600  ;;  %v6303_v53 = vadd.s32 %v5952_v13, %v1260_v16  ;;  %v4928_v5 = vpop.f32.mrb[8].mxu0  ;;  %v4976_v38 = vpop.f32.mrb[8].mxu1 }
 0x123   : > { %vm6296_vm9 = vmand %vm7911_vm8, %vm7910_vm1  ;;  %v6306_v34 = vadd.s32 %v5952_v13, %v1227_v17  ;;  %v1795_v55 = vmax.f32 %v1731_v24, %v1667_v52  ;;  %v1827_v56 = vmax.f32 %v1763_v26, %v1699_v45  ;;  %v1666_v57 = vsel %vm6250_vm7, %v919_v46, -inf  ;;  %v929_v16 = vpop.f32.mrb[9].mxu0  ;;  %v1089_v17 = vpop.f32.mrb[9].mxu1 }
 0x124   : > { %v1698_v54 = vsel %vm6260_vm4, %v1079_v50, -inf  ;;  %vm7914_vm5 = vcmp.lt.s32.totalorder %v6074_v58, 1024  ;;  %vm7915_vm6 = vcmp.ge.s32.totalorder %v6074_v58, 600  ;;  %vm1387_vm8 = vcmp.ge.s32.totalorder %v6222_v7, 600 }
 0x125   : > { %vm6316_vm1 = vmand %vm7915_vm6, %vm7914_vm5  ;;  %vm1451_vm0 = vcmp.lt.s32.totalorder %v6222_v7, 1024  ;;  %v1794_v61 = vmax.f32 %v1730_v30, %v1666_v57  ;;  %v1826_v62 = vmax.f32 %v1762_v37, %v1698_v54  ;;  %vm7918_vm7 = vcmp.lt.s32.totalorder %v6077_v59, 1024  ;;  %1859 = vst [vmem:[#allocation2 + $0x38] sm:$0xff] %v1795_v55 }
 0x126   : > { %vm7919_vm4 = vcmp.ge.s32.totalorder %v6077_v59, 600  ;;  %v6333_v58 = vadd.s32 %v5952_v13, %v1259_v28  ;;  %v1229_v4 = vadd.s32 144, %v5949_v11  ;;  %1891 = vst [vmem:[#allocation2 + $0x138] sm:$0xff] %v1827_v56  ;;  %vm1450_vm6 = vcmp.lt.s32.totalorder %v6281_v39, 1024  ;;  %v1767_v28 = vld [vmem:[#allocation2 + $0x158] sm:$0xff]  ;;  %v4931_v30 = vpop.f32.mrb[10].mxu0 }
 0x127   : > { %vm6326_vm14 = vmand %vm7919_vm4, %vm7918_vm7  ;;  %vm7922_vm7 = vcmp.ge.s32.totalorder %v6091_v2, 600  ;;  %v6347_v40 = vadd.s32 %v5952_v13, %v1230_v41  ;;  %v6350_v10 = vadd.s32 %v5952_v13, %v1262_v43  ;;  %v1261_v12 = vadd.s32 400, %v5949_v11  ;;  %1858 = vst [vmem:[#allocation2 + $0x30] sm:$0xff] %v1794_v61  ;;  %v4979_v37 = vpop.f32.mrb[10].mxu1  ;;  %v1766_v41 = vld [vmem:[#allocation2 + $0x150] sm:$0xff]  ;;  %v939_v51 = vpop.f32.mrb[11].mxu0 }
 0x128   : > { %vm6340_vm4 = vmand %vm7922_vm7, %vm1415_vm11  ;;  %v1232_v14 = vadd.s32 168, %v5949_v11  ;;  %1890 = vst [vmem:[#allocation2 + $0x130] sm:$0xff] %v1826_v62  ;;  %v1669_v2 = vsel %vm6274_vm12, %v4928_v5, -inf  ;;  %v1701_v15 = vsel %vm6296_vm9, %v4976_v38, -inf  ;;  %vm1357_vm7 = vcmp.ge.s32.totalorder %v6284_v32, 600  ;;  %v1099_v55 = vpop.f32.mrb[11].mxu1 }
 0x129   : > { %vm6362_vm11 = vmand %vm1383_vm2, %vm1447_vm15  ;;  %vm1421_vm5 = vcmp.lt.s32.totalorder %v6284_v32, 1024  ;;  %v1264_v19 = vadd.s32 424, %v5949_v11  ;;  %v1231_v20 = vadd.s32 160, %v5949_v11  ;;  %v1797_v42 = vmax.f32 %v1733_v63, %v1669_v2  ;;  %v1769_v5 = vld [vmem:[#allocation2 + $0x168] sm:$0xff] }
 0x12a   : > { %v1829_v21 = vmax.f32 %v1765_v0, %v1701_v15  ;;  %v1668_v22 = vsel %vm6316_vm1, %v929_v16, -inf  ;;  %v1700_v3 = vsel %vm6326_vm14, %v1089_v17, -inf  ;;  %vm7927_vm15 = vcmp.ge.s32.totalorder %v6139_v25, 600  ;;  %v4982_v59 = vpop.f32.mrb[12].mxu1  ;;  %v1773_v38 = vld [vmem:[#allocation2 + $0x188] sm:$0xff] }
 0x12b   : > { %vm6378_vm2 = vmand %vm7927_vm15, %vm1414_vm10  ;;  %vm1453_vm9 = vcmp.lt.s32.totalorder %v6303_v53, 1024  ;;  %v1796_v24 = vmax.f32 %v1732_v8, %v1668_v22  ;;  %v1828_v26 = vmax.f32 %v1764_v9, %v1700_v3  ;;  %vm7930_vm14 = vcmp.ge.s32.totalorder %v6153_v33, 600  ;;  %1861 = vst [vmem:[#allocation2 + $0x48] sm:$0xff] %v1797_v42  ;;  %v4934_v9 = vpop.f32.mrb[12].mxu0  ;;  %v1770_v33 = vld [vmem:[#allocation2 + $0x170] sm:$0xff]  ;;  %v1747_v42 = vld [vmem:[#allocation2 + $0xb8] sm:$0xff] }
 0x12c   : > { %vm6388_vm1 = vmand %vm7930_vm14, %vm1446_vm3  ;;  %v6395_v25 = vadd.s32 %v5952_v13, %v1229_v4  ;;  %v1263_v31 = vadd.s32 416, %v5949_v11  ;;  %1893 = vst [vmem:[#allocation2 + $0x148] sm:$0xff] %v1829_v21  ;;  %vm7933_vm3 = vcmp.ge.s32.totalorder %v6156_v35, 600  ;;  %v6409_v43 = vadd.s32 %v5952_v13, %v1261_v12  ;;  %v1737_v4 = vld [vmem:[#allocation2 + $0x68] sm:$0xff]  ;;  %v1736_v12 = vld [vmem:[#allocation2 + $0x60] sm:$0xff] }
 0x12d   : > { %vm6402_vm14 = vmand %vm7933_vm3, %vm1417_vm13  ;;  %v6412_v52 = vadd.s32 %v5952_v13, %v1232_v14  ;;  %v1234_v45 = vadd.s32 184, %v5949_v11  ;;  %v1266_v46 = vadd.s32 440, %v5949_v11  ;;  %1860 = vst [vmem:[#allocation2 + $0x40] sm:$0xff] %v1796_v24  ;;  %v1671_v35 = vsel %vm6340_vm4, %v4931_v30, -inf  ;;  %v1768_v14 = vld [vmem:[#allocation2 + $0x160] sm:$0xff] }
 0x12e   : > { %1892 = vst [vmem:[#allocation2 + $0x140] sm:$0xff] %v1828_v26  ;;  %v1703_v50 = vsel %vm6362_vm11, %v4979_v37, -inf  ;;  %vm7936_vm13 = vcmp.lt.s32.totalorder %v6175_v47, 1024  ;;  %vm7937_vm3 = vcmp.ge.s32.totalorder %v6175_v47, 600  ;;  %v6431_v57 = vadd.s32 %v5952_v13, %v1264_v19  ;;  %v949_v19 = vpop.f32.mrb[13].mxu0  ;;  %v1743_v26 = vld [vmem:[#allocation2 + $0x98] sm:$0xff] }
 0x12f   : > { %vm6424_vm10 = vmand %vm7937_vm3, %vm7936_vm13  ;;  %v6434_v54 = vadd.s32 %v5952_v13, %v1231_v20  ;;  %v1799_v60 = vmax.f32 %v1735_v27, %v1671_v35  ;;  %v1831_v61 = vmax.f32 %v1767_v28, %v1703_v50  ;;  %v1670_v62 = vsel %vm6378_vm2, %v939_v51, -inf  ;;  %v1109_v20 = vpop.f32.mrb[13].mxu1  ;;  %v4937_v37 = vpop.f32.mrb[14].mxu0 }
 0x130   : > { %v1702_v47 = vsel %vm6388_vm1, %v1099_v55, -inf  ;;  %vm7940_vm4 = vcmp.lt.s32.totalorder %v6178_v49, 1024  ;;  %vm7941_vm11 = vcmp.ge.s32.totalorder %v6178_v49, 600  ;;  %vm1455_vm15 = vcmp.lt.s32.totalorder %v6350_v10, 1024  ;;  %v959_v51 = vpop.f32.mrb[15].mxu0 }
 0x131   : > { %vm6444_vm13 = vmand %vm7941_vm11, %vm7940_vm4  ;;  %v1798_v0 = vmax.f32 %v1734_v48, %v1670_v62  ;;  %v1830_v1 = vmax.f32 %v1766_v41, %v1702_v47  ;;  %vm7944_vm2 = vcmp.lt.s32.totalorder %v6205_v36, 1024  ;;  %vm7945_vm1 = vcmp.ge.s32.totalorder %v6205_v36, 600  ;;  %1863 = vst [vmem:[#allocation2 + $0x58] sm:$0xff] %v1799_v60  ;;  %v4985_v48 = vpop.f32.mrb[14].mxu1  ;;  %v1738_v41 = vld [vmem:[#allocation2 + $0x70] sm:$0xff]  ;;  %v1772_v36 = vld [vmem:[#allocation2 + $0x180] sm:$0xff] }
 0x132   : > { %vm6454_vm12 = vmand %vm7945_vm1, %vm7944_vm2  ;;  %v6461_v49 = vadd.s32 %v5952_v13, %v1263_v31  ;;  %v1233_v8 = vadd.s32 176, %v5949_v11  ;;  %1895 = vst [vmem:[#allocation2 + $0x158] sm:$0xff] %v1831_v61  ;;  %vm7948_vm2 = vcmp.lt.s32.totalorder %v6219_v6, 1024  ;;  %vm7949_vm1 = vcmp.ge.s32.totalorder %v6219_v6, 600  ;;  %v1771_v31 = vld [vmem:[#allocation2 + $0x178] sm:$0xff]  ;;  %v1119_v55 = vpop.f32.mrb[15].mxu1 }
 0x133   : > { %vm6468_vm3 = vmand %vm7949_vm1, %vm7948_vm2  ;;  %vm1454_vm11 = vcmp.lt.s32.totalorder %v6409_v43, 1024  ;;  %v6475_v2 = vadd.s32 %v5952_v13, %v1234_v45  ;;  %v6478_v15 = vadd.s32 %v5952_v13, %v1266_v46  ;;  %v1265_v16 = vadd.s32 432, %v5949_v11  ;;  %1862 = vst [vmem:[#allocation2 + $0x50] sm:$0xff] %v1798_v0  ;;  %v1741_v0 = vld [vmem:[#allocation2 + $0x88] sm:$0xff] }
 0x134   : > { %v1236_v17 = vadd.s32 200, %v5949_v11  ;;  %1894 = vst [vmem:[#allocation2 + $0x150] sm:$0xff] %v1830_v1  ;;  %v1673_v6 = vsel %vm6402_vm14, %v4934_v9, -inf  ;;  %v1705_v18 = vsel %vm6424_vm10, %v4982_v59, -inf  ;;  %vm6490_vm2 = vmand %vm1387_vm8, %vm1451_vm0  ;;  %vm1425_vm4 = vcmp.lt.s32.totalorder %v6412_v52, 1024  ;;  %v1745_v1 = vld [vmem:[#allocation2 + $0xa8] sm:$0xff] }
 0x135   : > { %v1268_v21 = vadd.s32 456, %v5949_v11  ;;  %v1235_v22 = vadd.s32 192, %v5949_v11  ;;  %v1801_v3 = vmax.f32 %v1737_v4, %v1673_v6  ;;  %v1833_v23 = vmax.f32 %v1769_v5, %v1705_v18 }
 0x136   : > { %v1672_v24 = vsel %vm6444_vm13, %v949_v19, -inf  ;;  %v1704_v7 = vsel %vm6454_vm12, %v1109_v20, -inf  ;;  %vm7954_vm0 = vcmp.lt.s32.totalorder %v6267_v44, 1024  ;;  %vm7955_vm8 = vcmp.ge.s32.totalorder %v6267_v44, 600 }
 0x137   : > { %vm6506_vm10 = vmand %vm7955_vm8, %vm7954_vm0  ;;  %vm1393_vm14 = vcmp.ge.s32.totalorder %v6431_v57, 600  ;;  %vm1457_vm1 = vcmp.lt.s32.totalorder %v6431_v57, 1024  ;;  %v1800_v27 = vmax.f32 %v1736_v12, %v1672_v24  ;;  %v1832_v28 = vmax.f32 %v1768_v14, %v1704_v7  ;;  %1865 = vst [vmem:[#allocation2 + $0x68] sm:$0xff] %v1801_v3  ;;  %v4940_v12 = vpop.f32.mrb[16].mxu0  ;;  %v4988_v14 = vpop.f32.mrb[16].mxu1 }
 0x138   : > { %vm7958_vm12 = vcmp.ge.s32.totalorder %v6281_v39, 600  ;;  %vm1424_vm8 = vcmp.lt.s32.totalorder %v6434_v54, 1024  ;;  %v6523_v44 = vadd.s32 %v5952_v13, %v1233_v8  ;;  %1897 = vst [vmem:[#allocation2 + $0x168] sm:$0xff] %v1833_v23  ;;  %v6536_v45 = vadd.s32 %v5952_v13, %v1265_v16  ;;  %v1740_v8 = vld [vmem:[#allocation2 + $0x80] sm:$0xff]  ;;  %v969_v19 = vpop.f32.mrb[17].mxu0  ;;  %v1129_v20 = vpop.f32.mrb[17].mxu1 }
 0x139   : > { %vm6516_vm13 = vmand %vm7958_vm12, %vm1450_vm6  ;;  %v6539_v46 = vadd.s32 %v5952_v13, %v1236_v17  ;;  %v1267_v35 = vadd.s32 448, %v5949_v11  ;;  %1864 = vst [vmem:[#allocation2 + $0x60] sm:$0xff] %v1800_v27  ;;  %v1675_v32 = vsel %vm6468_vm3, %v4937_v37, -inf  ;;  %v1707_v50 = vsel %vm6490_vm2, %v4985_v48, -inf  ;;  %v1775_v27 = vld [vmem:[#allocation2 + $0x198] sm:$0xff]  ;;  %v4991_v30 = vpop.f32.mrb[18].mxu1 }
 0x13a   : > { %vm6529_vm6 = vmand %vm1357_vm7, %vm1421_vm5  ;;  %1896 = vst [vmem:[#allocation2 + $0x160] sm:$0xff] %v1832_v28  ;;  %vm7963_vm5 = vcmp.ge.s32.totalorder %v6303_v53, 600  ;;  %v6557_v60 = vadd.s32 %v5952_v13, %v1268_v21  ;;  %v6560_v61 = vadd.s32 %v5952_v13, %v1235_v22  ;;  %v1803_v62 = vmax.f32 %v1739_v29, %v1675_v32  ;;  %v1742_v37 = vld [vmem:[#allocation2 + $0x90] sm:$0xff] }
 0x13b   : > { %vm6550_vm7 = vmand %vm7963_vm5, %vm1453_vm9  ;;  %v1835_v47 = vmax.f32 %v1771_v31, %v1707_v50  ;;  %v1674_v63 = vsel %vm6506_vm10, %v959_v51, -inf  ;;  %v1706_v53 = vsel %vm6516_vm13, %v1119_v55, -inf  ;;  %vm7966_vm9 = vcmp.lt.s32.totalorder %v6306_v34, 1024  ;;  %v4943_v31 = vpop.f32.mrb[18].mxu0  ;;  %v1139_v51 = vpop.f32.mrb[19].mxu1  ;;  %v1749_v55 = vld [vmem:[#allocation2 + $0xc8] sm:$0xff] }
 0x13c   : > { %vm7967_vm3 = vcmp.ge.s32.totalorder %v6306_v34, 600  ;;  %vm1459_vm12 = vcmp.lt.s32.totalorder %v6478_v15, 1024  ;;  %v1802_v4 = vmax.f32 %v1738_v41, %v1674_v63  ;;  %v1834_v5 = vmax.f32 %v1770_v33, %v1706_v53  ;;  %1867 = vst [vmem:[#allocation2 + $0x78] sm:$0xff] %v1803_v62  ;;  %v979_v50 = vpop.f32.mrb[19].mxu0 }
 0x13d   : > { %vm6570_vm2 = vmand %vm7967_vm3, %vm7966_vm9  ;;  %vm7970_vm10 = vcmp.lt.s32.totalorder %v6333_v58, 1024  ;;  %vm7971_vm13 = vcmp.ge.s32.totalorder %v6333_v58, 600  ;;  %v1238_v34 = vadd.s32 216, %v5949_v11  ;;  %v1270_v59 = vadd.s32 472, %v5949_v11  ;;  %1899 = vst [vmem:[#allocation2 + $0x178] sm:$0xff] %v1835_v47 }
 0x13e   : > { %vm6580_vm0 = vmand %vm7971_vm13, %vm7970_vm10  ;;  %vm7974_vm5 = vcmp.lt.s32.totalorder %v6347_v40, 1024  ;;  %vm7975_vm10 = vcmp.ge.s32.totalorder %v6347_v40, 600  ;;  %v6599_v16 = vadd.s32 %v5952_v13, %v1267_v35  ;;  %v1237_v17 = vadd.s32 208, %v5949_v11  ;;  %1866 = vst [vmem:[#allocation2 + $0x70] sm:$0xff] %v1802_v4  ;;  %v1777_v4 = vld [vmem:[#allocation2 + $0x1a8] sm:$0xff] }
 0x13f   : > { %vm6592_vm13 = vmand %vm7975_vm10, %vm7974_vm5  ;;  %v1269_v6 = vadd.s32 464, %v5949_v11  ;;  %1898 = vst [vmem:[#allocation2 + $0x170] sm:$0xff] %v1834_v5  ;;  %v1677_v40 = vsel %vm6529_vm6, %v4940_v12, -inf  ;;  %v1709_v18 = vsel %vm6550_vm7, %v4988_v14, -inf  ;;  %vm7978_vm5 = vcmp.ge.s32.totalorder %v6350_v10, 600  ;;  %v1751_v12 = vld [vmem:[#allocation2 + $0xd8] sm:$0xff] }
 0x140   : > { %vm6611_vm10 = vmand %vm7978_vm5, %vm1455_vm15  ;;  %vm1429_vm3 = vcmp.lt.s32.totalorder %v6539_v46, 1024  ;;  %v1805_v21 = vmax.f32 %v1741_v0, %v1677_v40  ;;  %v1837_v22 = vmax.f32 %v1773_v38, %v1709_v18  ;;  %v1676_v3 = vsel %vm6570_vm2, %v969_v19, -inf }
 0x141   : > { %v1708_v23 = vsel %vm6580_vm0, %v1129_v20, -inf  ;;  %vm7981_vm6 = vcmp.lt.s32.totalorder %v6395_v25, 1024  ;;  %vm7982_vm7 = vcmp.ge.s32.totalorder %v6395_v25, 600  ;;  %vm1397_vm5 = vcmp.ge.s32.totalorder %v6557_v60, 600 }
 0x142   : > { %vm6625_vm15 = vmand %vm7982_vm7, %vm7981_vm6  ;;  %vm1461_vm9 = vcmp.lt.s32.totalorder %v6557_v60, 1024  ;;  %v1804_v24 = vmax.f32 %v1740_v8, %v1676_v3  ;;  %v1836_v7 = vmax.f32 %v1772_v36, %v1708_v23  ;;  %vm7985_vm0 = vcmp.ge.s32.totalorder %v6409_v43, 600  ;;  %1869 = vst [vmem:[#allocation2 + $0x88] sm:$0xff] %v1805_v21  ;;  %v1774_v43 = vld [vmem:[#allocation2 + $0x190] sm:$0xff]  ;;  %v1744_v8 = vld [vmem:[#allocation2 + $0xa0] sm:$0xff] }
 0x143   : > { %vm6635_vm2 = vmand %vm7985_vm0, %vm1454_vm11  ;;  %v6642_v25 = vadd.s32 %v5952_v13, %v1238_v34  ;;  %v6645_v29 = vadd.s32 %v5952_v13, %v1270_v59  ;;  %1901 = vst [vmem:[#allocation2 + $0x188] sm:$0xff] %v1837_v22  ;;  %vm7988_vm11 = vcmp.ge.s32.totalorder %v6412_v52, 600  ;;  %vm1460_vm7 = vcmp.lt.s32.totalorder %v6599_v16, 1024  ;;  %v1776_v34 = vld [vmem:[#allocation2 + $0x1a0] sm:$0xff]  ;;  %v4994_v59 = vpop.f32.mrb[20].mxu1  ;;  %v1779_v21 = vld [vmem:[#allocation2 + $0x1b8] sm:$0xff] }
 0x144   : > { %vm6651_vm0 = vmand %vm7988_vm11, %vm1425_vm4  ;;  %v6658_v41 = vadd.s32 %v5952_v13, %v1237_v17  ;;  %v6661_v33 = vadd.s32 %v5952_v13, %v1269_v6  ;;  %v1240_v39 = vadd.s32 232, %v5949_v11  ;;  %v1272_v35 = vadd.s32 488, %v5949_v11  ;;  %1868 = vst [vmem:[#allocation2 + $0x80] sm:$0xff] %v1804_v24  ;;  %v1149_v36 = vpop.f32.mrb[21].mxu1  ;;  %v1746_v24 = vld [vmem:[#allocation2 + $0xb0] sm:$0xff] }
 0x145   : > { %1900 = vst [vmem:[#allocation2 + $0x180] sm:$0xff] %v1836_v7  ;;  %v1679_v52 = vsel %vm6592_vm13, %v4943_v31, -inf  ;;  %v1711_v32 = vsel %vm6611_vm10, %v4991_v30, -inf  ;;  %vm6673_vm4 = vmand %vm1393_vm14, %vm1457_vm1  ;;  %v1239_v56 = vadd.s32 224, %v5949_v11  ;;  %v1271_v62 = vadd.s32 480, %v5949_v11  ;;  %v4997_v10 = vpop.f32.mrb[22].mxu1 }
 0x146   : > { %v1807_v47 = vmax.f32 %v1743_v26, %v1679_v52  ;;  %v1839_v63 = vmax.f32 %v1775_v27, %v1711_v32  ;;  %v1678_v53 = vsel %vm6625_vm15, %v979_v50, -inf  ;;  %v1710_v0 = vsel %vm6635_vm2, %v1139_v51, -inf  ;;  %v1778_v7 = vld [vmem:[#allocation2 + $0x1b0] sm:$0xff] }
 0x147   : > { %vm7993_vm1 = vcmp.ge.s32.totalorder %v6434_v54, 600  ;;  %v1806_v5 = vmax.f32 %v1742_v37, %v1678_v53  ;;  %v1838_v38 = vmax.f32 %v1774_v43, %v1710_v0  ;;  %vm7996_vm13 = vcmp.lt.s32.totalorder %v6461_v49, 1024  ;;  %v4946_v54 = vpop.f32.mrb[20].mxu0  ;;  %v1159_v43 = vpop.f32.mrb[23].mxu1  ;;  %v1780_v0 = vld [vmem:[#allocation2 + $0x1c0] sm:$0xff] }
 0x148   : > { %vm6687_vm14 = vmand %vm7993_vm1, %vm1424_vm8  ;;  %vm7997_vm10 = vcmp.ge.s32.totalorder %v6461_v49, 600  ;;  %1871 = vst [vmem:[#allocation2 + $0x98] sm:$0xff] %v1807_v47  ;;  %vm8000_vm8 = vcmp.lt.s32.totalorder %v6475_v2, 1024  ;;  %vm8001_vm1 = vcmp.ge.s32.totalorder %v6475_v2, 600  ;;  %v1681_v49 = vsel %vm6651_vm0, %v4946_v54, -inf  ;;  %v989_v14 = vpop.f32.mrb[21].mxu0 }
 0x149   : > { %vm6695_vm15 = vmand %vm7997_vm10, %vm7996_vm13  ;;  %1903 = vst [vmem:[#allocation2 + $0x198] sm:$0xff] %v1839_v63  ;;  %vm1399_vm13 = vcmp.ge.s32.totalorder %v6645_v29, 600  ;;  %vm1463_vm10 = vcmp.lt.s32.totalorder %v6645_v29, 1024  ;;  %v1713_v2 = vsel %vm6673_vm4, %v4994_v59, -inf  ;;  %vm1462_vm11 = vcmp.lt.s32.totalorder %v6661_v33, 1024  ;;  %v4949_v23 = vpop.f32.mrb[22].mxu0 }
 0x14a   : > { %vm6705_vm6 = vmand %vm8001_vm1, %vm8000_vm8  ;;  %1870 = vst [vmem:[#allocation2 + $0x90] sm:$0xff] %v1806_v5  ;;  %vm8004_vm8 = vcmp.ge.s32.totalorder %v6478_v15, 600  ;;  %v1809_v17 = vmax.f32 %v1745_v1, %v1681_v49  ;;  %v1841_v6 = vmax.f32 %v1777_v4, %v1713_v2  ;;  %v1680_v40 = vsel %vm6687_vm14, %v989_v14, -inf  ;;  %v999_v37 = vpop.f32.mrb[23].mxu0  ;;  %v1748_v47 = vld [vmem:[#allocation2 + $0xc0] sm:$0xff]  ;;  %v5000_v53 = vpop.f32.mrb[24].mxu1 }
 0x14b   : > { %1902 = vst [vmem:[#allocation2 + $0x190] sm:$0xff] %v1838_v38  ;;  %vm6721_vm1 = vmand %vm8004_vm8, %vm1459_vm12  ;;  %v1712_v18 = vsel %vm6695_vm15, %v1149_v36, -inf  ;;  %vm8007_vm0 = vcmp.lt.s32.totalorder %v6523_v44, 1024  ;;  %vm8008_vm4 = vcmp.ge.s32.totalorder %v6523_v44, 600  ;;  %v1808_v19 = vmax.f32 %v1744_v8, %v1680_v40  ;;  %v1169_v5 = vpop.f32.mrb[25].mxu1  ;;  %v1783_v14 = vld [vmem:[#allocation2 + $0x1d8] sm:$0xff] }
 0x14c   : > { %vm6735_vm12 = vmand %vm8008_vm4, %vm8007_vm0  ;;  %v1840_v20 = vmax.f32 %v1776_v34, %v1712_v18  ;;  %vm8011_vm8 = vcmp.lt.s32.totalorder %v6536_v45, 1024  ;;  %vm8012_vm2 = vcmp.ge.s32.totalorder %v6536_v45, 600  ;;  %v6748_v3 = vadd.s32 %v5952_v13, %v1240_v39  ;;  %1873 = vst [vmem:[#allocation2 + $0xa8] sm:$0xff] %v1809_v17  ;;  %v1750_v36 = vld [vmem:[#allocation2 + $0xd0] sm:$0xff]  ;;  %v1785_v45 = vld [vmem:[#allocation2 + $0x1e8] sm:$0xff] }
 0x14d   : > { %vm6743_vm14 = vmand %vm8012_vm2, %vm8011_vm8  ;;  %v6751_v44 = vadd.s32 %v5952_v13, %v1272_v35  ;;  %1905 = vst [vmem:[#allocation2 + $0x1a8] sm:$0xff] %v1841_v6  ;;  %vm8015_vm15 = vcmp.ge.s32.totalorder %v6539_v46, 600  ;;  %v6762_v26 = vadd.s32 %v5952_v13, %v1239_v56  ;;  %v6765_v27 = vadd.s32 %v5952_v13, %v1271_v62  ;;  %v5003_v6 = vpop.f32.mrb[26].mxu1  ;;  %v1782_v40 = vld [vmem:[#allocation2 + $0x1d0] sm:$0xff] }
 0x14e   : > { %vm6757_vm2 = vmand %vm8015_vm15, %vm1429_vm3  ;;  %v1242_v28 = vadd.s32 248, %v5949_v11  ;;  %v1274_v31 = vadd.s32 504, %v5949_v11  ;;  %1872 = vst [vmem:[#allocation2 + $0xa0] sm:$0xff] %v1808_v19  ;;  %v1683_v30 = vsel %vm6705_vm6, %v4949_v23, -inf  ;;  %v1715_v46 = vsel %vm6721_vm1, %v4997_v10, -inf }
 0x14f   : > { %1904 = vst [vmem:[#allocation2 + $0x1a0] sm:$0xff] %v1840_v20  ;;  %vm6777_vm3 = vmand %vm1397_vm5, %vm1461_vm9  ;;  %v1241_v39 = vadd.s32 240, %v5949_v11  ;;  %v1273_v35 = vadd.s32 496, %v5949_v11  ;;  %v1811_v52 = vmax.f32 %v1747_v42, %v1683_v30  ;;  %v1843_v32 = vmax.f32 %v1779_v21, %v1715_v46  ;;  %v1781_v11 = vld [vmem:[#allocation2 + $0x1c8] sm:$0xff]  ;;  %v1179_v42 = vpop.f32.mrb[27].mxu1  ;;  %v1752_v30 = vld [vmem:[#allocation2 + $0xe0] sm:$0xff] }
 0x150   : > { %v1682_v50 = vsel %vm6735_vm12, %v999_v37, -inf  ;;  %v1714_v51 = vsel %vm6743_vm14, %v1159_v43, -inf  ;;  %vm8020_vm6 = vcmp.lt.s32.totalorder %v6560_v61, 1024  ;;  %vm8021_vm9 = vcmp.ge.s32.totalorder %v6560_v61, 600  ;;  %v4952_v61 = vpop.f32.mrb[24].mxu0  ;;  %v1784_v46 = vld [vmem:[#allocation2 + $0x1e0] sm:$0xff] }
 0x151   : > { %vm6791_vm5 = vmand %vm8021_vm9, %vm8020_vm6  ;;  %v1810_v56 = vmax.f32 %v1746_v24, %v1682_v50  ;;  %v1842_v62 = vmax.f32 %v1778_v7, %v1714_v51  ;;  %vm8024_vm1 = vcmp.ge.s32.totalorder %v6599_v16, 600  ;;  %vm1369_vm4 = vcmp.ge.s32.totalorder %v6748_v3, 600  ;;  %1875 = vst [vmem:[#allocation2 + $0xb8] sm:$0xff] %v1811_v52  ;;  %v1009_v57 = vpop.f32.mrb[25].mxu0  ;;  %v1753_v7 = vld [vmem:[#allocation2 + $0xe8] sm:$0xff] }
 0x152   : > { %vm6799_vm0 = vmand %vm8024_vm1, %vm1460_vm7  ;;  %vm1433_vm12 = vcmp.lt.s32.totalorder %v6748_v3, 1024  ;;  %1907 = vst [vmem:[#allocation2 + $0x1b8] sm:$0xff] %v1843_v32  ;;  %vm8027_vm8 = vcmp.lt.s32.totalorder %v6642_v25, 1024  ;;  %vm8028_vm14 = vcmp.ge.s32.totalorder %v6642_v25, 600  ;;  %vm1401_vm7 = vcmp.ge.s32.totalorder %v6751_v44, 600  ;;  %v4955_v17 = vpop.f32.mrb[26].mxu0 }
 0x153   : > { %vm6809_vm15 = vmand %vm8028_vm14, %vm8027_vm8  ;;  %vm1465_vm6 = vcmp.lt.s32.totalorder %v6751_v44, 1024  ;;  %vm1368_vm9 = vcmp.ge.s32.totalorder %v6762_v26, 600  ;;  %v1307_v16 = vadd.s32 %v5952_v13, %v1242_v28  ;;  %1874 = vst [vmem:[#allocation2 + $0xb0] sm:$0xff] %v1810_v56  ;;  %v1685_v4 = vsel %vm6757_vm2, %v4952_v61, -inf  ;;  %v1019_v20 = vpop.f32.mrb[27].mxu0 }
 0x154   : > { %1906 = vst [vmem:[#allocation2 + $0x1b0] sm:$0xff] %v1842_v62  ;;  %v1717_v25 = vsel %vm6777_vm3, %v5000_v53, -inf  ;;  %vm6825_vm1 = vmand %vm1399_vm13, %vm1463_vm10  ;;  %vm1432_vm8 = vcmp.lt.s32.totalorder %v6762_v26, 1024  ;;  %v1339_v8 = vadd.s32 %v5952_v13, %v1274_v31  ;;  %v1813_v9 = vmax.f32 %v1749_v55, %v1685_v4  ;;  %v4958_v26 = vpop.f32.mrb[28].mxu0  ;;  %v5006_v31 = vpop.f32.mrb[28].mxu1  ;;  %v1755_v62 = vld [vmem:[#allocation2 + $0xf8] sm:$0xff] }
 0x155   : > { %v1845_v34 = vmax.f32 %v1781_v11, %v1717_v25  ;;  %v1684_v54 = vsel %vm6791_vm5, %v1009_v57, -inf  ;;  %v1716_v59 = vsel %vm6799_vm0, %v1169_v5, -inf  ;;  %vm8033_vm2 = vcmp.lt.s32.totalorder %v6658_v41, 1024  ;;  %vm6857_vm14 = vmand %vm1369_vm4, %vm1433_vm12  ;;  %v1029_v48 = vpop.f32.mrb[29].mxu0  ;;  %v1787_v11 = vld [vmem:[#allocation2 + $0x1f8] sm:$0xff]  ;;  %v1754_v53 = vld [vmem:[#allocation2 + $0xf0] sm:$0xff] }
 0x156   : > { %vm8034_vm13 = vcmp.ge.s32.totalorder %v6658_v41, 600  ;;  %v1812_v49 = vmax.f32 %v1748_v47, %v1684_v54  ;;  %v1844_v2 = vmax.f32 %v1780_v0, %v1716_v59  ;;  %vm8037_vm3 = vcmp.ge.s32.totalorder %v6661_v33, 600  ;;  %1877 = vst [vmem:[#allocation2 + $0xc8] sm:$0xff] %v1813_v9  ;;  %vm6871_vm4 = vmand %vm1401_vm7, %vm1465_vm6  ;;  %v4961_v63 = vpop.f32.mrb[30].mxu0  ;;  %v1786_v0 = vld [vmem:[#allocation2 + $0x1f0] sm:$0xff] }
 0x157   : > { %vm6839_vm10 = vmand %vm8034_vm13, %vm8033_vm2  ;;  %vm1400_vm0 = vcmp.ge.s32.totalorder %v6765_v27, 600  ;;  %v1306_v41 = vadd.s32 %v5952_v13, %v1241_v39  ;;  %1909 = vst [vmem:[#allocation2 + $0x1c8] sm:$0xff] %v1845_v34  ;;  %vm1371_vm2 = vcmp.ge.s32.totalorder %v1307_v16, 600  ;;  %vm1435_vm13 = vcmp.lt.s32.totalorder %v1307_v16, 1024  ;;  %v1189_v39 = vpop.f32.mrb[29].mxu1  ;;  %v1039_v4 = vpop.f32.mrb[31].mxu0 }
 0x158   : > { %vm6847_vm5 = vmand %vm8037_vm3, %vm1462_vm11  ;;  %vm1464_vm11 = vcmp.lt.s32.totalorder %v6765_v27, 1024  ;;  %v1338_v33 = vadd.s32 %v5952_v13, %v1273_v35  ;;  %1876 = vst [vmem:[#allocation2 + $0xc0] sm:$0xff] %v1812_v49  ;;  %v1687_v15 = vsel %vm6809_vm15, %v4955_v17, -inf  ;;  %v1719_v19 = vsel %vm6825_vm1, %v5003_v6, -inf  ;;  %v5009_v61 = vpop.f32.mrb[30].mxu1 }
 0x159   : > { %1908 = vst [vmem:[#allocation2 + $0x1c0] sm:$0xff] %v1844_v2  ;;  %vm1403_vm12 = vcmp.ge.s32.totalorder %v1339_v8, 600  ;;  %vm1467_vm3 = vcmp.lt.s32.totalorder %v1339_v8, 1024  ;;  %v1815_v13 = vmax.f32 %v1751_v12, %v1687_v15  ;;  %v1847_v22 = vmax.f32 %v1783_v14, %v1719_v19  ;;  %vm6883_vm15 = vmand %vm1368_vm9, %vm1432_vm8  ;;  %v1199_v25 = vpop.f32.mrb[31].mxu1 }
 0x15a   : > { %v1686_v3 = vsel %vm6839_vm10, %v1019_v20, -inf  ;;  %v1718_v23 = vsel %vm6847_vm5, %v1179_v42, -inf  ;;  %vm6891_vm7 = vmand %vm1400_vm0, %vm1464_vm11  ;;  %vm1370_vm6 = vcmp.ge.s32.totalorder %v1306_v41, 600  ;;  %vm1434_vm1 = vcmp.lt.s32.totalorder %v1306_v41, 1024 }
 0x15b   : > { %v1814_v10 = vmax.f32 %v1750_v36, %v1686_v3  ;;  %v1846_v24 = vmax.f32 %v1782_v40, %v1718_v23  ;;  %1879 = vst [vmem:[#allocation2 + $0xd8] sm:$0xff] %v1815_v13  ;;  %1911 = vst [vmem:[#allocation2 + $0x1d8] sm:$0xff] %v1847_v22  ;;  %vm1402_vm8 = vcmp.ge.s32.totalorder %v1338_v33, 600  ;;  %vm1466_vm10 = vcmp.lt.s32.totalorder %v1338_v33, 1024 }
 0x15c   : > { %vm6897_vm9 = vmand %vm1371_vm2, %vm1435_vm13  ;;  %v1689_v27 = vsel %vm6857_vm14, %v4958_v26, -inf  ;;  %v1721_v43 = vsel %vm6871_vm4, %v5006_v31, -inf  ;;  %v1688_v50 = vsel %vm6883_vm15, %v1029_v48, -inf  ;;  %v1720_v51 = vsel %vm6891_vm7, %v1189_v39, -inf }
 0x15d   : > { %1878 = vst [vmem:[#allocation2 + $0xd0] sm:$0xff] %v1814_v10  ;;  %1910 = vst [vmem:[#allocation2 + $0x1d0] sm:$0xff] %v1846_v24  ;;  %v1817_v52 = vmax.f32 %v1753_v7, %v1689_v27  ;;  %v1849_v32 = vmax.f32 %v1785_v45, %v1721_v43  ;;  %v1816_v60 = vmax.f32 %v1752_v30, %v1688_v50  ;;  %v1691_v1 = vsel %vm6897_vm9, %v4961_v63, -inf }
 0x15e   : > { %vm6907_vm5 = vmand %vm1403_vm12, %vm1467_vm3  ;;  %v1848_v56 = vmax.f32 %v1784_v46, %v1720_v51  ;;  %v1819_v57 = vmax.f32 %v1755_v62, %v1691_v1 }
 0x15f   : > { %vm6917_vm0 = vmand %vm1370_vm6, %vm1434_vm1  ;;  %1881 = vst [vmem:[#allocation2 + $0xe8] sm:$0xff] %v1817_v52  ;;  %v1723_v16 = vsel %vm6907_vm5, %v5009_v61, -inf }
 0x160   : > { %vm6923_vm14 = vmand %vm1402_vm8, %vm1466_vm10  ;;  %1913 = vst [vmem:[#allocation2 + $0x1e8] sm:$0xff] %v1849_v32  ;;  %v1851_v5 = vmax.f32 %v1787_v11, %v1723_v16  ;;  %v1690_v38 = vsel %vm6917_vm0, %v1039_v4, -inf }
 0x161   : > { %1880 = vst [vmem:[#allocation2 + $0xe0] sm:$0xff] %v1816_v60  ;;  %1912 = vst [vmem:[#allocation2 + $0x1e0] sm:$0xff] %v1848_v56  ;;  %v1722_v8 = vsel %vm6923_vm14, %v1199_v25, -inf  ;;  %v1818_v9 = vmax.f32 %v1754_v53, %v1690_v38 }
 0x162   : > { %v1850_v34 = vmax.f32 %v1786_v0, %v1722_v8  ;;  %1883 = vst [vmem:[#allocation2 + $0xf8] sm:$0xff] %v1819_v57  ;;  %1915 = vst [vmem:[#allocation2 + $0x1f8] sm:$0xff] %v1851_v5 }
 0x163   : > { %1882 = vst [vmem:[#allocation2 + $0xf0] sm:$0xff] %v1818_v9 }
 0x164   : > { %1914 = vst [vmem:[#allocation2 + $0x1f0] sm:$0xff] %v1850_v34 }
 0x165 PF: > { %p4533_p7 = scmp.ne.s32.totalorder %s5720_s30, 1 }
 0x166   : > { %v2059_v54 = vld [vmem:[%s7848_s4] sm:$0xff] (!%p4533_p7)  ;;  %v2060_v59 = vld [vmem:[%s7848_s4 + $0x8] sm:$0xff] (!%p4533_p7)  ;;  %v2061_v12 = vld [vmem:[%s7848_s4 + $0x10] sm:$0xff] (!%p4533_p7)  ;;  %v5630_v29 = vmov (!%p4533_p7), 0.0|0.0   ;;  %vm5631_vm11 = vmmov (!%p4533_p7), 0   ;;  %v5632_v14 = vmov (!%p4533_p7), 0.0  }
 0x167   : > { %1919 = sbr.rel (%p4533_p7) target bundleno = 634 (0x27a), region = 88  ;;  %5400 = vmatprep.subr.bf16.mxu0 (!%p4533_p7), %v5630_v29  ;;  %v5401_v49 = vpack.c.bf16 (!%p4533_p7), %v2060_v59, %v2059_v54  ;;  %v2062_v2 = vld [vmem:[%s7848_s4 + $0x18] sm:$0xff] (!%p4533_p7)  ;;  %5042 = vmatprep.mubr.msk.f32.mxu0 (!%p4533_p7), %vm5631_vm11, %v5632_v14  ;;  %v2063_v58 = vld [vmem:[%s7848_s4 + $0x20] sm:$0xff] (!%p4533_p7)  ;;  %v2064_v41 = vld [vmem:[%s7848_s4 + $0x28] sm:$0xff] (!%p4533_p7)  ;;  %v5633_v20 = vmov (!%p4533_p7), -inf  }
 0x168   : > { %v5404_v36 = vpack.c.bf16 (!%p4533_p7), %v2062_v2, %v2061_v12  ;;  %v1920_v17 = vld [vmem:[#allocation2] sm:$0xff] (!%p4533_p7)  ;;  %v1921_v6 = vld [vmem:[#allocation2 + $0x8] sm:$0xff] (!%p4533_p7)  ;;  %v6959_v40 = vld [vmem:[%s7848_s4 + $0x30] sm:$0xff] (!%p4533_p7)  ;;  %v5407_v42 = vpack.c.bf16 (!%p4533_p7), %v2064_v41, %v2063_v58 }
 0x169   : > { %5402 = vmatpush3.bf16.msra.mxu0 (!%p4533_p7), %v5401_v49  ;;  %v6964_v18 = vld [vmem:[%s7848_s4 + $0x38] sm:$0xff] (!%p4533_p7)  ;;  %v1922_v33 = vld [vmem:[#allocation2 + $0x10] sm:$0xff] (!%p4533_p7)  ;;  %v1924_v19 = vld [vmem:[#allocation2 + $0x20] sm:$0xff] (!%p4533_p7)  ;;  %2148 = vst [vmem:[#allocation2] sm:$0xff] (!%p4533_p7), %v5633_v20 }
 0x16a   : > { %5403 = vmatprep.subr.bf16.mxu0 (!%p4533_p7), %v5630_v29  ;;  %v1923_v15 = vld [vmem:[#allocation2 + $0x18] sm:$0xff] (!%p4533_p7)  ;;  %2149 = vst [vmem:[#allocation2 + $0x8] sm:$0xff] (!%p4533_p7), %v5633_v20  ;;  %v1925_v21 = vld [vmem:[#allocation2 + $0x28] sm:$0xff] (!%p4533_p7)  ;;  %v1926_v13 = vld [vmem:[#allocation2 + $0x30] sm:$0xff] (!%p4533_p7)  ;;  %v1984_v3 = vmax.f32 (!%p4533_p7), %v1920_v17, %v1924_v19  ;;  %v5410_v32 = vpack.c.bf16 (!%p4533_p7), %v6964_v18, %v6959_v40 }
 0x16b   : > { %v1927_v22 = vld [vmem:[#allocation2 + $0x38] sm:$0xff] (!%p4533_p7)  ;;  %2150 = vst [vmem:[#allocation2 + $0x10] sm:$0xff] (!%p4533_p7), %v5633_v20  ;;  %2151 = vst [vmem:[#allocation2 + $0x18] sm:$0xff] (!%p4533_p7), %v5633_v20  ;;  %v1928_v23 = vld [vmem:[#allocation2 + $0x40] sm:$0xff] (!%p4533_p7)  ;;  %v1985_v24 = vmax.f32 (!%p4533_p7), %v1921_v6, %v1925_v21  ;;  %v1986_v7 = vmax.f32 (!%p4533_p7), %v1922_v33, %v1926_v13 }
 0x16c   : > { %2152 = vst [vmem:[#allocation2 + $0x20] sm:$0xff] (!%p4533_p7), %v5633_v20  ;;  %v1929_v44 = vld [vmem:[#allocation2 + $0x48] sm:$0xff] (!%p4533_p7)  ;;  %v1930_v10 = vld [vmem:[#allocation2 + $0x50] sm:$0xff] (!%p4533_p7)  ;;  %v1987_v45 = vmax.f32 (!%p4533_p7), %v1923_v15, %v1927_v22  ;;  %2153 = vst [vmem:[#allocation2 + $0x28] sm:$0xff] (!%p4533_p7), %v5633_v20  ;;  %v1988_v30 = vmax.f32 (!%p4533_p7), %v1984_v3, %v1928_v23 }
 0x16d   : > { %5405 = vmatpush3.bf16.msra.mxu0 (!%p4533_p7), %v5404_v36  ;;  %2154 = vst [vmem:[#allocation2 + $0x30] sm:$0xff] (!%p4533_p7), %v5633_v20  ;;  %2155 = vst [vmem:[#allocation2 + $0x38] sm:$0xff] (!%p4533_p7), %v5633_v20  ;;  %v1931_v28 = vld [vmem:[#allocation2 + $0x58] sm:$0xff] (!%p4533_p7)  ;;  %v1932_v26 = vld [vmem:[#allocation2 + $0x60] sm:$0xff] (!%p4533_p7)  ;;  %v1989_v39 = vmax.f32 (!%p4533_p7), %v1985_v24, %v1929_v44  ;;  %v1990_v35 = vmax.f32 (!%p4533_p7), %v1986_v7, %v1930_v10 }
 0x16e   : > { %5406 = vmatprep.subr.bf16.mxu0 %v5630_v29  ;;  %v1933_v31 = vld [vmem:[#allocation2 + $0x68] sm:$0xff]  ;;  %2156 = vst [vmem:[#allocation2 + $0x40] sm:$0xff] %v5633_v20  ;;  %2157 = vst [vmem:[#allocation2 + $0x48] sm:$0xff] %v5633_v20  ;;  %v6981_v46 = vld [vmem:[%s7848_s4 + $0x40] sm:$0xff]  ;;  %v1991_v52 = vmax.f32 %v1987_v45, %v1931_v28  ;;  %v1992_v60 = vmax.f32 %v1988_v30, %v1932_v26 }
 0x16f   : > { %2158 = vst [vmem:[#allocation2 + $0x50] sm:$0xff] %v5633_v20  ;;  %v6986_v37 = vld [vmem:[%s7848_s4 + $0x48] sm:$0xff]  ;;  %v1934_v27 = vld [vmem:[#allocation2 + $0x70] sm:$0xff]  ;;  %v1935_v43 = vld [vmem:[#allocation2 + $0x78] sm:$0xff]  ;;  %v1993_v47 = vmax.f32 %v1989_v39, %v1933_v31 }
 0x170   : > { %v1936_v48 = vld [vmem:[#allocation2 + $0x80] sm:$0xff]  ;;  %2159 = vst [vmem:[#allocation2 + $0x58] sm:$0xff] %v5633_v20  ;;  %2160 = vst [vmem:[#allocation2 + $0x60] sm:$0xff] %v5633_v20  ;;  %v1937_v50 = vld [vmem:[#allocation2 + $0x88] sm:$0xff]  ;;  %v1994_v63 = vmax.f32 %v1990_v35, %v1934_v27  ;;  %v1995_v61 = vmax.f32 %v1991_v52, %v1935_v43  ;;  %v5413_v54 = vpack.c.bf16 %v6986_v37, %v6981_v46 }
 0x171   : > { %2161 = vst [vmem:[#allocation2 + $0x68] sm:$0xff] %v5633_v20  ;;  %5408 = vmatpush3.bf16.msra.mxu0 %v5407_v42  ;;  %v1938_v51 = vld [vmem:[#allocation2 + $0x90] sm:$0xff]  ;;  %v1939_v55 = vld [vmem:[#allocation2 + $0x98] sm:$0xff]  ;;  %2162 = vst [vmem:[#allocation2 + $0x70] sm:$0xff] %v5633_v20  ;;  %v1996_v16 = vmax.f32 %v1992_v60, %v1936_v48  ;;  %v1997_v8 = vmax.f32 %v1993_v47, %v1937_v50 }
 0x172   : > { %2163 = vst [vmem:[#allocation2 + $0x78] sm:$0xff] %v5633_v20  ;;  %2164 = vst [vmem:[#allocation2 + $0x80] sm:$0xff] %v5633_v20  ;;  %5409 = vmatprep.subr.bf16.mxu0 %v5630_v29  ;;  %v1940_v56 = vld [vmem:[#allocation2 + $0xa0] sm:$0xff]  ;;  %v1941_v62 = vld [vmem:[#allocation2 + $0xa8] sm:$0xff]  ;;  %v1998_v9 = vmax.f32 %v1994_v63, %v1938_v51  ;;  %v1999_v34 = vmax.f32 %v1995_v61, %v1939_v55 }
 0x173   : > { %v1942_v11 = vld [vmem:[#allocation2 + $0xb0] sm:$0xff]  ;;  %2165 = vst [vmem:[#allocation2 + $0x88] sm:$0xff] %v5633_v20  ;;  %2166 = vst [vmem:[#allocation2 + $0x90] sm:$0xff] %v5633_v20  ;;  %v1943_v53 = vld [vmem:[#allocation2 + $0xb8] sm:$0xff]  ;;  %v2000_v2 = vmax.f32 %v1996_v16, %v1940_v56  ;;  %v2001_v41 = vmax.f32 %v1997_v8, %v1941_v62 }
 0x174   : > { %2167 = vst [vmem:[#allocation2 + $0x98] sm:$0xff] %v5633_v20  ;;  %v1944_v0 = vld [vmem:[#allocation2 + $0xc0] sm:$0xff]  ;;  %v1945_v1 = vld [vmem:[#allocation2 + $0xc8] sm:$0xff]  ;;  %2168 = vst [vmem:[#allocation2 + $0xa0] sm:$0xff] %v5633_v20  ;;  %v2002_v17 = vmax.f32 %v1998_v9, %v1942_v11  ;;  %v2003_v6 = vmax.f32 %v1999_v34, %v1943_v53 }
 0x175   : > { %2169 = vst [vmem:[#allocation2 + $0xa8] sm:$0xff] %v5633_v20  ;;  %2170 = vst [vmem:[#allocation2 + $0xb0] sm:$0xff] %v5633_v20  ;;  %v7006_v4 = vld [vmem:[%s7848_s4 + $0x50] sm:$0xff]  ;;  %v7011_v25 = vld [vmem:[%s7848_s4 + $0x58] sm:$0xff]  ;;  %5411 = vmatpush3.bf16.msra.mxu0 %v5410_v32  ;;  %v2004_v15 = vmax.f32 %v2000_v2, %v1944_v0  ;;  %v2005_v3 = vmax.f32 %v2001_v41, %v1945_v1 }
 0x176   : > { %v1946_v57 = vld [vmem:[#allocation2 + $0xd0] sm:$0xff]  ;;  %v1947_v5 = vld [vmem:[#allocation2 + $0xd8] sm:$0xff]  ;;  %v7013_v38 = vld [vmem:[#allocation2 + $0xe0] sm:$0xff]  ;;  %2171 = vst [vmem:[#allocation2 + $0xb8] sm:$0xff] %v5633_v20  ;;  %5412 = vmatprep.subr.bf16.mxu0 %v5630_v29  ;;  %v5416_v10 = vpack.c.bf16 %v7011_v25, %v7006_v4 }
 0x177   : > { %2172 = vst [vmem:[#allocation2 + $0xc0] sm:$0xff] %v5633_v20  ;;  %2173 = vst [vmem:[#allocation2 + $0xc8] sm:$0xff] %v5633_v20  ;;  %v7020_v59 = vld [vmem:[#allocation2 + $0xe8] sm:$0xff]  ;;  %v7022_v12 = vld [vmem:[#allocation2 + $0xf0] sm:$0xff]  ;;  %v2006_v23 = vmax.f32 %v2002_v17, %v1946_v57  ;;  %v2007_v44 = vmax.f32 %v2003_v6, %v1947_v5  ;;  %v2008_v28 = vmax.f32 %v2004_v15, %v7013_v38 }
 0x178   : > { %v7024_v49 = vld [vmem:[#allocation2 + $0xf8] sm:$0xff]  ;;  %2174 = vst [vmem:[#allocation2 + $0xd0] sm:$0xff] %v5633_v20  ;;  %2175 = vst [vmem:[#allocation2 + $0xd8] sm:$0xff] %v5633_v20  ;;  %v1952_v14 = vld [vmem:[#allocation2 + $0x100] sm:$0xff]  ;;  %v2009_v46 = vmax.f32 %v2005_v3, %v7020_v59 }
 0x179   : > { %2176 = vst [vmem:[#allocation2 + $0xe0] sm:$0xff] %v5633_v20  ;;  %v1953_v36 = vld [vmem:[#allocation2 + $0x108] sm:$0xff]  ;;  %v1954_v58 = vld [vmem:[#allocation2 + $0x110] sm:$0xff]  ;;  %2177 = vst [vmem:[#allocation2 + $0xe8] sm:$0xff] %v5633_v20  ;;  %5414 = vmatpush3.bf16.msra.mxu0 %v5413_v54  ;;  %v2010_v37 = vmax.f32 %v2006_v23, %v7022_v12  ;;  %v2011_v27 = vmax.f32 %v2007_v44, %v7024_v49  ;;  %v2012_v35 = vmax.f32 %v2008_v28, %v1952_v14 }
 0x17a   : > { %2178 = vst [vmem:[#allocation2 + $0xf0] sm:$0xff] %v5633_v20  ;;  %2179 = vst [vmem:[#allocation2 + $0xf8] sm:$0xff] %v5633_v20  ;;  %v1955_v40 = vld [vmem:[#allocation2 + $0x118] sm:$0xff]  ;;  %v7033_v18 = vld [vmem:[#allocation2 + $0x120] sm:$0xff]  ;;  %5415 = vmatprep.subr.bf16.mxu0 %v5630_v29  ;;  %v2013_v60 = vmax.f32 %v2009_v46, %v1953_v36 }
 0x17b   : > { %v7035_v33 = vld [vmem:[#allocation2 + $0x128] sm:$0xff]  ;;  %2180 = vst [vmem:[#allocation2 + $0x100] sm:$0xff] %v5633_v20  ;;  %2181 = vst [vmem:[#allocation2 + $0x108] sm:$0xff] %v5633_v20  ;;  %v7043_v19 = vld [vmem:[%s7848_s4 + $0x60] sm:$0xff]  ;;  %v2014_v56 = vmax.f32 %v2010_v37, %v1954_v58  ;;  %v2015_v62 = vmax.f32 %v2011_v27, %v1955_v40  ;;  %v2016_v53 = vmax.f32 %v2012_v35, %v7033_v18 }
 0x17c   : > { %2182 = vst [vmem:[#allocation2 + $0x110] sm:$0xff] %v5633_v20  ;;  %v7048_v42 = vld [vmem:[%s7848_s4 + $0x68] sm:$0xff]  ;;  %v7050_v21 = vld [vmem:[#allocation2 + $0x130] sm:$0xff]  ;;  %v7052_v13 = vld [vmem:[#allocation2 + $0x138] sm:$0xff]  ;;  %v2017_v4 = vmax.f32 %v2013_v60, %v7035_v33 }
 0x17d   : > { %v7054_v22 = vld [vmem:[#allocation2 + $0x140] sm:$0xff]  ;;  %2183 = vst [vmem:[#allocation2 + $0x118] sm:$0xff] %v5633_v20  ;;  %2184 = vst [vmem:[#allocation2 + $0x120] sm:$0xff] %v5633_v20  ;;  %v7061_v24 = vld [vmem:[#allocation2 + $0x148] sm:$0xff]  ;;  %5417 = vmatpush3.bf16.msra.mxu0 %v5416_v10  ;;  %v5419_v11 = vpack.c.bf16 %v7048_v42, %v7043_v19  ;;  %v2018_v25 = vmax.f32 %v2014_v56, %v7050_v21  ;;  %v2019_v57 = vmax.f32 %v2015_v62, %v7052_v13 }
 0x17e   : > { %2185 = vst [vmem:[#allocation2 + $0x128] sm:$0xff] %v5633_v20  ;;  %v7063_v7 = vld [vmem:[#allocation2 + $0x150] sm:$0xff]  ;;  %v7065_v45 = vld [vmem:[#allocation2 + $0x158] sm:$0xff]  ;;  %2186 = vst [vmem:[#allocation2 + $0x130] sm:$0xff] %v5633_v20  ;;  %5418 = vmatprep.subr.bf16.mxu0 %v5630_v29  ;;  %v2020_v9 = vmax.f32 %v2016_v53, %v7054_v22  ;;  %v2021_v59 = vmax.f32 %v2017_v4, %v7061_v24 }
 0x17f   : > { %2187 = vst [vmem:[#allocation2 + $0x138] sm:$0xff] %v5633_v20  ;;  %2188 = vst [vmem:[#allocation2 + $0x140] sm:$0xff] %v5633_v20  ;;  %v7072_v26 = vld [vmem:[#allocation2 + $0x160] sm:$0xff]  ;;  %v7074_v31 = vld [vmem:[#allocation2 + $0x168] sm:$0xff]  ;;  %v2022_v12 = vmax.f32 %v2018_v25, %v7063_v7  ;;  %v2023_v49 = vmax.f32 %v2019_v57, %v7065_v45 }
 0x180   : > { %v7076_v30 = vld [vmem:[#allocation2 + $0x170] sm:$0xff]  ;;  %2189 = vst [vmem:[#allocation2 + $0x148] sm:$0xff] %v5633_v20  ;;  %2190 = vst [vmem:[#allocation2 + $0x150] sm:$0xff] %v5633_v20  ;;  %v7084_v43 = vld [vmem:[#allocation2 + $0x178] sm:$0xff]  ;;  %v2024_v14 = vmax.f32 %v2020_v9, %v7072_v26  ;;  %v2025_v36 = vmax.f32 %v2021_v59, %v7074_v31  ;;  %v2055_v26 = vlaneseq }
 0x181   : > { %2191 = vst [vmem:[#allocation2 + $0x158] sm:$0xff] %v5633_v20  ;;  %v1968_v48 = vld [vmem:[#allocation2 + $0x180] sm:$0xff]  ;;  %v1969_v39 = vld [vmem:[#allocation2 + $0x188] sm:$0xff]  ;;  %2192 = vst [vmem:[#allocation2 + $0x160] sm:$0xff] %v5633_v20  ;;  %5420 = vmatpush3.bf16.msra.mxu0 %v5419_v11  ;;  %v2026_v58 = vmax.f32 %v2022_v12, %v7076_v30  ;;  %v2027_v41 = vmax.f32 %v2023_v49, %v7084_v43 }
 0x182   : > { %2193 = vst [vmem:[#allocation2 + $0x168] sm:$0xff] %v5633_v20  ;;  %2194 = vst [vmem:[#allocation2 + $0x170] sm:$0xff] %v5633_v20  ;;  %v2073_v52 = vld [vmem:[%s7848_s4 + $0x70] sm:$0xff]  ;;  %v2074_v32 = vld [vmem:[%s7848_s4 + $0x78] sm:$0xff]  ;;  %5421 = vmatprep.subr.bf16.mxu0 %v5630_v29  ;;  %v2028_v17 = vmax.f32 %v2024_v14, %v1968_v48  ;;  %v2029_v6 = vmax.f32 %v2025_v36, %v1969_v39  ;;  %v2056_v46 = vshrl.u32 %v2055_v26, 7 }
 0x183   : > { %v1970_v50 = vld [vmem:[#allocation2 + $0x190] sm:$0xff]  ;;  %v1971_v51 = vld [vmem:[#allocation2 + $0x198] sm:$0xff]  ;;  %v1972_v55 = vld [vmem:[#allocation2 + $0x1a0] sm:$0xff]  ;;  %2195 = vst [vmem:[#allocation2 + $0x178] sm:$0xff] %v5633_v20  ;;  %v5422_v2 = vpack.c.bf16 %v2074_v32, %v2073_v52 }
 0x184   : > { %2196 = vst [vmem:[#allocation2 + $0x180] sm:$0xff] %v5633_v20  ;;  %2197 = vst [vmem:[#allocation2 + $0x188] sm:$0xff] %v5633_v20  ;;  %v1973_v47 = vld [vmem:[#allocation2 + $0x1a8] sm:$0xff]  ;;  %v1974_v63 = vld [vmem:[#allocation2 + $0x1b0] sm:$0xff]  ;;  %v2030_v40 = vmax.f32 %v2026_v58, %v1970_v50  ;;  %v2031_v18 = vmax.f32 %v2027_v41, %v1971_v51  ;;  %v2032_v33 = vmax.f32 %v2028_v17, %v1972_v55  ;;  %v2057_v48 = vsub.s32 0, %v2056_v46 }
 0x185   : > { %v1975_v61 = vld [vmem:[#allocation2 + $0x1b8] sm:$0xff]  ;;  %2198 = vst [vmem:[#allocation2 + $0x190] sm:$0xff] %v5633_v20  ;;  %2199 = vst [vmem:[#allocation2 + $0x198] sm:$0xff] %v5633_v20  ;;  %v1976_v0 = vld [vmem:[#allocation2 + $0x1c0] sm:$0xff]  ;;  %5423 = vmatpush3.bf16.msra.mxu0 %v5422_v2  ;;  %v2033_v15 = vmax.f32 %v2029_v6, %v1973_v47 }
 0x186   : > { %2200 = vst [vmem:[#allocation2 + $0x1a0] sm:$0xff] %v5633_v20  ;;  %v1977_v1 = vld [vmem:[#allocation2 + $0x1c8] sm:$0xff]  ;;  %v1978_v16 = vld [vmem:[#allocation2 + $0x1d0] sm:$0xff]  ;;  %2201 = vst [vmem:[#allocation2 + $0x1a8] sm:$0xff] %v5633_v20  ;;  %v2034_v19 = vmax.f32 %v2030_v40, %v1974_v63  ;;  %v2035_v42 = vmax.f32 %v2031_v18, %v1975_v61  ;;  %v2036_v21 = vmax.f32 %v2032_v33, %v1976_v0 }
 0x187   : > { %2202 = vst [vmem:[#allocation2 + $0x1b0] sm:$0xff] %v5633_v20  ;;  %2203 = vst [vmem:[#allocation2 + $0x1b8] sm:$0xff] %v5633_v20  ;;  %v1979_v5 = vld [vmem:[#allocation2 + $0x1d8] sm:$0xff]  ;;  %v1980_v38 = vld [vmem:[#allocation2 + $0x1e0] sm:$0xff]  ;;  %v2037_v13 = vmax.f32 %v2033_v15, %v1977_v1 }
 0x188   : > { %v1981_v8 = vld [vmem:[#allocation2 + $0x1e8] sm:$0xff]  ;;  %2204 = vst [vmem:[#allocation2 + $0x1c0] sm:$0xff] %v5633_v20  ;;  %2205 = vst [vmem:[#allocation2 + $0x1c8] sm:$0xff] %v5633_v20  ;;  %v1982_v34 = vld [vmem:[#allocation2 + $0x1f0] sm:$0xff]  ;;  %v2039_v22 = vmax.f32 %v2035_v42, %v1979_v5  ;;  %v2040_v29 = vmax.f32 %v2036_v21, %v1980_v38 }
 0x189   : > { %2206 = vst [vmem:[#allocation2 + $0x1d0] sm:$0xff] %v5633_v20  ;;  %v1983_v54 = vld [vmem:[#allocation2 + $0x1f8] sm:$0xff]  ;;  %2207 = vst [vmem:[#allocation2 + $0x1d8] sm:$0xff] %v5633_v20  ;;  %v2041_v3 = vmax.f32 %v2037_v13, %v1981_v8  ;;  %v2053_v27 = vld [vmem:[%s7846_s2] sm:$0x1] }
 0x18a   : > { %2208 = vst [vmem:[#allocation2 + $0x1e0] sm:$0xff] %v5633_v20  ;;  %2209 = vst [vmem:[#allocation2 + $0x1e8] sm:$0xff] %v5633_v20  ;;  %v2043_v44 = vmax.f32 %v2039_v22, %v1983_v54  ;;  %v2145_v52 = vld [vmem:[%s7849_s5] sm:$0x1] }
 0x18b   : > { %2210 = vst [vmem:[#allocation2 + $0x1f0] sm:$0xff] %v5633_v20  ;;  %2211 = vst [vmem:[#allocation2 + $0x1f8] sm:$0xff] %v5633_v20  ;;  %v2038_v20 = vmax.f32 %v2034_v19, %v1978_v16  ;;  %v2044_v10 = vmax.f32 %v2040_v29, %v2041_v3 }
 0x18d   : > { %v2042_v23 = vmax.f32 %v2038_v20, %v1982_v34 }
 0x18f   : > { %v2045_v24 = vmax.f32 %v2042_v23, %v2043_v44 }
 0x191   : > { %v2046_v7 = vmax.f32 %v2044_v10, %v2045_v24 }
 0x193   : > { %v2047_v45 = vrot.slane %v2046_v7, 4 }
 0x195   : > { %v2048_v28 = vmax.f32 %v2046_v7, %v2047_v45 }
 0x197   : > { %v2049_v31 = vrot.slane %v2048_v28, 2 }
 0x199   : > { %v2050_v30 = vmax.f32 %v2048_v28, %v2049_v31 }
 0x19b   : > { %v2051_v37 = vrot.slane %v2050_v30, 1 }
 0x19d   : > { %v2052_v43 = vmax.f32 %v2050_v30, %v2051_v37 }
 0x19f   : > { %v2054_v39 = vadd.f32 %v2053_v27, %v2052_v43 }
 0x1a1   : > { %v2058_v35 = vrot.slane %v2054_v39, %v2057_v48 }
 0x1a3   : > { %5043 = vmatmul.mubr.f32.vlgmr.msra.gmra.mrb[0].mxu0 %v2058_v35 }
 0x276   : > { %v2141_v32 = vpop.f32.mrb[0].mxu0 }
 0x277   : > { %v2146_v50 = vadd.f32 %v2145_v52, %v2141_v32  ;;  %v5044_v51 = vpop.f32.mrb[1].mxu0 }
 0x279   : > { %2147 = vst [vmem:[#allocation3] sm:$0x1] %v2146_v50 }
 0x27a PF: > { %2215 = sbr.rel (%p470_p3) target bundleno = 1212 (0x4bc), region = 92  ;;  %v2280_v55 = vld [vmem:[%s7847_s3] sm:$0xff] (!%p470_p3)  ;;  %v2281_v60 = vld [vmem:[%s7847_s3 + $0x8] sm:$0xff] (!%p470_p3)  ;;  %v2282_v56 = vld [vmem:[%s7847_s3 + $0x10] sm:$0xff] (!%p470_p3)  ;;  %vm2293_vm2 = vcmask (!%p470_p3), 359424   ;;  %vm2486_vm13 = vcmask (!%p470_p3), 1043456  }
 0x27b   : > { %v5424_v62 = vpack.c.bf16 (!%p470_p3), %v2281_v60, %v2280_v55  ;;  %v2283_v11 = vld [vmem:[%s7847_s3 + $0x18] sm:$0xff] (!%p470_p3)  ;;  %v2284_v63 = vld [vmem:[%s7847_s3 + $0x20] sm:$0xff] (!%p470_p3)  ;;  %v2285_v61 = vld [vmem:[%s7847_s3 + $0x28] sm:$0xf] (!%p470_p3)  ;;  %vm5634_vm4 = vmmov (!%p470_p3), 1  }
 0x27c   : > { %v5428_v47 = vpack.c.bf16 (!%p470_p3), %v2283_v11, %v2282_v56  ;;  %v2216_v53 = vld [vmem:[%s5734_s21] sm:$0xff] (!%p470_p3)  ;;  %v5432_v0 = vpack.c.bf16 (!%p470_p3), %v2285_v61, %v2284_v63  ;;  %vm5433_vm12 = vmpackc.low (!%p470_p3), %vm2486_vm13, %vm5634_vm4  ;;  %v2217_v1 = vld [vmem:[%s5734_s21 + $0x8] sm:$0xff] (!%p470_p3) }
 0x27d   : > { %5425 = vmatprep.subr.bf16.mxu0 (!%p470_p3), %v5424_v62  ;;  %5057 = vmatprep.mubr.msk.f32.mxu0 (!%p470_p3), %vm2293_vm2, %v2216_v53  ;;  %v2218_v16 = vld [vmem:[%s5734_s21 + $0x10] sm:$0xff] (!%p470_p3)  ;;  %v2219_v4 = vld [vmem:[%s5734_s21 + $0x18] sm:$0xff] (!%p470_p3)  ;;  %v2220_v25 = vld [vmem:[%s5734_s21 + $0x20] sm:$0xff] (!%p470_p3) }
 0x27e   : > { %5427 = vmatpush3.bf16.msra.mxu0 (!%p470_p3), %v5424_v62  ;;  %v2221_v57 = vld [vmem:[%s5734_s21 + $0x28] sm:$0xff] (!%p470_p3)  ;;  %v2222_v5 = vld [vmem:[%s5734_s21 + $0x30] sm:$0xff] (!%p470_p3)  ;;  %v2223_v38 = vld [vmem:[%s5734_s21 + $0x38] sm:$0xff] (!%p470_p3) }
 0x27f   : > { %5429 = vmatprep.subr.bf16.mxu0 (!%p470_p3), %v5428_v47  ;;  %v2939_v8 = vld [vmem:[%s7850_s6] sm:$0xff] (!%p470_p3)  ;;  %v2940_v9 = vld [vmem:[%s7850_s6 + $0x8] sm:$0xff] (!%p470_p3)  ;;  %v2941_v34 = vld [vmem:[%s7850_s6 + $0x10] sm:$0xff] (!%p470_p3) }
 0x280   : > { %v2942_v54 = vld [vmem:[%s7850_s6 + $0x18] sm:$0xff] (!%p470_p3)  ;;  %v2224_v59 = vld [vmem:[%s5734_s21 + $0x40] sm:$0xff] (!%p470_p3)  ;;  %v5438_v12 = vpack.c.bf16 (!%p470_p3), %v2940_v9, %v2939_v8  ;;  %v2944_v14 = vld [vmem:[%s7850_s6 + $0x28] sm:$0xff] (!%p470_p3) }
 0x281   : > { %v5442_v49 = vpack.c.bf16 %v2942_v54, %v2941_v34  ;;  %v2943_v2 = vld [vmem:[%s7850_s6 + $0x20] sm:$0xff]  ;;  %v2225_v36 = vld [vmem:[%s5734_s21 + $0x48] sm:$0xff]  ;;  %v2226_v58 = vld [vmem:[%s5734_s21 + $0x50] sm:$0xff] }
 0x282   : > { %5431 = vmatpush3.bf16.msra.mxu0 %v5428_v47  ;;  %5548 = vmatprep.subr.bf16.mxu1 %v5438_v12  ;;  %v5446_v41 = vpack.c.bf16 %v2944_v14, %v2943_v2  ;;  %v2945_v17 = vld [vmem:[%s7850_s6 + $0x30] sm:$0xff]  ;;  %v2946_v6 = vld [vmem:[%s7850_s6 + $0x38] sm:$0xff]  ;;  %v2228_v18 = vld [vmem:[%s5734_s21 + $0x60] sm:$0xff] }
 0x283   : > { %5434 = vmatprep.subr.msk.bf16.mxu0 %vm5433_vm12, %v5432_v0  ;;  %5556 = vmatpush3.bf16.msra.mxu1 %v5438_v12  ;;  %v2227_v40 = vld [vmem:[%s5734_s21 + $0x58] sm:$0xff]  ;;  %v5450_v33 = vpack.c.bf16 %v2946_v6, %v2945_v17  ;;  %v2947_v15 = vld [vmem:[%s7850_s6 + $0x40] sm:$0xff]  ;;  %v2948_v19 = vld [vmem:[%s7850_s6 + $0x48] sm:$0xff] }
 0x284   : > { %5549 = vmatprep.subr.bf16.mxu1 %v5442_v49  ;;  %v2229_v42 = vld [vmem:[%s5734_s21 + $0x68] sm:$0xff]  ;;  %v2230_v21 = vld [vmem:[%s5734_s21 + $0x70] sm:$0xff]  ;;  %v5454_v13 = vpack.c.bf16 %v2948_v19, %v2947_v15  ;;  %v2950_v22 = vld [vmem:[%s7850_s6 + $0x58] sm:$0xff] }
 0x285   : > { %v2949_v20 = vld [vmem:[%s7850_s6 + $0x50] sm:$0xff]  ;;  %v2231_v29 = vld [vmem:[%s5734_s21 + $0x78] sm:$0xff]  ;;  %v2232_v3 = vld [vmem:[%s5734_s21 + $0x80] sm:$0xff] }
 0x286   : > { %5437 = vmatpush3.bf16.msk.msra.mxu0 %vm5433_vm12, %v5432_v0  ;;  %v5458_v23 = vpack.c.bf16 %v2950_v22, %v2949_v20  ;;  %v2951_v44 = vld [vmem:[%s7850_s6 + $0x60] sm:$0xff]  ;;  %v2952_v10 = vld [vmem:[%s7850_s6 + $0x68] sm:$0xff]  ;;  %v2234_v7 = vld [vmem:[%s5734_s21 + $0x90] sm:$0xff] }
 0x287   : > { %5439 = vmatprep.subr.bf16.mxu0 %v5438_v12  ;;  %5557 = vmatpush3.bf16.msra.mxu1 %v5442_v49  ;;  %v2233_v24 = vld [vmem:[%s5734_s21 + $0x88] sm:$0xff]  ;;  %v5462_v45 = vpack.c.bf16 %v2952_v10, %v2951_v44  ;;  %v2235_v28 = vld [vmem:[%s5734_s21 + $0x98] sm:$0xff]  ;;  %v2236_v26 = vld [vmem:[%s5734_s21 + $0xa0] sm:$0xff] }
 0x288   : > { %5550 = vmatprep.subr.bf16.mxu1 %v5446_v41  ;;  %v2237_v31 = vld [vmem:[%s5734_s21 + $0xa8] sm:$0xff]  ;;  %v2238_v30 = vld [vmem:[%s5734_s21 + $0xb0] sm:$0xff]  ;;  %v2239_v46 = vld [vmem:[%s5734_s21 + $0xb8] sm:$0xff] }
 0x289   : > { %5058 = vmatmul.mubr.msk.f32.vlgmr.msra.gmra.mrb[0].mxu0 %vm2293_vm2, %v2217_v1  ;;  %v2240_v37 = vld [vmem:[%s5734_s21 + $0xc0] sm:$0xff]  ;;  %v2241_v27 = vld [vmem:[%s5734_s21 + $0xc8] sm:$0xff]  ;;  %v2242_v43 = vld [vmem:[%s5734_s21 + $0xd0] sm:$0xff] }
 0x28a   : > { %5060 = vmatprep.mubr.msk.f32.mxu0 %vm2293_vm2, %v2218_v16  ;;  %5441 = vmatpush3.bf16.msra.mxu0 %v5438_v12  ;;  %v2243_v48 = vld [vmem:[%s5734_s21 + $0xd8] sm:$0xff]  ;;  %v2244_v39 = vld [vmem:[%s5734_s21 + $0xe0] sm:$0xff]  ;;  %v2245_v35 = vld [vmem:[%s5734_s21 + $0xe8] sm:$0xff] }
 0x28b   : > { %5443 = vmatprep.subr.bf16.mxu0 %v5442_v49  ;;  %5558 = vmatpush3.bf16.msra.mxu1 %v5446_v41  ;;  %v2246_v52 = vld [vmem:[%s5734_s21 + $0xf0] sm:$0xff]  ;;  %v2247_v32 = vld [vmem:[%s5734_s21 + $0xf8] sm:$0xff]  ;;  %v2248_v50 = vld [vmem:[%s5734_s21 + $0x100] sm:$0xff] }
 0x28c   : > { %5551 = vmatprep.subr.bf16.mxu1 %v5450_v33  ;;  %v2249_v51 = vld [vmem:[%s5734_s21 + $0x108] sm:$0xff]  ;;  %v2250_v55 = vld [vmem:[%s5734_s21 + $0x110] sm:$0xff]  ;;  %v2251_v60 = vld [vmem:[%s5734_s21 + $0x118] sm:$0xff] }
 0x28d   : > { %5061 = vmatmul.mubr.msk.f32.gmra.mrb[2].mxu0 %vm2293_vm2, %v2219_v4  ;;  %v2252_v56 = vld [vmem:[%s5734_s21 + $0x120] sm:$0xff]  ;;  %v2253_v62 = vld [vmem:[%s5734_s21 + $0x128] sm:$0xff]  ;;  %v2254_v11 = vld [vmem:[%s5734_s21 + $0x130] sm:$0xff] }
 0x28e   : > { %5063 = vmatprep.mubr.msk.f32.mxu0 %vm2293_vm2, %v2220_v25  ;;  %5445 = vmatpush3.bf16.msra.mxu0 %v5442_v49  ;;  %v2255_v47 = vld [vmem:[%s5734_s21 + $0x138] sm:$0xff]  ;;  %v2256_v63 = vld [vmem:[%s5734_s21 + $0x140] sm:$0xff]  ;;  %v2257_v61 = vld [vmem:[%s5734_s21 + $0x148] sm:$0xff] }
 0x28f   : > { %5447 = vmatprep.subr.bf16.mxu0 %v5446_v41  ;;  %5559 = vmatpush3.bf16.msra.mxu1 %v5450_v33  ;;  %v2258_v53 = vld [vmem:[%s5734_s21 + $0x150] sm:$0xff]  ;;  %v2259_v0 = vld [vmem:[%s5734_s21 + $0x158] sm:$0xff]  ;;  %v2260_v1 = vld [vmem:[%s5734_s21 + $0x160] sm:$0xff] }
 0x290   : > { %5552 = vmatprep.subr.bf16.mxu1 %v5454_v13  ;;  %v2953_v16 = vld [vmem:[%s7850_s6 + $0x70] sm:$0xff]  ;;  %v2954_v4 = vld [vmem:[%s7850_s6 + $0x78] sm:$0xff]  ;;  %v2264_v8 = vld [vmem:[%s5734_s21 + $0x180] sm:$0xff] }
 0x291   : > { %5064 = vmatmul.mubr.msk.f32.gmra.mrb[4].mxu0 %vm2293_vm2, %v2221_v57  ;;  %v5466_v25 = vpack.c.bf16 %v2954_v4, %v2953_v16  ;;  %v2261_v57 = vld [vmem:[%s5734_s21 + $0x168] sm:$0xff]  ;;  %v2266_v34 = vld [vmem:[%s5734_s21 + $0x190] sm:$0xff]  ;;  %v2267_v54 = vld [vmem:[%s5734_s21 + $0x198] sm:$0xff] }
 0x292   : > { %5066 = vmatprep.mubr.msk.f32.mxu0 %vm2293_vm2, %v2222_v5  ;;  %5449 = vmatpush3.bf16.msra.mxu0 %v5446_v41  ;;  %v2262_v5 = vld [vmem:[%s5734_s21 + $0x170] sm:$0xff]  ;;  %v2265_v9 = vld [vmem:[%s5734_s21 + $0x188] sm:$0xff]  ;;  %v2271_v2 = vld [vmem:[%s5734_s21 + $0x1b8] sm:$0xff] }
 0x293   : > { %5451 = vmatprep.subr.bf16.mxu0 %v5450_v33  ;;  %5560 = vmatpush3.bf16.msra.mxu1 %v5454_v13  ;;  %v2269_v12 = vld [vmem:[%s5734_s21 + $0x1a8] sm:$0xff]  ;;  %v2270_v49 = vld [vmem:[%s5734_s21 + $0x1b0] sm:$0xff]  ;;  %v2272_v14 = vld [vmem:[%s5734_s21 + $0x1c0] sm:$0xff] }
 0x294   : > { %5553 = vmatprep.subr.bf16.mxu1 %v5458_v23  ;;  %v2275_v41 = vld [vmem:[%s5734_s21 + $0x1d8] sm:$0xff]  ;;  %v2276_v17 = vld [vmem:[%s5734_s21 + $0x1e0] sm:$0xff]  ;;  %v2277_v6 = vld [vmem:[%s5734_s21 + $0x1e8] sm:$0xff] }
 0x295   : > { %5067 = vmatmul.mubr.msk.f32.gmra.mrb[6].mxu0 %vm2293_vm2, %v2223_v38  ;;  %v2263_v38 = vld [vmem:[%s5734_s21 + $0x178] sm:$0xff] }
 0x296   : > { %5069 = vmatprep.mubr.msk.f32.mxu0 %vm2293_vm2, %v2224_v59  ;;  %5453 = vmatpush3.bf16.msra.mxu0 %v5450_v33  ;;  %v2268_v59 = vld [vmem:[%s5734_s21 + $0x1a0] sm:$0xff] }
 0x297   : > { %5455 = vmatprep.subr.bf16.mxu0 %v5454_v13  ;;  %5561 = vmatpush3.bf16.msra.mxu1 %v5458_v23  ;;  %v7330_v33 = vld [vmem:[#allocation3] ss:$0 sm:$0xff] }
 0x298   : > { %5554 = vmatprep.subr.bf16.mxu1 %v5462_v45 }
 0x299   : > { %5070 = vmatmul.mubr.msk.f32.gmra.mrb[8].mxu0 %vm2293_vm2, %v2225_v36  ;;  %v2273_v36 = vld [vmem:[%s5734_s21 + $0x1c8] sm:$0xff] }
 0x29a   : > { %5072 = vmatprep.mubr.msk.f32.mxu0 %vm2293_vm2, %v2226_v58  ;;  %5457 = vmatpush3.bf16.msra.mxu0 %v5454_v13  ;;  %v2274_v58 = vld [vmem:[%s5734_s21 + $0x1d0] sm:$0xff] }
 0x29b   : > { %5459 = vmatprep.subr.bf16.mxu0 %v5458_v23  ;;  %5562 = vmatpush3.bf16.msra.mxu1 %v5462_v45 }
 0x29c   : > { %5555 = vmatprep.subr.bf16.mxu1 %v5466_v25 }
 0x29d   : > { %5073 = vmatmul.mubr.msk.f32.gmra.mrb[10].mxu0 %vm2293_vm2, %v2227_v40  ;;  %v2278_v40 = vld [vmem:[%s5734_s21 + $0x1f0] sm:$0xff] }
 0x29e   : > { %5075 = vmatprep.mubr.msk.f32.mxu0 %vm2293_vm2, %v2228_v18  ;;  %5461 = vmatpush3.bf16.msra.mxu0 %v5458_v23  ;;  %v2279_v18 = vld [vmem:[%s5734_s21 + $0x1f8] sm:$0xff]  ;;  %s4603_s21 = sshll.u32 %s4462_s16, 9 }
 0x29f   : > { %5463 = vmatprep.subr.bf16.mxu0 %v5462_v45  ;;  %5563 = vmatpush3.bf16.msra.mxu1 %v5466_v25 }
 0x2a1   : > { %5076 = vmatmul.mubr.msk.f32.gmra.mrb[12].mxu0 %vm2293_vm2, %v2229_v42 }
 0x2a2   : > { %5078 = vmatprep.mubr.msk.f32.mxu0 %vm2293_vm2, %v2230_v21  ;;  %5465 = vmatpush3.bf16.msra.mxu0 %v5462_v45 }
 0x2a3   : > { %5467 = vmatprep.subr.bf16.mxu0 %v5466_v25 }
 0x2a5   : > { %5079 = vmatmul.mubr.msk.f32.gmra.mrb[14].mxu0 %vm2293_vm2, %v2231_v29 }
 0x2a6   : > { %5081 = vmatprep.mubr.msk.f32.mxu0 %vm2293_vm2, %v2232_v3  ;;  %5469 = vmatpush3.bf16.msra.mxu0 %v5466_v25 }
 0x2a9   : > { %5082 = vmatmul.mubr.msk.f32.gmra.mrb[16].mxu0 %vm2293_vm2, %v2233_v24 }
 0x2aa   : > { %5084 = vmatprep.mubr.msk.f32.mxu0 %vm2293_vm2, %v2234_v7 }
 0x2ad   : > { %5085 = vmatmul.mubr.msk.f32.gmra.mrb[18].mxu0 %vm2293_vm2, %v2235_v28 }
 0x2ae   : > { %5087 = vmatprep.mubr.msk.f32.mxu0 %vm2293_vm2, %v2236_v26 }
 0x2b1   : > { %5088 = vmatmul.mubr.msk.f32.gmra.mrb[20].mxu0 %vm2293_vm2, %v2237_v31 }
 0x2b2   : > { %5090 = vmatprep.mubr.msk.f32.mxu0 %vm2293_vm2, %v2238_v30 }
 0x2b5   : > { %5091 = vmatmul.mubr.msk.f32.gmra.mrb[22].mxu0 %vm2293_vm2, %v2239_v46 }
 0x2b6   : > { %5093 = vmatprep.mubr.msk.f32.mxu0 %vm2293_vm2, %v2240_v37 }
 0x2b9   : > { %5094 = vmatmul.mubr.msk.f32.gmra.mrb[24].mxu0 %vm2293_vm2, %v2241_v27 }
 0x2ba   : > { %5096 = vmatprep.mubr.msk.f32.mxu0 %vm2293_vm2, %v2242_v43 }
 0x2bd   : > { %5097 = vmatmul.mubr.msk.f32.gmra.mrb[26].mxu0 %vm2293_vm2, %v2243_v48 }
 0x2be   : > { %5099 = vmatprep.mubr.msk.f32.mxu0 %vm2293_vm2, %v2244_v39 }
 0x2c1   : > { %5100 = vmatmul.mubr.msk.f32.gmra.mrb[28].mxu0 %vm2293_vm2, %v2245_v35 }
 0x2c2   : > { %5102 = vmatprep.mubr.msk.f32.mxu0 %vm2293_vm2, %v2246_v52 }
 0x2c5   : > { %5103 = vmatmul.mubr.msk.f32.gmra.mrb[30].mxu0 %vm2293_vm2, %v2247_v32 }
 0x2c6   : > { %5105 = vmatprep.mubr.msk.f32.mxu0 %vm2293_vm2, %v2248_v50 }
 0x2c9   : > { %5106 = vmatmul.mubr.msk.f32.gmra.mrb[32].mxu0 %vm2293_vm2, %v2249_v51 }
 0x2ca   : > { %5108 = vmatprep.mubr.msk.f32.mxu0 %vm2293_vm2, %v2250_v55 }
 0x2cd   : > { %5109 = vmatmul.mubr.msk.f32.gmra.mrb[34].mxu0 %vm2293_vm2, %v2251_v60 }
 0x2ce   : > { %5111 = vmatprep.mubr.msk.f32.mxu0 %vm2293_vm2, %v2252_v56 }
 0x2d1   : > { %5112 = vmatmul.mubr.msk.f32.gmra.mrb[36].mxu0 %vm2293_vm2, %v2253_v62 }
 0x2d2   : > { %5114 = vmatprep.mubr.msk.f32.mxu0 %vm2293_vm2, %v2254_v11 }
 0x2d5   : > { %5115 = vmatmul.mubr.msk.f32.gmra.mrb[38].mxu0 %vm2293_vm2, %v2255_v47 }
 0x2d6   : > { %5117 = vmatprep.mubr.msk.f32.mxu0 %vm2293_vm2, %v2256_v63 }
 0x2d9   : > { %5118 = vmatmul.mubr.msk.f32.gmra.mrb[40].mxu0 %vm2293_vm2, %v2257_v61 }
 0x2da   : > { %5120 = vmatprep.mubr.msk.f32.mxu0 %vm2293_vm2, %v2258_v53 }
 0x2dd   : > { %5121 = vmatmul.mubr.msk.f32.gmra.mrb[42].mxu0 %vm2293_vm2, %v2259_v0 }
 0x2de   : > { %5123 = vmatprep.mubr.msk.f32.mxu0 %vm2293_vm2, %v2260_v1 }
 0x2e1   : > { %5124 = vmatmul.mubr.msk.f32.gmra.mrb[44].mxu0 %vm2293_vm2, %v2261_v57 }
 0x2e2   : > { %5126 = vmatprep.mubr.msk.f32.mxu0 %vm2293_vm2, %v2262_v5 }
 0x2e5   : > { %5127 = vmatmul.mubr.msk.f32.gmra.mrb[46].mxu0 %vm2293_vm2, %v2263_v38 }
 0x2e6   : > { %5129 = vmatprep.mubr.msk.f32.mxu0 %vm2293_vm2, %v2264_v8 }
 0x2e9   : > { %5130 = vmatmul.mubr.msk.f32.gmra.mrb[48].mxu0 %vm2293_vm2, %v2265_v9 }
 0x2ea   : > { %5132 = vmatprep.mubr.msk.f32.mxu0 %vm2293_vm2, %v2266_v34 }
 0x2ed   : > { %5133 = vmatmul.mubr.msk.f32.gmra.mrb[50].mxu0 %vm2293_vm2, %v2267_v54 }
 0x2ee   : > { %5135 = vmatprep.mubr.msk.f32.mxu0 %vm2293_vm2, %v2268_v59 }
 0x2f1   : > { %5136 = vmatmul.mubr.msk.f32.gmra.mrb[52].mxu0 %vm2293_vm2, %v2269_v12 }
 0x2f2   : > { %5138 = vmatprep.mubr.msk.f32.mxu0 %vm2293_vm2, %v2270_v49 }
 0x2f5   : > { %5139 = vmatmul.mubr.msk.f32.gmra.mrb[54].mxu0 %vm2293_vm2, %v2271_v2 }
 0x2f6   : > { %5141 = vmatprep.mubr.msk.f32.mxu0 %vm2293_vm2, %v2272_v14 }
 0x2f9   : > { %5142 = vmatmul.mubr.msk.f32.gmra.mrb[56].mxu0 %vm2293_vm2, %v2273_v36 }
 0x2fa   : > { %5144 = vmatprep.mubr.msk.f32.mxu0 %vm2293_vm2, %v2274_v58 }
 0x2fd   : > { %5145 = vmatmul.mubr.msk.f32.gmra.mrb[58].mxu0 %vm2293_vm2, %v2275_v41 }
 0x2fe   : > { %5147 = vmatprep.mubr.msk.f32.mxu0 %vm2293_vm2, %v2276_v17 }
 0x301   : > { %5148 = vmatmul.mubr.msk.f32.gmra.mrb[60].mxu0 %vm2293_vm2, %v2277_v6 }
 0x302   : > { %5150 = vmatprep.mubr.msk.f32.mxu0 %vm2293_vm2, %v2278_v40 }
 0x305   : > { %5151 = vmatmul.mubr.msk.f32.gmra.mrb[62].mxu0 %vm2293_vm2, %v2279_v18 }
 0x35c   : > { %v5059_v15 = vpop.f32.mrb[0].mxu0 }
 0x35d   : > { %v2562_v19 = vadd.f32 %v5059_v15, %v7330_v33  ;;  %v2556_v42 = vpop.f32.mrb[1].mxu0 }
 0x35e   : > { %v2557_v21 = vadd.f32 %v7330_v33, %v2556_v42 }
 0x35f   : > { %v2876_v22 = vmax.f32 %v2562_v19, 0.0 }
 0x360   : > { %v2875_v13 = vmax.f32 %v2557_v21, 0.0  ;;  %v5062_v20 = vpop.f32.mrb[2].mxu0 }
 0x361   : > { %v2572_v29 = vadd.f32 %v5062_v20, %v7330_v33  ;;  %v2566_v3 = vpop.f32.mrb[3].mxu0 }
 0x362   : > { %v2567_v23 = vadd.f32 %v7330_v33, %v2566_v3  ;;  %5185 = vmatprep.mubr.f32.mxu0 %v2875_v13 }
 0x363   : > { %5186 = vmatmul.mubr.f32.vlgmr.msra.gmra.mrb[64].mxu0 %v2876_v22  ;;  %v2878_v24 = vmax.f32 %v2572_v29, 0.0 }
 0x364   : > { %v2877_v44 = vmax.f32 %v2567_v23, 0.0  ;;  %v5065_v10 = vpop.f32.mrb[4].mxu0 }
 0x365   : > { %v2582_v7 = vadd.f32 %v5065_v10, %v7330_v33  ;;  %v2576_v45 = vpop.f32.mrb[5].mxu0 }
 0x366   : > { %5188 = vmatprep.mubr.f32.mxu0 %v2877_v44  ;;  %v2577_v28 = vadd.f32 %v7330_v33, %v2576_v45 }
 0x367   : > { %5189 = vmatmul.mubr.f32.gmra.mrb[66].mxu0 %v2878_v24  ;;  %v2880_v30 = vmax.f32 %v2582_v7, 0.0 }
 0x368   : > { %v5068_v26 = vpop.f32.mrb[6].mxu0  ;;  %v2879_v31 = vmax.f32 %v2577_v28, 0.0 }
 0x369   : > { %v2592_v46 = vadd.f32 %v5068_v26, %v7330_v33  ;;  %v2586_v37 = vpop.f32.mrb[7].mxu0 }
 0x36a   : > { %v2587_v27 = vadd.f32 %v7330_v33, %v2586_v37  ;;  %5191 = vmatprep.mubr.f32.mxu1 %v2879_v31 }
 0x36b   : > { %5192 = vmatmul.mubr.f32.vlgmr.msra.gmra.mrb[0].mxu1 %v2880_v30  ;;  %v2882_v39 = vmax.f32 %v2592_v46, 0.0 }
 0x36c   : > { %v2881_v43 = vmax.f32 %v2587_v27, 0.0  ;;  %v5071_v48 = vpop.f32.mrb[8].mxu0 }
 0x36d   : > { %v2602_v35 = vadd.f32 %v5071_v48, %v7330_v33  ;;  %v2596_v52 = vpop.f32.mrb[9].mxu0 }
 0x36e   : > { %v2597_v32 = vadd.f32 %v7330_v33, %v2596_v52  ;;  %5194 = vmatprep.mubr.f32.mxu1 %v2881_v43 }
 0x36f   : > { %5195 = vmatmul.mubr.f32.gmra.mrb[2].mxu1 %v2882_v39  ;;  %v2884_v55 = vmax.f32 %v2602_v35, 0.0 }
 0x370   : > { %v2883_v50 = vmax.f32 %v2597_v32, 0.0  ;;  %v5074_v51 = vpop.f32.mrb[10].mxu0 }
 0x371   : > { %v2612_v60 = vadd.f32 %v5074_v51, %v7330_v33  ;;  %v2606_v56 = vpop.f32.mrb[11].mxu0 }
 0x372   : > { %v2607_v62 = vadd.f32 %v7330_v33, %v2606_v56  ;;  %5197 = vmatprep.mubr.f32.mxu1 %v2883_v50 }
 0x373   : > { %5198 = vmatmul.mubr.f32.gmra.mrb[4].mxu1 %v2884_v55  ;;  %v2886_v63 = vmax.f32 %v2612_v60, 0.0 }
 0x374   : > { %v2885_v11 = vmax.f32 %v2607_v62, 0.0  ;;  %v5077_v47 = vpop.f32.mrb[12].mxu0 }
 0x375   : > { %v2622_v61 = vadd.f32 %v5077_v47, %v7330_v33  ;;  %v2616_v53 = vpop.f32.mrb[13].mxu0 }
 0x376   : > { %v2617_v0 = vadd.f32 %v7330_v33, %v2616_v53  ;;  %5200 = vmatprep.mubr.f32.mxu1 %v2885_v11 }
 0x377   : > { %5201 = vmatmul.mubr.f32.gmra.mrb[6].mxu1 %v2886_v63  ;;  %v2888_v4 = vmax.f32 %v2622_v61, 0.0 }
 0x378   : > { %v2887_v1 = vmax.f32 %v2617_v0, 0.0  ;;  %v5080_v16 = vpop.f32.mrb[14].mxu0 }
 0x379   : > { %v2632_v25 = vadd.f32 %v5080_v16, %v7330_v33  ;;  %v2626_v57 = vpop.f32.mrb[15].mxu0 }
 0x37a   : > { %v2627_v5 = vadd.f32 %v7330_v33, %v2626_v57  ;;  %5203 = vmatprep.mubr.f32.mxu1 %v2887_v1 }
 0x37b   : > { %5204 = vmatmul.mubr.f32.gmra.mrb[8].mxu1 %v2888_v4  ;;  %v2890_v9 = vmax.f32 %v2632_v25, 0.0 }
 0x37c   : > { %v2889_v38 = vmax.f32 %v2627_v5, 0.0  ;;  %v5083_v8 = vpop.f32.mrb[16].mxu0 }
 0x37d   : > { %v2642_v34 = vadd.f32 %v5083_v8, %v7330_v33  ;;  %v2636_v54 = vpop.f32.mrb[17].mxu0 }
 0x37e   : > { %v2637_v59 = vadd.f32 %v7330_v33, %v2636_v54  ;;  %5206 = vmatprep.mubr.f32.mxu1 %v2889_v38 }
 0x37f   : > { %5207 = vmatmul.mubr.f32.gmra.mrb[10].mxu1 %v2890_v9  ;;  %v2892_v2 = vmax.f32 %v2642_v34, 0.0 }
 0x380   : > { %v2891_v12 = vmax.f32 %v2637_v59, 0.0  ;;  %v5086_v49 = vpop.f32.mrb[18].mxu0 }
 0x381   : > { %v2652_v14 = vadd.f32 %v5086_v49, %v7330_v33  ;;  %v2646_v36 = vpop.f32.mrb[19].mxu0 }
 0x382   : > { %v2647_v58 = vadd.f32 %v7330_v33, %v2646_v36  ;;  %5209 = vmatprep.mubr.f32.mxu1 %v2891_v12 }
 0x383   : > { %5210 = vmatmul.mubr.f32.gmra.mrb[12].mxu1 %v2892_v2  ;;  %v2894_v6 = vmax.f32 %v2652_v14, 0.0 }
 0x384   : > { %v2893_v41 = vmax.f32 %v2647_v58, 0.0  ;;  %v5089_v17 = vpop.f32.mrb[20].mxu0 }
 0x385   : > { %v2662_v40 = vadd.f32 %v5089_v17, %v7330_v33  ;;  %v2656_v18 = vpop.f32.mrb[21].mxu0 }
 0x386   : > { %v2657_v15 = vadd.f32 %v7330_v33, %v2656_v18  ;;  %5212 = vmatprep.mubr.f32.mxu1 %v2893_v41 }
 0x387   : > { %5213 = vmatmul.mubr.f32.gmra.mrb[14].mxu1 %v2894_v6  ;;  %v2896_v21 = vmax.f32 %v2662_v40, 0.0 }
 0x388   : > { %v2895_v19 = vmax.f32 %v2657_v15, 0.0  ;;  %v5092_v42 = vpop.f32.mrb[22].mxu0 }
 0x389   : > { %v2672_v13 = vadd.f32 %v5092_v42, %v7330_v33  ;;  %v2666_v20 = vpop.f32.mrb[23].mxu0 }
 0x38a   : > { %v2667_v22 = vadd.f32 %v7330_v33, %v2666_v20  ;;  %5215 = vmatprep.mubr.f32.mxu1 %v2895_v19 }
 0x38b   : > { %5216 = vmatmul.mubr.f32.gmra.mrb[16].mxu1 %v2896_v21  ;;  %v2898_v23 = vmax.f32 %v2672_v13, 0.0 }
 0x38c   : > { %v2897_v29 = vmax.f32 %v2667_v22, 0.0  ;;  %v5095_v3 = vpop.f32.mrb[24].mxu0 }
 0x38d   : > { %v2682_v44 = vadd.f32 %v5095_v3, %v7330_v33  ;;  %v2676_v10 = vpop.f32.mrb[25].mxu0 }
 0x38e   : > { %v2677_v24 = vadd.f32 %v7330_v33, %v2676_v10  ;;  %5218 = vmatprep.mubr.f32.mxu1 %v2897_v29 }
 0x38f   : > { %5219 = vmatmul.mubr.f32.gmra.mrb[18].mxu1 %v2898_v23  ;;  %v2900_v28 = vmax.f32 %v2682_v44, 0.0 }
 0x390   : > { %v2899_v7 = vmax.f32 %v2677_v24, 0.0  ;;  %v5098_v45 = vpop.f32.mrb[26].mxu0 }
 0x391   : > { %v2692_v26 = vadd.f32 %v5098_v45, %v7330_v33  ;;  %v2686_v31 = vpop.f32.mrb[27].mxu0 }
 0x392   : > { %v2687_v30 = vadd.f32 %v7330_v33, %v2686_v31  ;;  %5221 = vmatprep.mubr.f32.mxu1 %v2899_v7 }
 0x393   : > { %5222 = vmatmul.mubr.f32.gmra.mrb[20].mxu1 %v2900_v28  ;;  %v2902_v27 = vmax.f32 %v2692_v26, 0.0 }
 0x394   : > { %v2901_v46 = vmax.f32 %v2687_v30, 0.0  ;;  %v5101_v37 = vpop.f32.mrb[28].mxu0 }
 0x395   : > { %v2702_v43 = vadd.f32 %v5101_v37, %v7330_v33  ;;  %v2696_v48 = vpop.f32.mrb[29].mxu0 }
 0x396   : > { %v2697_v39 = vadd.f32 %v7330_v33, %v2696_v48  ;;  %5224 = vmatprep.mubr.f32.mxu1 %v2901_v46 }
 0x397   : > { %5225 = vmatmul.mubr.f32.gmra.mrb[22].mxu1 %v2902_v27  ;;  %v2904_v32 = vmax.f32 %v2702_v43, 0.0 }
 0x398   : > { %v2903_v35 = vmax.f32 %v2697_v39, 0.0  ;;  %v5104_v52 = vpop.f32.mrb[30].mxu0 }
 0x399   : > { %v2712_v50 = vadd.f32 %v5104_v52, %v7330_v33  ;;  %v2706_v51 = vpop.f32.mrb[31].mxu0 }
 0x39a   : > { %v2707_v55 = vadd.f32 %v7330_v33, %v2706_v51  ;;  %5227 = vmatprep.mubr.f32.mxu1 %v2903_v35 }
 0x39b   : > { %5228 = vmatmul.mubr.f32.gmra.mrb[24].mxu1 %v2904_v32  ;;  %v2906_v62 = vmax.f32 %v2712_v50, 0.0 }
 0x39c   : > { %v2905_v60 = vmax.f32 %v2707_v55, 0.0  ;;  %v5107_v56 = vpop.f32.mrb[32].mxu0 }
 0x39d   : > { %v2722_v11 = vadd.f32 %v5107_v56, %v7330_v33  ;;  %v2716_v47 = vpop.f32.mrb[33].mxu0 }
 0x39e   : > { %v2717_v63 = vadd.f32 %v7330_v33, %v2716_v47  ;;  %5230 = vmatprep.mubr.f32.mxu1 %v2905_v60 }
 0x39f   : > { %5231 = vmatmul.mubr.f32.gmra.mrb[26].mxu1 %v2906_v62  ;;  %v2908_v0 = vmax.f32 %v2722_v11, 0.0 }
 0x3a0   : > { %v2907_v61 = vmax.f32 %v2717_v63, 0.0  ;;  %v5110_v53 = vpop.f32.mrb[34].mxu0 }
 0x3a1   : > { %v2732_v1 = vadd.f32 %v5110_v53, %v7330_v33  ;;  %v2726_v16 = vpop.f32.mrb[35].mxu0 }
 0x3a2   : > { %v2727_v4 = vadd.f32 %v7330_v33, %v2726_v16  ;;  %5233 = vmatprep.mubr.f32.mxu1 %v2907_v61 }
 0x3a3   : > { %5234 = vmatmul.mubr.f32.gmra.mrb[28].mxu1 %v2908_v0  ;;  %v2910_v5 = vmax.f32 %v2732_v1, 0.0 }
 0x3a4   : > { %v2909_v25 = vmax.f32 %v2727_v4, 0.0  ;;  %v5113_v57 = vpop.f32.mrb[36].mxu0 }
 0x3a5   : > { %v2742_v38 = vadd.f32 %v5113_v57, %v7330_v33  ;;  %v2736_v8 = vpop.f32.mrb[37].mxu0 }
 0x3a6   : > { %v2737_v9 = vadd.f32 %v7330_v33, %v2736_v8  ;;  %5236 = vmatprep.mubr.f32.mxu1 %v2909_v25 }
 0x3a7   : > { %5237 = vmatmul.mubr.f32.gmra.mrb[30].mxu1 %v2910_v5  ;;  %v2912_v59 = vmax.f32 %v2742_v38, 0.0 }
 0x3a8   : > { %v2911_v34 = vmax.f32 %v2737_v9, 0.0  ;;  %v5116_v54 = vpop.f32.mrb[38].mxu0 }
 0x3a9   : > { %v2752_v12 = vadd.f32 %v5116_v54, %v7330_v33  ;;  %v2746_v49 = vpop.f32.mrb[39].mxu0 }
 0x3aa   : > { %v2747_v2 = vadd.f32 %v7330_v33, %v2746_v49  ;;  %5239 = vmatprep.mubr.f32.mxu1 %v2911_v34 }
 0x3ab   : > { %5240 = vmatmul.mubr.f32.gmra.mrb[32].mxu1 %v2912_v59  ;;  %v2914_v58 = vmax.f32 %v2752_v12, 0.0 }
 0x3ac   : > { %v2913_v14 = vmax.f32 %v2747_v2, 0.0  ;;  %v5119_v36 = vpop.f32.mrb[40].mxu0 }
 0x3ad   : > { %v2762_v41 = vadd.f32 %v5119_v36, %v7330_v33  ;;  %v2756_v17 = vpop.f32.mrb[41].mxu0 }
 0x3ae   : > { %v2757_v6 = vadd.f32 %v7330_v33, %v2756_v17  ;;  %5242 = vmatprep.mubr.f32.mxu1 %v2913_v14 }
 0x3af   : > { %5243 = vmatmul.mubr.f32.gmra.mrb[34].mxu1 %v2914_v58  ;;  %v2916_v15 = vmax.f32 %v2762_v41, 0.0 }
 0x3b0   : > { %v2915_v40 = vmax.f32 %v2757_v6, 0.0  ;;  %v5122_v18 = vpop.f32.mrb[42].mxu0 }
 0x3b1   : > { %v2772_v19 = vadd.f32 %v5122_v18, %v7330_v33  ;;  %v2766_v42 = vpop.f32.mrb[43].mxu0 }
 0x3b2   : > { %v2767_v21 = vadd.f32 %v7330_v33, %v2766_v42  ;;  %5245 = vmatprep.mubr.f32.mxu1 %v2915_v40 }
 0x3b3   : > { %5246 = vmatmul.mubr.f32.gmra.mrb[36].mxu1 %v2916_v15  ;;  %v2918_v22 = vmax.f32 %v2772_v19, 0.0 }
 0x3b4   : > { %v2917_v13 = vmax.f32 %v2767_v21, 0.0  ;;  %v5125_v20 = vpop.f32.mrb[44].mxu0  ;;  %v3413_v21 = vlaneseq }
 0x3b5   : > { %v2782_v29 = vadd.f32 %v5125_v20, %v7330_v33  ;;  %v2776_v3 = vpop.f32.mrb[45].mxu0 }
 0x3b6   : > { %v2777_v23 = vadd.f32 %v7330_v33, %v2776_v3  ;;  %5248 = vmatprep.mubr.f32.mxu1 %v2917_v13  ;;  %v7396_v13 = vshrl.u32 %v3413_v21, 7 }
 0x3b7   : > { %5249 = vmatmul.mubr.f32.gmra.mrb[38].mxu1 %v2918_v22  ;;  %v2920_v24 = vmax.f32 %v2782_v29, 0.0  ;;  %v7401_v22 = vstv %s4603_s21  ;;  %v7406_v29 = vld [vmem:[%s7851_s7] ss:$0 sm:$0xff] }
 0x3b8   : > { %v2919_v44 = vmax.f32 %v2777_v23, 0.0  ;;  %v5128_v10 = vpop.f32.mrb[46].mxu0  ;;  %v3415_v20 = vadd.s32 8, %v7396_v13  ;;  %v3417_v3 = vadd.s32 24, %v7396_v13  ;;  %v3479_v23 = vadd.s32 %v7401_v22, %v7396_v13 }
 0x3b9   : > { %v2792_v7 = vadd.f32 %v5128_v10, %v7330_v33  ;;  %v2786_v45 = vpop.f32.mrb[47].mxu0 }
 0x3ba   : > { %v2787_v28 = vadd.f32 %v7330_v33, %v2786_v45  ;;  %5251 = vmatprep.mubr.f32.mxu1 %v2919_v44  ;;  %v3416_v44 = vadd.s32 16, %v7396_v13  ;;  %vm3543_vm15 = vcmp.lt.s32.totalorder %v3479_v23, 600  ;;  %v3805_v23 = vld [vmem:[#allocation2 + $0x30] sm:$0xff] }
 0x3bb   : > { %5252 = vmatmul.mubr.f32.gmra.mrb[40].mxu1 %v2920_v24  ;;  %v2922_v30 = vmax.f32 %v2792_v7, 0.0  ;;  %v3419_v24 = vadd.s32 40, %v7396_v13 }
 0x3bc   : > { %v2921_v26 = vmax.f32 %v2787_v28, 0.0  ;;  %v5131_v31 = vpop.f32.mrb[48].mxu0  ;;  %v3418_v28 = vadd.s32 32, %v7396_v13 }
 0x3bd   : > { %v2802_v46 = vadd.f32 %v5131_v31, %v7330_v33  ;;  %v2796_v37 = vpop.f32.mrb[49].mxu0  ;;  %v3482_v31 = vadd.s32 %v7401_v22, %v3417_v3 }
 0x3be   : > { %v2797_v27 = vadd.f32 %v7330_v33, %v2796_v37  ;;  %5254 = vmatprep.mubr.f32.mxu1 %v2921_v26  ;;  %v3481_v37 = vadd.s32 %v7401_v22, %v3416_v44 }
 0x3bf   : > { %5255 = vmatmul.mubr.f32.gmra.mrb[42].mxu1 %v2922_v30  ;;  %v2924_v39 = vmax.f32 %v2802_v46, 0.0  ;;  %v3800_v46 = vld [vmem:[#allocation2 + $0x8] sm:$0xff]  ;;  %vm3546_vm7 = vcmp.lt.s32.totalorder %v3482_v31, 600 }
 0x3c0   : > { %v2923_v43 = vmax.f32 %v2797_v27, 0.0  ;;  %v5134_v48 = vpop.f32.mrb[50].mxu0  ;;  %vm3545_vm6 = vcmp.lt.s32.totalorder %v3481_v37, 600 }
 0x3c1   : > { %v2812_v35 = vadd.f32 %v5134_v48, %v7330_v33  ;;  %v2806_v52 = vpop.f32.mrb[51].mxu0 }
 0x3c2   : > { %v2807_v32 = vadd.f32 %v7330_v33, %v2806_v52  ;;  %5257 = vmatprep.mubr.f32.mxu1 %v2923_v43  ;;  %v3799_v43 = vld [vmem:[#allocation2] sm:$0xff] }
 0x3c3   : > { %5258 = vmatmul.mubr.f32.gmra.mrb[44].mxu1 %v2924_v39  ;;  %v2926_v55 = vmax.f32 %v2812_v35, 0.0  ;;  %v3484_v39 = vadd.s32 %v7401_v22, %v3419_v24 }
 0x3c4   : > { %v2925_v50 = vmax.f32 %v2807_v32, 0.0  ;;  %v5137_v51 = vpop.f32.mrb[52].mxu0 }
 0x3c5   : > { %v2822_v60 = vadd.f32 %v5137_v51, %v7330_v33  ;;  %v2816_v56 = vpop.f32.mrb[53].mxu0  ;;  %v3421_v51 = vadd.s32 56, %v7396_v13  ;;  %vm3548_vm1 = vcmp.lt.s32.totalorder %v3484_v39, 600 }
 0x3c6   : > { %v2817_v62 = vadd.f32 %v7330_v33, %v2816_v56  ;;  %5260 = vmatprep.mubr.f32.mxu1 %v2925_v50  ;;  %v3483_v50 = vadd.s32 %v7401_v22, %v3418_v28 }
 0x3c7   : > { %5261 = vmatmul.mubr.f32.gmra.mrb[46].mxu1 %v2926_v55  ;;  %v2928_v63 = vmax.f32 %v2822_v60, 0.0 }
 0x3c8   : > { %v2927_v11 = vmax.f32 %v2817_v62, 0.0  ;;  %v5140_v47 = vpop.f32.mrb[54].mxu0  ;;  %vm3547_vm9 = vcmp.lt.s32.totalorder %v3483_v50, 600 }
 0x3c9   : > { %v2832_v61 = vadd.f32 %v5140_v47, %v7330_v33  ;;  %v2826_v53 = vpop.f32.mrb[55].mxu0  ;;  %v3802_v47 = vld [vmem:[#allocation2 + $0x18] sm:$0xff] }
 0x3ca   : > { %v2827_v0 = vadd.f32 %v7330_v33, %v2826_v53  ;;  %5263 = vmatprep.mubr.f32.mxu1 %v2927_v11  ;;  %v3801_v53 = vld [vmem:[#allocation2 + $0x10] sm:$0xff] }
 0x3cb   : > { %5264 = vmatmul.mubr.f32.gmra.mrb[48].mxu1 %v2928_v63  ;;  %v2930_v4 = vmax.f32 %v2832_v61, 0.0  ;;  %v3420_v63 = vadd.s32 48, %v7396_v13 }
 0x3cc   : > { %v2929_v1 = vmax.f32 %v2827_v0, 0.0  ;;  %v5143_v16 = vpop.f32.mrb[56].mxu0 }
 0x3cd   : > { %v2842_v25 = vadd.f32 %v5143_v16, %v7330_v33  ;;  %v2836_v57 = vpop.f32.mrb[57].mxu0 }
 0x3ce   : > { %v2837_v5 = vadd.f32 %v7330_v33, %v2836_v57  ;;  %5266 = vmatprep.mubr.f32.mxu1 %v2929_v1 }
 0x3cf   : > { %5267 = vmatmul.mubr.f32.gmra.mrb[50].mxu1 %v2930_v4  ;;  %v2932_v9 = vmax.f32 %v2842_v25, 0.0  ;;  %v3486_v25 = vadd.s32 %v7401_v22, %v3421_v51 }
 0x3d0   : > { %v2931_v38 = vmax.f32 %v2837_v5, 0.0  ;;  %v5146_v8 = vpop.f32.mrb[58].mxu0 }
 0x3d1   : > { %v2852_v34 = vadd.f32 %v5146_v8, %v7330_v33  ;;  %v2846_v54 = vpop.f32.mrb[59].mxu0  ;;  %v3423_v8 = vadd.s32 72, %v7396_v13  ;;  %vm3550_vm8 = vcmp.lt.s32.totalorder %v3486_v25, 600  ;;  %v3431_v25 = vadd.s32 136, %v7396_v13 }
 0x3d2   : > { %v2847_v59 = vadd.f32 %v7330_v33, %v2846_v54  ;;  %5269 = vmatprep.mubr.f32.mxu1 %v2931_v38  ;;  %v3804_v54 = vld [vmem:[#allocation2 + $0x28] sm:$0xff] }
 0x3d3   : > { %5270 = vmatmul.mubr.f32.gmra.mrb[52].mxu1 %v2932_v9  ;;  %v2934_v2 = vmax.f32 %v2852_v34, 0.0 }
 0x3d4   : > { %v2933_v12 = vmax.f32 %v2847_v59, 0.0  ;;  %v5149_v49 = vpop.f32.mrb[60].mxu0  ;;  %v3485_v59 = vadd.s32 %v7401_v22, %v3420_v63 }
 0x3d5   : > { %v2862_v14 = vadd.f32 %v5149_v49, %v7330_v33  ;;  %v2856_v36 = vpop.f32.mrb[61].mxu0 }
 0x3d6   : > { %v2857_v58 = vadd.f32 %v7330_v33, %v2856_v36  ;;  %5272 = vmatprep.mubr.f32.mxu1 %v2933_v12  ;;  %v3422_v12 = vadd.s32 64, %v7396_v13  ;;  %v3425_v36 = vadd.s32 88, %v7396_v13  ;;  %vm3549_vm10 = vcmp.lt.s32.totalorder %v3485_v59, 600 }
 0x3d7   : > { %5273 = vmatmul.mubr.f32.gmra.mrb[54].mxu1 %v2934_v2  ;;  %v2936_v6 = vmax.f32 %v2862_v14, 0.0  ;;  %v3803_v2 = vld [vmem:[#allocation2 + $0x20] sm:$0xff] }
 0x3d8   : > { %v2935_v41 = vmax.f32 %v2857_v58, 0.0  ;;  %v5152_v17 = vpop.f32.mrb[62].mxu0 }
 0x3d9   : > { %v2872_v40 = vadd.f32 %v5152_v17, %v7330_v33  ;;  %v2866_v18 = vpop.f32.mrb[63].mxu0 }
 0x3da   : > { %v2867_v15 = vadd.f32 %v7330_v33, %v2866_v18  ;;  %5275 = vmatprep.mubr.f32.mxu1 %v2935_v41  ;;  %v3480_v33 = vadd.s32 %v7401_v22, %v3415_v20  ;;  %v3806_v20 = vld [vmem:[#allocation2 + $0x38] sm:$0xff] }
 0x3db   : > { %5276 = vmatmul.mubr.f32.gmra.mrb[56].mxu1 %v2936_v6  ;;  %v2938_v42 = vmax.f32 %v2872_v40, 0.0  ;;  %v3424_v6 = vadd.s32 80, %v7396_v13 }
 0x3dc   : > { %v2937_v19 = vmax.f32 %v2867_v15, 0.0  ;;  %vm3544_vm3 = vcmp.lt.s32.totalorder %v3480_v33, 600  ;;  %v3487_v33 = vadd.s32 %v7401_v22, %v3422_v12 }
 0x3dd   : > { %v3489_v28 = vadd.s32 %v7401_v22, %v3424_v6 }
 0x3de   : > { %5278 = vmatprep.mubr.f32.mxu1 %v2937_v19  ;;  %v3488_v19 = vadd.s32 %v7401_v22, %v3423_v8  ;;  %vm3551_vm0 = vcmp.lt.s32.totalorder %v3487_v33, 600  ;;  %v3430_v8 = vadd.s32 128, %v7396_v13 }
 0x3df   : > { %5279 = vmatmul.mubr.f32.gmra.mrb[58].mxu1 %v2938_v42  ;;  %vm3553_vm11 = vcmp.lt.s32.totalorder %v3489_v28, 600 }
 0x3e0   : > { %vm3552_vm5 = vcmp.lt.s32.totalorder %v3488_v19, 600  ;;  %v3433_v19 = vadd.s32 152, %v7396_v13 }
 0x436   : > { %v5187_v10 = vpop.f32.mrb[64].mxu0 }
 0x437   : > { %v3034_v7 = vadd.f32 %v5187_v10, %v7406_v29  ;;  %v3028_v45 = vpop.f32.mrb[65].mxu0  ;;  %v3490_v10 = vadd.s32 %v7401_v22, %v3425_v36 }
 0x438   : > { %v3029_v26 = vadd.f32 %v7406_v29, %v3028_v45 }
 0x439   : > { %v3348_v30 = vmax.f32 %v3034_v7, 0.0  ;;  %vm3554_vm14 = vcmp.lt.s32.totalorder %v3490_v10, 600 }
 0x43a   : > { %v3347_v27 = vmax.f32 %v3029_v26, 0.0  ;;  %v5190_v48 = vpop.f32.mrb[66].mxu0  ;;  %v3427_v26 = vadd.s32 104, %v7396_v13 }
 0x43b   : > { %v3736_v35 = vsel %vm3544_vm3, %v3348_v30, -inf  ;;  %v3044_v52 = vadd.f32 %v5190_v48, %v7406_v29  ;;  %v3038_v32 = vpop.f32.mrb[67].mxu0  ;;  %v3426_v48 = vadd.s32 96, %v7396_v13 }
 0x43c   : > { %v3864_v55 = vmax.f32 %v3800_v46, %v3736_v35  ;;  %v3735_v60 = vsel %vm3543_vm15, %v3347_v27, -inf  ;;  %v3039_v56 = vadd.f32 %v7406_v29, %v3038_v32  ;;  %v3807_v35 = vld [vmem:[#allocation2 + $0x40] sm:$0xff] }
 0x43d   : > { %v3863_v62 = vmax.f32 %v3799_v43, %v3735_v60  ;;  %v3350_v11 = vmax.f32 %v3044_v52, 0.0  ;;  %v3808_v43 = vld [vmem:[#allocation2 + $0x48] sm:$0xff] }
 0x43e   : > { %3928 = vst [vmem:[#allocation2 + $0x8] sm:$0xff] %v3864_v55  ;;  %v3349_v61 = vmax.f32 %v3039_v56, 0.0  ;;  %v5193_v0 = vpop.f32.mrb[0].mxu1  ;;  %v3492_v55 = vadd.s32 %v7401_v22, %v3427_v26 }
 0x43f   : > { %3927 = vst [vmem:[#allocation2] sm:$0xff] %v3863_v62  ;;  %v3738_v1 = vsel %vm3546_vm7, %v3350_v11, -inf  ;;  %v3054_v16 = vadd.f32 %v5193_v0, %v7406_v29  ;;  %v3048_v4 = vpop.f32.mrb[1].mxu1  ;;  %v3429_v11 = vadd.s32 120, %v7396_v13  ;;  %v3428_v0 = vadd.s32 112, %v7396_v13 }
 0x440   : > { %v3866_v57 = vmax.f32 %v3802_v47, %v3738_v1  ;;  %v3737_v5 = vsel %vm3545_vm6, %v3349_v61, -inf  ;;  %v3049_v38 = vadd.f32 %v7406_v29, %v3048_v4  ;;  %v3810_v61 = vld [vmem:[#allocation2 + $0x58] sm:$0xff]  ;;  %vm3556_vm2 = vcmp.lt.s32.totalorder %v3492_v55, 600 }
 0x441   : > { %v3865_v9 = vmax.f32 %v3801_v53, %v3737_v5  ;;  %v3352_v34 = vmax.f32 %v3054_v16, 0.0  ;;  %v3491_v53 = vadd.s32 %v7401_v22, %v3426_v48  ;;  %v3809_v16 = vld [vmem:[#allocation2 + $0x50] sm:$0xff]  ;;  %v3494_v59 = vadd.s32 %v7401_v22, %v3429_v11 }
 0x442   : > { %3930 = vst [vmem:[#allocation2 + $0x18] sm:$0xff] %v3866_v57  ;;  %v3351_v49 = vmax.f32 %v3049_v38, 0.0  ;;  %v5196_v14 = vpop.f32.mrb[2].mxu1  ;;  %v3437_v55 = vadd.s32 184, %v7396_v13  ;;  %v3436_v11 = vadd.s32 176, %v7396_v13 }
 0x443   : > { %3929 = vst [vmem:[#allocation2 + $0x10] sm:$0xff] %v3865_v9  ;;  %v3740_v58 = vsel %vm3548_vm1, %v3352_v34, -inf  ;;  %v3064_v41 = vadd.f32 %v5196_v14, %v7406_v29  ;;  %v3058_v17 = vpop.f32.mrb[3].mxu1  ;;  %vm3555_vm13 = vcmp.lt.s32.totalorder %v3491_v53, 600  ;;  %v3493_v14 = vadd.s32 %v7401_v22, %v3428_v0 }
 0x444   : > { %v3868_v40 = vmax.f32 %v3804_v54, %v3740_v58  ;;  %v3739_v18 = vsel %vm3547_vm9, %v3351_v49, -inf  ;;  %v3059_v15 = vadd.f32 %v7406_v29, %v3058_v17  ;;  %v3811_v58 = vld [vmem:[#allocation2 + $0x60] sm:$0xff]  ;;  %v3496_v17 = vadd.s32 %v7401_v22, %v3431_v25 }
 0x445   : > { %v3867_v42 = vmax.f32 %v3803_v2, %v3739_v18  ;;  %v3354_v21 = vmax.f32 %v3064_v41, 0.0  ;;  %v3812_v2 = vld [vmem:[#allocation2 + $0x68] sm:$0xff]  ;;  %vm3558_vm4 = vcmp.lt.s32.totalorder %v3494_v59, 600  ;;  %vm3557_vm12 = vcmp.lt.s32.totalorder %v3493_v14, 600 }
 0x446   : > { %3932 = vst [vmem:[#allocation2 + $0x28] sm:$0xff] %v3868_v40  ;;  %v3353_v3 = vmax.f32 %v3059_v15, 0.0  ;;  %v5199_v44 = vpop.f32.mrb[4].mxu1  ;;  %v3495_v15 = vadd.s32 %v7401_v22, %v3430_v8  ;;  %vm3560_vm3 = vcmp.lt.s32.totalorder %v3496_v17, 600  ;;  %v3439_v59 = vadd.s32 200, %v7396_v13 }
 0x447   : > { %3931 = vst [vmem:[#allocation2 + $0x20] sm:$0xff] %v3867_v42  ;;  %v3742_v24 = vsel %vm3550_vm8, %v3354_v21, -inf  ;;  %v3074_v7 = vadd.f32 %v5199_v44, %v7406_v29  ;;  %v3068_v45 = vpop.f32.mrb[5].mxu1  ;;  %v3432_v44 = vadd.s32 144, %v7396_v13 }
 0x448   : > { %v3870_v31 = vmax.f32 %v3806_v20, %v3742_v24  ;;  %v3741_v30 = vsel %vm3549_vm10, %v3353_v3, -inf  ;;  %v3069_v46 = vadd.f32 %v7406_v29, %v3068_v45  ;;  %v3813_v24 = vld [vmem:[#allocation2 + $0x70] sm:$0xff]  ;;  %vm3559_vm15 = vcmp.lt.s32.totalorder %v3495_v15, 600 }
 0x449   : > { %v3869_v37 = vmax.f32 %v3805_v23, %v3741_v30  ;;  %v3356_v27 = vmax.f32 %v3074_v7, 0.0  ;;  %v3814_v23 = vld [vmem:[#allocation2 + $0x78] sm:$0xff] }
 0x44a   : > { %3934 = vst [vmem:[#allocation2 + $0x38] sm:$0xff] %v3870_v31  ;;  %v3355_v39 = vmax.f32 %v3069_v46, 0.0  ;;  %v5202_v52 = vpop.f32.mrb[6].mxu1  ;;  %v3498_v31 = vadd.s32 %v7401_v22, %v3433_v19 }
 0x44b   : > { %3933 = vst [vmem:[#allocation2 + $0x30] sm:$0xff] %v3869_v37  ;;  %v3744_v32 = vsel %vm3552_vm5, %v3356_v27, -inf  ;;  %v3084_v50 = vadd.f32 %v5202_v52, %v7406_v29  ;;  %v3078_v51 = vpop.f32.mrb[7].mxu1  ;;  %v3435_v27 = vadd.s32 168, %v7396_v13  ;;  %v3434_v52 = vadd.s32 160, %v7396_v13 }
 0x44c   : > { %v3872_v60 = vmax.f32 %v3808_v43, %v3744_v32  ;;  %v3743_v56 = vsel %vm3551_vm0, %v3355_v39, -inf  ;;  %v3079_v62 = vadd.f32 %v7406_v29, %v3078_v51  ;;  %v3816_v39 = vld [vmem:[#allocation2 + $0x88] sm:$0xff]  ;;  %vm3562_vm7 = vcmp.lt.s32.totalorder %v3498_v31, 600 }
 0x44d   : > { %v3871_v47 = vmax.f32 %v3807_v35, %v3743_v56  ;;  %v3358_v63 = vmax.f32 %v3084_v50, 0.0  ;;  %v3497_v35 = vadd.s32 %v7401_v22, %v3432_v44  ;;  %v3815_v50 = vld [vmem:[#allocation2 + $0x80] sm:$0xff]  ;;  %v3500_v53 = vadd.s32 %v7401_v22, %v3435_v27 }
 0x44e   : > { %3936 = vst [vmem:[#allocation2 + $0x48] sm:$0xff] %v3872_v60  ;;  %v3357_v1 = vmax.f32 %v3079_v62, 0.0  ;;  %v5205_v4 = vpop.f32.mrb[8].mxu1  ;;  %v3443_v31 = vadd.s32 232, %v7396_v13  ;;  %v3442_v27 = vadd.s32 224, %v7396_v13 }
 0x44f   : > { %3935 = vst [vmem:[#allocation2 + $0x40] sm:$0xff] %v3871_v47  ;;  %v3746_v57 = vsel %vm3554_vm14, %v3358_v63, -inf  ;;  %v3094_v5 = vadd.f32 %v5205_v4, %v7406_v29  ;;  %v3088_v38 = vpop.f32.mrb[9].mxu1  ;;  %vm3561_vm6 = vcmp.lt.s32.totalorder %v3497_v35, 600  ;;  %v3499_v4 = vadd.s32 %v7401_v22, %v3434_v52 }
 0x450   : > { %v3874_v9 = vmax.f32 %v3810_v61, %v3746_v57  ;;  %v3745_v34 = vsel %vm3553_vm11, %v3357_v1, -inf  ;;  %v3089_v54 = vadd.f32 %v7406_v29, %v3088_v38  ;;  %v3817_v57 = vld [vmem:[#allocation2 + $0x90] sm:$0xff]  ;;  %v3502_v38 = vadd.s32 %v7401_v22, %v3437_v55 }
 0x451   : > { %v3873_v12 = vmax.f32 %v3809_v16, %v3745_v34  ;;  %v3360_v49 = vmax.f32 %v3094_v5, 0.0  ;;  %v3818_v16 = vld [vmem:[#allocation2 + $0x98] sm:$0xff]  ;;  %vm3564_vm1 = vcmp.lt.s32.totalorder %v3500_v53, 600  ;;  %vm3563_vm9 = vcmp.lt.s32.totalorder %v3499_v4, 600 }
 0x452   : > { %3938 = vst [vmem:[#allocation2 + $0x58] sm:$0xff] %v3874_v9  ;;  %v3359_v36 = vmax.f32 %v3089_v54, 0.0  ;;  %v5208_v41 = vpop.f32.mrb[10].mxu1  ;;  %v3501_v54 = vadd.s32 %v7401_v22, %v3436_v11  ;;  %vm3566_vm8 = vcmp.lt.s32.totalorder %v3502_v38, 600  ;;  %v3445_v53 = vadd.s32 248, %v7396_v13 }
 0x453   : > { %3937 = vst [vmem:[#allocation2 + $0x50] sm:$0xff] %v3873_v12  ;;  %v3748_v6 = vsel %vm3556_vm2, %v3360_v49, -inf  ;;  %v3104_v40 = vadd.f32 %v5208_v41, %v7406_v29  ;;  %v3098_v18 = vpop.f32.mrb[11].mxu1  ;;  %v3438_v41 = vadd.s32 192, %v7396_v13 }
 0x454   : > { %v3876_v42 = vmax.f32 %v3812_v2, %v3748_v6  ;;  %v3747_v21 = vsel %vm3555_vm13, %v3359_v36, -inf  ;;  %v3099_v20 = vadd.f32 %v7406_v29, %v3098_v18  ;;  %v3819_v6 = vld [vmem:[#allocation2 + $0xa0] sm:$0xff]  ;;  %vm3565_vm10 = vcmp.lt.s32.totalorder %v3501_v54, 600 }
 0x455   : > { %v3875_v33 = vmax.f32 %v3811_v58, %v3747_v21  ;;  %v3362_v3 = vmax.f32 %v3104_v40, 0.0  ;;  %v3820_v58 = vld [vmem:[#allocation2 + $0xa8] sm:$0xff] }
 0x456   : > { %3940 = vst [vmem:[#allocation2 + $0x68] sm:$0xff] %v3876_v42  ;;  %v3361_v10 = vmax.f32 %v3099_v20, 0.0  ;;  %v5211_v7 = vpop.f32.mrb[12].mxu1  ;;  %v3504_v42 = vadd.s32 %v7401_v22, %v3439_v59 }
 0x457   : > { %3939 = vst [vmem:[#allocation2 + $0x60] sm:$0xff] %v3875_v33  ;;  %v3750_v45 = vsel %vm3558_vm4, %v3362_v3, -inf  ;;  %v3114_v28 = vadd.f32 %v5211_v7, %v7406_v29  ;;  %v3108_v26 = vpop.f32.mrb[13].mxu1  ;;  %v3441_v3 = vadd.s32 216, %v7396_v13  ;;  %v3440_v7 = vadd.s32 208, %v7396_v13 }
 0x458   : > { %v3878_v30 = vmax.f32 %v3814_v23, %v3750_v45  ;;  %v3749_v46 = vsel %vm3557_vm12, %v3361_v10, -inf  ;;  %v3109_v37 = vadd.f32 %v7406_v29, %v3108_v26  ;;  %v3822_v10 = vld [vmem:[#allocation2 + $0xb8] sm:$0xff]  ;;  %vm3568_vm5 = vcmp.lt.s32.totalorder %v3504_v42, 600 }
 0x459   : > { %v3877_v43 = vmax.f32 %v3813_v24, %v3749_v46  ;;  %v3364_v48 = vmax.f32 %v3114_v28, 0.0  ;;  %v3503_v24 = vadd.s32 %v7401_v22, %v3438_v41  ;;  %v3821_v28 = vld [vmem:[#allocation2 + $0xb0] sm:$0xff]  ;;  %v3506_v35 = vadd.s32 %v7401_v22, %v3441_v3 }
 0x45a   : > { %3942 = vst [vmem:[#allocation2 + $0x78] sm:$0xff] %v3878_v30  ;;  %v3363_v32 = vmax.f32 %v3109_v37, 0.0  ;;  %v5214_v51 = vpop.f32.mrb[14].mxu1  ;;  %v3449_v42 = vadd.s32 280, %v7396_v13  ;;  %v3448_v3 = vadd.s32 272, %v7396_v13 }
 0x45b   : > { %3941 = vst [vmem:[#allocation2 + $0x70] sm:$0xff] %v3877_v43  ;;  %v3752_v60 = vsel %vm3560_vm3, %v3364_v48, -inf  ;;  %v3124_v56 = vadd.f32 %v5214_v51, %v7406_v29  ;;  %v3118_v62 = vpop.f32.mrb[15].mxu1  ;;  %vm3567_vm0 = vcmp.lt.s32.totalorder %v3503_v24, 600  ;;  %v3505_v51 = vadd.s32 %v7401_v22, %v3440_v7 }
 0x45c   : > { %v3880_v47 = vmax.f32 %v3816_v39, %v3752_v60  ;;  %v3751_v63 = vsel %vm3559_vm15, %v3363_v32, -inf  ;;  %v3119_v61 = vadd.f32 %v7406_v29, %v3118_v62  ;;  %v3823_v60 = vld [vmem:[#allocation2 + $0xc0] sm:$0xff]  ;;  %v3508_v62 = vadd.s32 %v7401_v22, %v3443_v31 }
 0x45d   : > { %v3879_v0 = vmax.f32 %v3815_v50, %v3751_v63  ;;  %v3366_v1 = vmax.f32 %v3124_v56, 0.0  ;;  %v3824_v50 = vld [vmem:[#allocation2 + $0xc8] sm:$0xff]  ;;  %vm3570_vm14 = vcmp.lt.s32.totalorder %v3506_v35, 600  ;;  %vm3569_vm11 = vcmp.lt.s32.totalorder %v3505_v51, 600 }
 0x45e   : > { %3944 = vst [vmem:[#allocation2 + $0x88] sm:$0xff] %v3880_v47  ;;  %v3365_v25 = vmax.f32 %v3119_v61, 0.0  ;;  %v5217_v5 = vpop.f32.mrb[16].mxu1  ;;  %v3507_v61 = vadd.s32 %v7401_v22, %v3442_v27  ;;  %vm3572_vm2 = vcmp.lt.s32.totalorder %v3508_v62, 600  ;;  %v3451_v35 = vadd.s32 296, %v7396_v13 }
 0x45f   : > { %3943 = vst [vmem:[#allocation2 + $0x80] sm:$0xff] %v3879_v0  ;;  %v3754_v8 = vsel %vm3562_vm7, %v3366_v1, -inf  ;;  %v3134_v9 = vadd.f32 %v5217_v5, %v7406_v29  ;;  %v3128_v34 = vpop.f32.mrb[17].mxu1  ;;  %v3444_v5 = vadd.s32 240, %v7396_v13 }
 0x460   : > { %v3882_v12 = vmax.f32 %v3818_v16, %v3754_v8  ;;  %v3753_v49 = vsel %vm3561_vm6, %v3365_v25, -inf  ;;  %v3129_v2 = vadd.f32 %v7406_v29, %v3128_v34  ;;  %v3825_v8 = vld [vmem:[#allocation2 + $0xd0] sm:$0xff]  ;;  %vm3571_vm13 = vcmp.lt.s32.totalorder %v3507_v61, 600 }
 0x461   : > { %v3881_v14 = vmax.f32 %v3817_v57, %v3753_v49  ;;  %v3368_v36 = vmax.f32 %v3134_v9, 0.0  ;;  %v3826_v57 = vld [vmem:[#allocation2 + $0xd8] sm:$0xff] }
 0x462   : > { %3946 = vst [vmem:[#allocation2 + $0x98] sm:$0xff] %v3882_v12  ;;  %v3367_v17 = vmax.f32 %v3129_v2, 0.0  ;;  %v5220_v40 = vpop.f32.mrb[18].mxu1  ;;  %v3510_v12 = vadd.s32 %v7401_v22, %v3445_v53 }
 0x463   : > { %3945 = vst [vmem:[#allocation2 + $0x90] sm:$0xff] %v3881_v14  ;;  %v3756_v18 = vsel %vm3564_vm1, %v3368_v36, -inf  ;;  %v3144_v15 = vadd.f32 %v5220_v40, %v7406_v29  ;;  %v3138_v19 = vpop.f32.mrb[19].mxu1  ;;  %v3447_v36 = vadd.s32 264, %v7396_v13  ;;  %v3446_v40 = vadd.s32 256, %v7396_v13 }
 0x464   : > { %v3884_v21 = vmax.f32 %v3820_v58, %v3756_v18  ;;  %v3755_v20 = vsel %vm3563_vm9, %v3367_v17, -inf  ;;  %v3139_v33 = vadd.f32 %v7406_v29, %v3138_v19  ;;  %v3828_v17 = vld [vmem:[#allocation2 + $0xe8] sm:$0xff]  ;;  %vm3574_vm4 = vcmp.lt.s32.totalorder %v3510_v12, 600 }
 0x465   : > { %v3883_v23 = vmax.f32 %v3819_v6, %v3755_v20  ;;  %v3370_v44 = vmax.f32 %v3144_v15, 0.0  ;;  %v3509_v6 = vadd.s32 %v7401_v22, %v3444_v5  ;;  %v3827_v15 = vld [vmem:[#allocation2 + $0xe0] sm:$0xff]  ;;  %v3512_v24 = vadd.s32 %v7401_v22, %v3447_v36 }
 0x466   : > { %3948 = vst [vmem:[#allocation2 + $0xa8] sm:$0xff] %v3884_v21  ;;  %v3369_v45 = vmax.f32 %v3139_v33, 0.0  ;;  %v5223_v26 = vpop.f32.mrb[20].mxu1  ;;  %v3455_v12 = vadd.s32 328, %v7396_v13  ;;  %v3454_v36 = vadd.s32 320, %v7396_v13 }
 0x467   : > { %3947 = vst [vmem:[#allocation2 + $0xa0] sm:$0xff] %v3883_v23  ;;  %v3758_v30 = vsel %vm3566_vm8, %v3370_v44, -inf  ;;  %v3154_v46 = vadd.f32 %v5223_v26, %v7406_v29  ;;  %v3148_v37 = vpop.f32.mrb[21].mxu1  ;;  %vm3573_vm12 = vcmp.lt.s32.totalorder %v3509_v6, 600  ;;  %v3511_v26 = vadd.s32 %v7401_v22, %v3446_v40 }
 0x468   : > { %v3886_v43 = vmax.f32 %v3822_v10, %v3758_v30  ;;  %v3757_v48 = vsel %vm3565_vm10, %v3369_v45, -inf  ;;  %v3149_v39 = vadd.f32 %v7406_v29, %v3148_v37  ;;  %v3829_v30 = vld [vmem:[#allocation2 + $0xf0] sm:$0xff]  ;;  %v3514_v37 = vadd.s32 %v7401_v22, %v3449_v42 }
 0x469   : > { %v3885_v52 = vmax.f32 %v3821_v28, %v3757_v48  ;;  %v3372_v32 = vmax.f32 %v3154_v46, 0.0  ;;  %v3830_v28 = vld [vmem:[#allocation2 + $0xf8] sm:$0xff]  ;;  %vm3576_vm3 = vcmp.lt.s32.totalorder %v3512_v24, 600  ;;  %vm3575_vm15 = vcmp.lt.s32.totalorder %v3511_v26, 600 }
 0x46a   : > { %3950 = vst [vmem:[#allocation2 + $0xb8] sm:$0xff] %v3886_v43  ;;  %v3371_v55 = vmax.f32 %v3149_v39, 0.0  ;;  %v5226_v56 = vpop.f32.mrb[22].mxu1  ;;  %v3513_v39 = vadd.s32 %v7401_v22, %v3448_v3  ;;  %vm3578_vm7 = vcmp.lt.s32.totalorder %v3514_v37, 600  ;;  %v3457_v24 = vadd.s32 344, %v7396_v13 }
 0x46b   : > { %3949 = vst [vmem:[#allocation2 + $0xb0] sm:$0xff] %v3885_v52  ;;  %v3760_v11 = vsel %vm3568_vm5, %v3372_v32, -inf  ;;  %v3164_v47 = vadd.f32 %v5226_v56, %v7406_v29  ;;  %v3158_v63 = vpop.f32.mrb[23].mxu1  ;;  %v3450_v56 = vadd.s32 288, %v7396_v13 }
 0x46c   : > { %v3888_v0 = vmax.f32 %v3824_v50, %v3760_v11  ;;  %v3759_v1 = vsel %vm3567_vm0, %v3371_v55, -inf  ;;  %v3159_v16 = vadd.f32 %v7406_v29, %v3158_v63  ;;  %v3831_v11 = vld [vmem:[#allocation2 + $0x100] sm:$0xff]  ;;  %vm3577_vm6 = vcmp.lt.s32.totalorder %v3513_v39, 600 }
 0x46d   : > { %v3887_v4 = vmax.f32 %v3823_v60, %v3759_v1  ;;  %v3374_v25 = vmax.f32 %v3164_v47, 0.0  ;;  %v3832_v60 = vld [vmem:[#allocation2 + $0x108] sm:$0xff] }
 0x46e   : > { %3952 = vst [vmem:[#allocation2 + $0xc8] sm:$0xff] %v3888_v0  ;;  %v3373_v38 = vmax.f32 %v3159_v16, 0.0  ;;  %v5229_v9 = vpop.f32.mrb[24].mxu1  ;;  %v3516_v0 = vadd.s32 %v7401_v22, %v3451_v35 }
 0x46f   : > { %3951 = vst [vmem:[#allocation2 + $0xc0] sm:$0xff] %v3887_v4  ;;  %v3762_v34 = vsel %vm3570_vm14, %v3374_v25, -inf  ;;  %v3174_v54 = vadd.f32 %v5229_v9, %v7406_v29  ;;  %v3168_v59 = vpop.f32.mrb[25].mxu1  ;;  %v3453_v25 = vadd.s32 312, %v7396_v13  ;;  %v3452_v9 = vadd.s32 304, %v7396_v13 }
 0x470   : > { %v3890_v49 = vmax.f32 %v3826_v57, %v3762_v34  ;;  %v3761_v2 = vsel %vm3569_vm11, %v3373_v38, -inf  ;;  %v3169_v14 = vadd.f32 %v7406_v29, %v3168_v59  ;;  %v3834_v38 = vld [vmem:[#allocation2 + $0x118] sm:$0xff]  ;;  %vm3580_vm1 = vcmp.lt.s32.totalorder %v3516_v0, 600 }
 0x471   : > { %v3889_v58 = vmax.f32 %v3825_v8, %v3761_v2  ;;  %v3376_v41 = vmax.f32 %v3174_v54, 0.0  ;;  %v3515_v8 = vadd.s32 %v7401_v22, %v3450_v56  ;;  %v3833_v54 = vld [vmem:[#allocation2 + $0x110] sm:$0xff]  ;;  %v3518_v6 = vadd.s32 %v7401_v22, %v3453_v25 }
 0x472   : > { %3954 = vst [vmem:[#allocation2 + $0xd8] sm:$0xff] %v3890_v49  ;;  %v3375_v18 = vmax.f32 %v3169_v14, 0.0  ;;  %v5232_v19 = vpop.f32.mrb[26].mxu1  ;;  %v3461_v0 = vadd.s32 376, %v7396_v13  ;;  %v3460_v25 = vadd.s32 368, %v7396_v13 }
 0x473   : > { %3953 = vst [vmem:[#allocation2 + $0xd0] sm:$0xff] %v3889_v58  ;;  %v3764_v21 = vsel %vm3572_vm2, %v3376_v41, -inf  ;;  %v3184_v20 = vadd.f32 %v5232_v19, %v7406_v29  ;;  %v3178_v33 = vpop.f32.mrb[27].mxu1  ;;  %vm3579_vm9 = vcmp.lt.s32.totalorder %v3515_v8, 600  ;;  %v3517_v19 = vadd.s32 %v7401_v22, %v3452_v9 }
 0x474   : > { %v3892_v23 = vmax.f32 %v3828_v17, %v3764_v21  ;;  %v3763_v44 = vsel %vm3571_vm13, %v3375_v18, -inf  ;;  %v3179_v10 = vadd.f32 %v7406_v29, %v3178_v33  ;;  %v3835_v21 = vld [vmem:[#allocation2 + $0x120] sm:$0xff]  ;;  %v3520_v33 = vadd.s32 %v7401_v22, %v3455_v12 }
 0x475   : > { %v3891_v7 = vmax.f32 %v3827_v15, %v3763_v44  ;;  %v3378_v45 = vmax.f32 %v3184_v20, 0.0  ;;  %v3836_v15 = vld [vmem:[#allocation2 + $0x128] sm:$0xff]  ;;  %vm3582_vm8 = vcmp.lt.s32.totalorder %v3518_v6, 600  ;;  %vm3581_vm10 = vcmp.lt.s32.totalorder %v3517_v19, 600 }
 0x476   : > { %3956 = vst [vmem:[#allocation2 + $0xe8] sm:$0xff] %v3892_v23  ;;  %v3377_v31 = vmax.f32 %v3179_v10, 0.0  ;;  %v5235_v46 = vpop.f32.mrb[28].mxu1  ;;  %v3519_v10 = vadd.s32 %v7401_v22, %v3454_v36  ;;  %vm3584_vm5 = vcmp.lt.s32.totalorder %v3520_v33, 600  ;;  %v3463_v6 = vadd.s32 392, %v7396_v13 }
 0x477   : > { %3955 = vst [vmem:[#allocation2 + $0xe0] sm:$0xff] %v3891_v7  ;;  %v3766_v27 = vsel %vm3574_vm4, %v3378_v45, -inf  ;;  %v3194_v43 = vadd.f32 %v5235_v46, %v7406_v29  ;;  %v3188_v48 = vpop.f32.mrb[29].mxu1  ;;  %v3456_v46 = vadd.s32 336, %v7396_v13 }
 0x478   : > { %v3894_v52 = vmax.f32 %v3830_v28, %v3766_v27  ;;  %v3765_v32 = vsel %vm3573_vm12, %v3377_v31, -inf  ;;  %v3189_v50 = vadd.f32 %v7406_v29, %v3188_v48  ;;  %v3837_v27 = vld [vmem:[#allocation2 + $0x130] sm:$0xff]  ;;  %vm3583_vm0 = vcmp.lt.s32.totalorder %v3519_v10, 600 }
 0x479   : > { %v3893_v51 = vmax.f32 %v3829_v30, %v3765_v32  ;;  %v3380_v55 = vmax.f32 %v3194_v43, 0.0  ;;  %v3838_v30 = vld [vmem:[#allocation2 + $0x138] sm:$0xff] }
 0x47a   : > { %3958 = vst [vmem:[#allocation2 + $0xf8] sm:$0xff] %v3894_v52  ;;  %v3379_v62 = vmax.f32 %v3189_v50, 0.0  ;;  %v5238_v47 = vpop.f32.mrb[30].mxu1  ;;  %v3522_v52 = vadd.s32 %v7401_v22, %v3457_v24 }
 0x47b   : > { %3957 = vst [vmem:[#allocation2 + $0xf0] sm:$0xff] %v3893_v51  ;;  %v3768_v63 = vsel %vm3576_vm3, %v3380_v55, -inf  ;;  %v3204_v61 = vadd.f32 %v5238_v47, %v7406_v29  ;;  %v3198_v53 = vpop.f32.mrb[31].mxu1  ;;  %v3459_v55 = vadd.s32 360, %v7396_v13  ;;  %v3458_v47 = vadd.s32 352, %v7396_v13 }
 0x47c   : > { %v3896_v1 = vmax.f32 %v3832_v60, %v3768_v63  ;;  %v3767_v16 = vsel %vm3575_vm15, %v3379_v62, -inf  ;;  %v3199_v4 = vadd.f32 %v7406_v29, %v3198_v53  ;;  %v3840_v62 = vld [vmem:[#allocation2 + $0x148] sm:$0xff]  ;;  %vm3586_vm14 = vcmp.lt.s32.totalorder %v3522_v52, 600 }
 0x47d   : > { %v3895_v57 = vmax.f32 %v3831_v11, %v3767_v16  ;;  %v3382_v5 = vmax.f32 %v3204_v61, 0.0  ;;  %v3521_v11 = vadd.s32 %v7401_v22, %v3456_v46  ;;  %v3839_v61 = vld [vmem:[#allocation2 + $0x140] sm:$0xff]  ;;  %v3524_v8 = vadd.s32 %v7401_v22, %v3459_v55 }
 0x47e   : > { %3960 = vst [vmem:[#allocation2 + $0x108] sm:$0xff] %v3896_v1  ;;  %v3381_v34 = vmax.f32 %v3199_v4, 0.0  ;;  %v5241_v59 = vpop.f32.mrb[32].mxu1  ;;  %v3467_v52 = vadd.s32 424, %v7396_v13  ;;  %v3466_v55 = vadd.s32 416, %v7396_v13 }
 0x47f   : > { %3959 = vst [vmem:[#allocation2 + $0x100] sm:$0xff] %v3895_v57  ;;  %v3770_v49 = vsel %vm3578_vm7, %v3382_v5, -inf  ;;  %v3214_v2 = vadd.f32 %v5241_v59, %v7406_v29  ;;  %v3208_v14 = vpop.f32.mrb[33].mxu1  ;;  %vm3585_vm11 = vcmp.lt.s32.totalorder %v3521_v11, 600  ;;  %v3523_v59 = vadd.s32 %v7401_v22, %v3458_v47 }
 0x480   : > { %v3898_v58 = vmax.f32 %v3834_v38, %v3770_v49  ;;  %v3769_v41 = vsel %vm3577_vm6, %v3381_v34, -inf  ;;  %v3209_v17 = vadd.f32 %v7406_v29, %v3208_v14  ;;  %v3841_v49 = vld [vmem:[#allocation2 + $0x150] sm:$0xff]  ;;  %v3526_v14 = vadd.s32 %v7401_v22, %v3461_v0 }
 0x481   : > { %v3897_v40 = vmax.f32 %v3833_v54, %v3769_v41  ;;  %v3384_v18 = vmax.f32 %v3214_v2, 0.0  ;;  %v3842_v54 = vld [vmem:[#allocation2 + $0x158] sm:$0xff]  ;;  %vm3588_vm2 = vcmp.lt.s32.totalorder %v3524_v8, 600  ;;  %vm3587_vm13 = vcmp.lt.s32.totalorder %v3523_v59, 600 }
 0x482   : > { %3962 = vst [vmem:[#allocation2 + $0x118] sm:$0xff] %v3898_v58  ;;  %v3383_v42 = vmax.f32 %v3209_v17, 0.0  ;;  %v5244_v20 = vpop.f32.mrb[34].mxu1  ;;  %v3525_v17 = vadd.s32 %v7401_v22, %v3460_v25  ;;  %vm3590_vm4 = vcmp.lt.s32.totalorder %v3526_v14, 600  ;;  %v3469_v8 = vadd.s32 440, %v7396_v13 }
 0x483   : > { %3961 = vst [vmem:[#allocation2 + $0x110] sm:$0xff] %v3897_v40  ;;  %v3772_v3 = vsel %vm3580_vm1, %v3384_v18, -inf  ;;  %v3224_v23 = vadd.f32 %v5244_v20, %v7406_v29  ;;  %v3218_v44 = vpop.f32.mrb[35].mxu1  ;;  %v3462_v20 = vadd.s32 384, %v7396_v13 }
 0x484   : > { %v3900_v7 = vmax.f32 %v3836_v15, %v3772_v3  ;;  %v3771_v45 = vsel %vm3579_vm9, %v3383_v42, -inf  ;;  %v3219_v28 = vadd.f32 %v7406_v29, %v3218_v44  ;;  %v3843_v3 = vld [vmem:[#allocation2 + $0x160] sm:$0xff]  ;;  %vm3589_vm12 = vcmp.lt.s32.totalorder %v3525_v17, 600 }
 0x485   : > { %v3899_v26 = vmax.f32 %v3835_v21, %v3771_v45  ;;  %v3386_v31 = vmax.f32 %v3224_v23, 0.0  ;;  %v3844_v21 = vld [vmem:[#allocation2 + $0x168] sm:$0xff]  ;;  %v7596_v17 = vld [vmem:[%s7851_s7] ss:$0 sm:$0xff] }
 0x486   : > { %3964 = vst [vmem:[#allocation2 + $0x128] sm:$0xff] %v3900_v7  ;;  %v3385_v37 = vmax.f32 %v3219_v28, 0.0  ;;  %v5247_v43 = vpop.f32.mrb[36].mxu1  ;;  %v3528_v7 = vadd.s32 %v7401_v22, %v3463_v6 }
 0x487   : > { %3963 = vst [vmem:[#allocation2 + $0x120] sm:$0xff] %v3899_v26  ;;  %v3774_v48 = vsel %vm3582_vm8, %v3386_v31, -inf  ;;  %v3234_v39 = vadd.f32 %v5247_v43, %v7406_v29  ;;  %v3228_v35 = vpop.f32.mrb[37].mxu1  ;;  %v3465_v31 = vadd.s32 408, %v7396_v13  ;;  %v3464_v43 = vadd.s32 400, %v7396_v13 }
 0x488   : > { %v3902_v32 = vmax.f32 %v3838_v30, %v3774_v48  ;;  %v3773_v50 = vsel %vm3581_vm10, %v3385_v37, -inf  ;;  %v3229_v51 = vadd.f32 %v7406_v29, %v3228_v35  ;;  %v3846_v37 = vld [vmem:[#allocation2 + $0x178] sm:$0xff]  ;;  %vm3592_vm3 = vcmp.lt.s32.totalorder %v3528_v7, 600 }
 0x489   : > { %v3901_v60 = vmax.f32 %v3837_v27, %v3773_v50  ;;  %v3388_v56 = vmax.f32 %v3234_v39, 0.0  ;;  %v3527_v27 = vadd.s32 %v7401_v22, %v3462_v20  ;;  %v3845_v39 = vld [vmem:[#allocation2 + $0x170] sm:$0xff]  ;;  %v3530_v11 = vadd.s32 %v7401_v22, %v3465_v31 }
 0x48a   : > { %3966 = vst [vmem:[#allocation2 + $0x138] sm:$0xff] %v3902_v32  ;;  %v3387_v63 = vmax.f32 %v3229_v51, 0.0  ;;  %v5250_v53 = vpop.f32.mrb[38].mxu1  ;;  %v3473_v7 = vadd.s32 472, %v7396_v13  ;;  %v3472_v31 = vadd.s32 464, %v7396_v13 }
 0x48b   : > { %3965 = vst [vmem:[#allocation2 + $0x130] sm:$0xff] %v3901_v60  ;;  %v3776_v1 = vsel %vm3584_vm5, %v3388_v56, -inf  ;;  %v3244_v16 = vadd.f32 %v5250_v53, %v7406_v29  ;;  %v3238_v4 = vpop.f32.mrb[39].mxu1  ;;  %vm3591_vm15 = vcmp.lt.s32.totalorder %v3527_v27, 600  ;;  %v3529_v53 = vadd.s32 %v7401_v22, %v3464_v43 }
 0x48c   : > { %v3904_v57 = vmax.f32 %v3840_v62, %v3776_v1  ;;  %v3775_v5 = vsel %vm3583_vm0, %v3387_v63, -inf  ;;  %v3239_v38 = vadd.f32 %v7406_v29, %v3238_v4  ;;  %v3847_v1 = vld [vmem:[#allocation2 + $0x180] sm:$0xff]  ;;  %v3532_v4 = vadd.s32 %v7401_v22, %v3467_v52 }
 0x48d   : > { %v3903_v9 = vmax.f32 %v3839_v61, %v3775_v5  ;;  %v3390_v34 = vmax.f32 %v3244_v16, 0.0  ;;  %v3848_v61 = vld [vmem:[#allocation2 + $0x188] sm:$0xff]  ;;  %vm3594_vm7 = vcmp.lt.s32.totalorder %v3530_v11, 600  ;;  %vm3593_vm6 = vcmp.lt.s32.totalorder %v3529_v53, 600 }
 0x48e   : > { %3968 = vst [vmem:[#allocation2 + $0x148] sm:$0xff] %v3904_v57  ;;  %v3389_v12 = vmax.f32 %v3239_v38, 0.0  ;;  %v5253_v2 = vpop.f32.mrb[40].mxu1  ;;  %v3531_v38 = vadd.s32 %v7401_v22, %v3466_v55  ;;  %vm3596_vm1 = vcmp.lt.s32.totalorder %v3532_v4, 600  ;;  %v3475_v11 = vadd.s32 488, %v7396_v13 }
 0x48f   : > { %3967 = vst [vmem:[#allocation2 + $0x140] sm:$0xff] %v3903_v9  ;;  %v3778_v36 = vsel %vm3586_vm14, %v3390_v34, -inf  ;;  %v3254_v58 = vadd.f32 %v5253_v2, %v7406_v29  ;;  %v3248_v41 = vpop.f32.mrb[41].mxu1  ;;  %v3468_v2 = vadd.s32 432, %v7396_v13 }
 0x490   : > { %v3906_v40 = vmax.f32 %v3842_v54, %v3778_v36  ;;  %v3777_v18 = vsel %vm3585_vm11, %v3389_v12, -inf  ;;  %v3249_v15 = vadd.f32 %v7406_v29, %v3248_v41  ;;  %v3849_v36 = vld [vmem:[#allocation2 + $0x190] sm:$0xff]  ;;  %vm3595_vm9 = vcmp.lt.s32.totalorder %v3531_v38, 600 }
 0x491   : > { %v3905_v19 = vmax.f32 %v3841_v49, %v3777_v18  ;;  %v3392_v42 = vmax.f32 %v3254_v58, 0.0  ;;  %v3850_v49 = vld [vmem:[#allocation2 + $0x198] sm:$0xff] }
 0x492   : > { %3970 = vst [vmem:[#allocation2 + $0x158] sm:$0xff] %v3906_v40  ;;  %v3391_v33 = vmax.f32 %v3249_v15, 0.0  ;;  %v5256_v23 = vpop.f32.mrb[42].mxu1  ;;  %v3534_v40 = vadd.s32 %v7401_v22, %v3469_v8 }
 0x493   : > { %3969 = vst [vmem:[#allocation2 + $0x150] sm:$0xff] %v3905_v19  ;;  %v3780_v44 = vsel %vm3588_vm2, %v3392_v42, -inf  ;;  %v3264_v10 = vadd.f32 %v5256_v23, %v7406_v29  ;;  %v3258_v24 = vpop.f32.mrb[43].mxu1  ;;  %v3471_v42 = vadd.s32 456, %v7396_v13  ;;  %v3470_v23 = vadd.s32 448, %v7396_v13 }
 0x494   : > { %v3908_v45 = vmax.f32 %v3844_v21, %v3780_v44  ;;  %v3779_v28 = vsel %vm3587_vm13, %v3391_v33, -inf  ;;  %v3259_v26 = vadd.f32 %v7406_v29, %v3258_v24  ;;  %v3852_v33 = vld [vmem:[#allocation2 + $0x1a8] sm:$0xff]  ;;  %vm3598_vm8 = vcmp.lt.s32.totalorder %v3534_v40, 600 }
 0x495   : > { %v3907_v30 = vmax.f32 %v3843_v3, %v3779_v28  ;;  %v3394_v46 = vmax.f32 %v3264_v10, 0.0  ;;  %v3533_v3 = vadd.s32 %v7401_v22, %v3468_v2  ;;  %v3851_v10 = vld [vmem:[#allocation2 + $0x1a0] sm:$0xff]  ;;  %v3536_v27 = vadd.s32 %v7401_v22, %v3471_v42 }
 0x496   : > { %3972 = vst [vmem:[#allocation2 + $0x168] sm:$0xff] %v3908_v45  ;;  %v3393_v48 = vmax.f32 %v3259_v26, 0.0  ;;  %v5259_v35 = vpop.f32.mrb[44].mxu1 }
 0x497   : > { %3971 = vst [vmem:[#allocation2 + $0x160] sm:$0xff] %v3907_v30  ;;  %v3782_v32 = vsel %vm3590_vm4, %v3394_v46, -inf  ;;  %v3274_v50 = vadd.f32 %v5259_v35, %v7406_v29  ;;  %v3268_v51 = vpop.f32.mrb[45].mxu1  ;;  %vm3597_vm10 = vcmp.lt.s32.totalorder %v3533_v3, 600  ;;  %v3535_v35 = vadd.s32 %v7401_v22, %v3470_v23  ;;  %v3860_v3 = vld [vmem:[#allocation2 + $0x1e8] sm:$0xff] }
 0x498   : > { %v3910_v60 = vmax.f32 %v3846_v37, %v3782_v32  ;;  %v3781_v56 = vsel %vm3589_vm12, %v3393_v48, -inf  ;;  %v3269_v62 = vadd.f32 %v7406_v29, %v3268_v51  ;;  %v3853_v32 = vld [vmem:[#allocation2 + $0x1b0] sm:$0xff]  ;;  %v3538_v51 = vadd.s32 %v7401_v22, %v3473_v7 }
 0x499   : > { %v3909_v47 = vmax.f32 %v3845_v39, %v3781_v56  ;;  %v3396_v63 = vmax.f32 %v3274_v50, 0.0  ;;  %v3854_v39 = vld [vmem:[#allocation2 + $0x1b8] sm:$0xff]  ;;  %vm3600_vm5 = vcmp.lt.s32.totalorder %v3536_v27, 600  ;;  %vm3599_vm0 = vcmp.lt.s32.totalorder %v3535_v35, 600 }
 0x49a   : > { %3974 = vst [vmem:[#allocation2 + $0x178] sm:$0xff] %v3910_v60  ;;  %v3395_v0 = vmax.f32 %v3269_v62, 0.0  ;;  %v5262_v16 = vpop.f32.mrb[46].mxu1  ;;  %v3537_v62 = vadd.s32 %v7401_v22, %v3472_v31  ;;  %vm3602_vm14 = vcmp.lt.s32.totalorder %v3538_v51, 600  ;;  %v3862_v27 = vld [vmem:[#allocation2 + $0x1f8] sm:$0xff] }
 0x49b   : > { %3973 = vst [vmem:[#allocation2 + $0x170] sm:$0xff] %v3909_v47  ;;  %v3784_v25 = vsel %vm3592_vm3, %v3396_v63, -inf  ;;  %v3284_v57 = vadd.f32 %v5262_v16, %v7406_v29  ;;  %v3278_v5 = vpop.f32.mrb[47].mxu1  ;;  %v3474_v16 = vadd.s32 480, %v7396_v13 }
 0x49c   : > { %v3912_v9 = vmax.f32 %v3848_v61, %v3784_v25  ;;  %v3783_v34 = vsel %vm3591_vm15, %v3395_v0, -inf  ;;  %v3279_v54 = vadd.f32 %v7406_v29, %v3278_v5  ;;  %v3855_v25 = vld [vmem:[#allocation2 + $0x1c0] sm:$0xff]  ;;  %vm3601_vm11 = vcmp.lt.s32.totalorder %v3537_v62, 600 }
 0x49d   : > { %v3911_v59 = vmax.f32 %v3847_v1, %v3783_v34  ;;  %v3398_v12 = vmax.f32 %v3284_v57, 0.0  ;;  %v3856_v1 = vld [vmem:[#allocation2 + $0x1c8] sm:$0xff] }
 0x49e   : > { %3976 = vst [vmem:[#allocation2 + $0x188] sm:$0xff] %v3912_v9  ;;  %v3397_v14 = vmax.f32 %v3279_v54, 0.0  ;;  %v5265_v58 = vpop.f32.mrb[48].mxu1  ;;  %v3540_v9 = vadd.s32 %v7401_v22, %v3475_v11 }
 0x49f   : > { %3975 = vst [vmem:[#allocation2 + $0x180] sm:$0xff] %v3911_v59  ;;  %v3786_v41 = vsel %vm3594_vm7, %v3398_v12, -inf  ;;  %v3294_v29 = vadd.f32 %v7596_v17, %v5265_v58  ;;  %v3288_v6 = vpop.f32.mrb[49].mxu1  ;;  %v3477_v12 = vadd.s32 504, %v7396_v13  ;;  %v3476_v58 = vadd.s32 496, %v7396_v13 }
 0x4a0   : > { %v3914_v18 = vmax.f32 %v3850_v49, %v3786_v41  ;;  %v3785_v15 = vsel %vm3593_vm6, %v3397_v14, -inf  ;;  %v3289_v19 = vadd.f32 %v7596_v17, %v3288_v6  ;;  %v3858_v14 = vld [vmem:[#allocation2 + $0x1d8] sm:$0xff]  ;;  %vm3604_vm2 = vcmp.lt.s32.totalorder %v3540_v9, 600 }
 0x4a1   : > { %v3913_v21 = vmax.f32 %v3849_v36, %v3785_v15  ;;  %v3400_v20 = vmax.f32 %v3294_v29, 0.0  ;;  %v3539_v36 = vadd.s32 %v7401_v22, %v3474_v16  ;;  %v3857_v29 = vld [vmem:[#allocation2 + $0x1d0] sm:$0xff]  ;;  %v3541_v23 = vadd.s32 %v7401_v22, %v3476_v58 }
 0x4a2   : > { %3978 = vst [vmem:[#allocation2 + $0x198] sm:$0xff] %v3914_v18  ;;  %v3399_v44 = vmax.f32 %v3289_v19, 0.0  ;;  %v5268_v24 = vpop.f32.mrb[50].mxu1 }
 0x4a3   : > { %3977 = vst [vmem:[#allocation2 + $0x190] sm:$0xff] %v3913_v21  ;;  %v3788_v45 = vsel %vm3596_vm1, %v3400_v20, -inf  ;;  %v3304_v28 = vadd.f32 %v7596_v17, %v5268_v24  ;;  %v3298_v26 = vpop.f32.mrb[51].mxu1  ;;  %v3542_v20 = vadd.s32 %v7401_v22, %v3477_v12  ;;  %vm3603_vm13 = vcmp.lt.s32.totalorder %v3539_v36, 600 }
 0x4a4   : > { %v3916_v30 = vmax.f32 %v3852_v33, %v3788_v45  ;;  %v3787_v46 = vsel %vm3595_vm9, %v3399_v44, -inf  ;;  %v3299_v37 = vadd.f32 %v7596_v17, %v3298_v26  ;;  %vm3605_vm12 = vcmp.lt.s32.totalorder %v3541_v23, 600 }
 0x4a5   : > { %v3915_v43 = vmax.f32 %v3851_v10, %v3787_v46  ;;  %v3402_v48 = vmax.f32 %v3304_v28, 0.0  ;;  %v3859_v10 = vld [vmem:[#allocation2 + $0x1e0] sm:$0xff]  ;;  %vm3606_vm4 = vcmp.lt.s32.totalorder %v3542_v20, 600 }
 0x4a6   : > { %3980 = vst [vmem:[#allocation2 + $0x1a8] sm:$0xff] %v3916_v30  ;;  %v3401_v52 = vmax.f32 %v3299_v37, 0.0  ;;  %v5271_v50 = vpop.f32.mrb[52].mxu1 }
 0x4a7   : > { %3979 = vst [vmem:[#allocation2 + $0x1a0] sm:$0xff] %v3915_v43  ;;  %v3790_v55 = vsel %vm3598_vm8, %v3402_v48, -inf  ;;  %v3314_v60 = vadd.f32 %v7596_v17, %v5271_v50  ;;  %v3308_v56 = vpop.f32.mrb[53].mxu1  ;;  %v3861_v43 = vld [vmem:[#allocation2 + $0x1f0] sm:$0xff] }
 0x4a8   : > { %v3918_v47 = vmax.f32 %v3854_v39, %v3790_v55  ;;  %v3789_v63 = vsel %vm3597_vm10, %v3401_v52, -inf  ;;  %v3309_v61 = vadd.f32 %v7596_v17, %v3308_v56 }
 0x4a9   : > { %v3917_v53 = vmax.f32 %v3853_v32, %v3789_v63  ;;  %v3404_v0 = vmax.f32 %v3314_v60, 0.0 }
 0x4aa   : > { %3982 = vst [vmem:[#allocation2 + $0x1b8] sm:$0xff] %v3918_v47  ;;  %v3403_v4 = vmax.f32 %v3309_v61, 0.0  ;;  %v5274_v57 = vpop.f32.mrb[54].mxu1 }
 0x4ab   : > { %3981 = vst [vmem:[#allocation2 + $0x1b0] sm:$0xff] %v3917_v53  ;;  %v3792_v5 = vsel %vm3600_vm5, %v3404_v0, -inf  ;;  %v3324_v38 = vadd.f32 %v7596_v17, %v5274_v57  ;;  %v3318_v8 = vpop.f32.mrb[55].mxu1 }
 0x4ac   : > { %v3920_v34 = vmax.f32 %v3856_v1, %v3792_v5  ;;  %v3791_v54 = vsel %vm3599_vm0, %v3403_v4, -inf  ;;  %v3319_v59 = vadd.f32 %v7596_v17, %v3318_v8 }
 0x4ad   : > { %v3919_v49 = vmax.f32 %v3855_v25, %v3791_v54  ;;  %v3406_v2 = vmax.f32 %v3324_v38, 0.0 }
 0x4ae   : > { %3984 = vst [vmem:[#allocation2 + $0x1c8] sm:$0xff] %v3920_v34  ;;  %v3405_v41 = vmax.f32 %v3319_v59, 0.0  ;;  %v5277_v6 = vpop.f32.mrb[56].mxu1 }
 0x4af   : > { %3983 = vst [vmem:[#allocation2 + $0x1c0] sm:$0xff] %v3919_v49  ;;  %v3794_v40 = vsel %vm3602_vm14, %v3406_v2, -inf  ;;  %v3334_v18 = vadd.f32 %v7596_v17, %v5277_v6  ;;  %v3328_v15 = vpop.f32.mrb[57].mxu1 }
 0x4b0   : > { %v3922_v19 = vmax.f32 %v3858_v14, %v3794_v40  ;;  %v3793_v42 = vsel %vm3601_vm11, %v3405_v41, -inf  ;;  %v3329_v21 = vadd.f32 %v7596_v17, %v3328_v15 }
 0x4b1   : > { %v3921_v33 = vmax.f32 %v3857_v29, %v3793_v42  ;;  %v3408_v13 = vmax.f32 %v3334_v18, 0.0 }
 0x4b2   : > { %3986 = vst [vmem:[#allocation2 + $0x1d8] sm:$0xff] %v3922_v19  ;;  %v3407_v44 = vmax.f32 %v3329_v21, 0.0  ;;  %v5280_v24 = vpop.f32.mrb[58].mxu1 }
 0x4b3   : > { %3985 = vst [vmem:[#allocation2 + $0x1d0] sm:$0xff] %v3921_v33  ;;  %v3796_v7 = vsel %vm3604_vm2, %v3408_v13, -inf  ;;  %v3344_v45 = vadd.f32 %v7596_v17, %v5280_v24  ;;  %v3338_v28 = vpop.f32.mrb[59].mxu1 }
 0x4b4   : > { %v3924_v26 = vmax.f32 %v3860_v3, %v3796_v7  ;;  %v3795_v31 = vsel %vm3603_vm13, %v3407_v44, -inf  ;;  %v3339_v30 = vadd.f32 %v7596_v17, %v3338_v28 }
 0x4b5   : > { %v3923_v46 = vmax.f32 %v3859_v10, %v3795_v31  ;;  %v3410_v37 = vmax.f32 %v3344_v45, 0.0 }
 0x4b6   : > { %3988 = vst [vmem:[#allocation2 + $0x1e8] sm:$0xff] %v3924_v26  ;;  %v3409_v22 = vmax.f32 %v3339_v30, 0.0 }
 0x4b7   : > { %3987 = vst [vmem:[#allocation2 + $0x1e0] sm:$0xff] %v3923_v46  ;;  %v3798_v48 = vsel %vm3606_vm4, %v3410_v37, -inf }
 0x4b8   : > { %v3926_v39 = vmax.f32 %v3862_v27, %v3798_v48  ;;  %v3797_v35 = vsel %vm3605_vm12, %v3409_v22, -inf }
 0x4b9   : > { %v3925_v52 = vmax.f32 %v3861_v43, %v3797_v35 }
 0x4ba   : > { %3990 = vst [vmem:[#allocation2 + $0x1f8] sm:$0xff] %v3926_v39 }
 0x4bb   : > { %3989 = vst [vmem:[#allocation2 + $0x1f0] sm:$0xff] %v3925_v52 }
 0x4bc PF: > { %p4604_p8 = scmp.ne.s32.totalorder %s5720_s30, 2 }
 0x4bd   : > { %v4128_v17 = vld [vmem:[%s7852_s8] sm:$0xff] (!%p4604_p8)  ;;  %v4129_v32 = vld [vmem:[%s7852_s8 + $0x8] sm:$0xff] (!%p4604_p8)  ;;  %v4130_v50 = vld [vmem:[%s7852_s8 + $0x10] sm:$0xff] (!%p4604_p8)  ;;  %v5635_v51 = vmov (!%p4604_p8), 0.0|0.0   ;;  %vm5636_vm3 = vmmov (!%p4604_p8), 0   ;;  %v5637_v56 = vmov (!%p4604_p8), 0.0  }
 0x4be   : > { %3994 = sbr.rel (%p4604_p8) target bundleno = 1912 (0x778), region = 96  ;;  %5470 = vmatprep.subr.bf16.mxu0 (!%p4604_p8), %v5635_v51  ;;  %v5471_v55 = vpack.c.bf16 (!%p4604_p8), %v4129_v32, %v4128_v17  ;;  %v4131_v60 = vld [vmem:[%s7852_s8 + $0x18] sm:$0xff] (!%p4604_p8)  ;;  %5313 = vmatprep.mubr.msk.f32.mxu0 (!%p4604_p8), %vm5636_vm3, %v5637_v56  ;;  %v4132_v11 = vld [vmem:[%s7852_s8 + $0x20] sm:$0xff] (!%p4604_p8)  ;;  %v4133_v47 = vld [vmem:[%s7852_s8 + $0x28] sm:$0xff] (!%p4604_p8) }
 0x4bf   : > { %5494 = vmatprep.subr.bf16.mxu1 (!%p4604_p8), %v5635_v51  ;;  %5348 = vmatprep.mubr.msk.f32.mxu1 (!%p4604_p8), %vm5636_vm3, %v5637_v56  ;;  %v5474_v62 = vpack.c.bf16 (!%p4604_p8), %v4131_v60, %v4130_v50  ;;  %v3995_v63 = vld [vmem:[#allocation2] sm:$0xff] (!%p4604_p8)  ;;  %v3996_v61 = vld [vmem:[#allocation2 + $0x8] sm:$0xff] (!%p4604_p8)  ;;  %v4134_v53 = vld [vmem:[%s7852_s8 + $0x30] sm:$0xff] (!%p4604_p8)  ;;  %v5477_v25 = vpack.c.bf16 (!%p4604_p8), %v4133_v47, %v4132_v11 }
 0x4c0   : > { %5472 = vmatpush3.bf16.msra.mxu0 (!%p4604_p8), %v5471_v55  ;;  %v4135_v0 = vld [vmem:[%s7852_s8 + $0x38] sm:$0xff] (!%p4604_p8)  ;;  %v3997_v1 = vld [vmem:[#allocation2 + $0x10] sm:$0xff] (!%p4604_p8)  ;;  %v3999_v4 = vld [vmem:[#allocation2 + $0x20] sm:$0xff] (!%p4604_p8) }
 0x4c1   : > { %5473 = vmatprep.subr.bf16.mxu0 (!%p4604_p8), %v5635_v51  ;;  %v3998_v16 = vld [vmem:[#allocation2 + $0x18] sm:$0xff] (!%p4604_p8)  ;;  %v4000_v57 = vld [vmem:[#allocation2 + $0x28] sm:$0xff] (!%p4604_p8)  ;;  %v4001_v5 = vld [vmem:[#allocation2 + $0x30] sm:$0xff] (!%p4604_p8)  ;;  %v4059_v8 = vmax.f32 (!%p4604_p8), %v3995_v63, %v3999_v4  ;;  %v5480_v19 = vpack.c.bf16 (!%p4604_p8), %v4135_v0, %v4134_v53 }
 0x4c2   : > { %v4002_v38 = vld [vmem:[#allocation2 + $0x38] sm:$0xff] (!%p4604_p8)  ;;  %v4003_v9 = vld [vmem:[#allocation2 + $0x40] sm:$0xff] (!%p4604_p8)  ;;  %v4004_v34 = vld [vmem:[#allocation2 + $0x48] sm:$0xff] (!%p4604_p8)  ;;  %v4060_v59 = vmax.f32 (!%p4604_p8), %v3996_v61, %v4000_v57  ;;  %v4061_v12 = vmax.f32 (!%p4604_p8), %v3997_v1, %v4001_v5 }
 0x4c3   : > { %v4005_v54 = vld [vmem:[#allocation2 + $0x50] sm:$0xff] (!%p4604_p8)  ;;  %v4062_v49 = vmax.f32 (!%p4604_p8), %v3998_v16, %v4002_v38  ;;  %v4006_v2 = vld [vmem:[#allocation2 + $0x58] sm:$0xff] (!%p4604_p8)  ;;  %v4007_v14 = vld [vmem:[#allocation2 + $0x60] sm:$0xff] (!%p4604_p8)  ;;  %v4063_v58 = vmax.f32 (!%p4604_p8), %v4059_v8, %v4003_v9 }
 0x4c4   : > { %5475 = vmatpush3.bf16.msra.mxu0 (!%p4604_p8), %v5474_v62  ;;  %v4008_v36 = vld [vmem:[#allocation2 + $0x68] sm:$0xff] (!%p4604_p8)  ;;  %v4009_v41 = vld [vmem:[#allocation2 + $0x70] sm:$0xff] (!%p4604_p8)  ;;  %v4010_v29 = vld [vmem:[#allocation2 + $0x78] sm:$0xff] (!%p4604_p8)  ;;  %v4064_v40 = vmax.f32 (!%p4604_p8), %v4060_v59, %v4004_v34  ;;  %v4065_v18 = vmax.f32 (!%p4604_p8), %v4061_v12, %v4005_v54 }
 0x4c5   : > { %5476 = vmatprep.subr.bf16.mxu0 %v5635_v51  ;;  %v4011_v6 = vld [vmem:[#allocation2 + $0x80] sm:$0xff]  ;;  %v4066_v15 = vmax.f32 %v4062_v49, %v4006_v2  ;;  %v4012_v42 = vld [vmem:[#allocation2 + $0x88] sm:$0xff]  ;;  %v4013_v21 = vld [vmem:[#allocation2 + $0x90] sm:$0xff]  ;;  %v4067_v33 = vmax.f32 %v4063_v58, %v4007_v14 }
 0x4c6   : > { %v4014_v20 = vld [vmem:[#allocation2 + $0x98] sm:$0xff]  ;;  %v4136_v13 = vld [vmem:[%s7852_s8 + $0x40] sm:$0xff]  ;;  %v4137_v3 = vld [vmem:[%s7852_s8 + $0x48] sm:$0xff]  ;;  %v4068_v44 = vmax.f32 %v4064_v40, %v4008_v36  ;;  %v4069_v10 = vmax.f32 %v4065_v18, %v4009_v41 }
 0x4c7   : > { %v4015_v23 = vld [vmem:[#allocation2 + $0xa0] sm:$0xff]  ;;  %v4070_v24 = vmax.f32 %v4066_v15, %v4010_v29  ;;  %v4016_v7 = vld [vmem:[#allocation2 + $0xa8] sm:$0xff]  ;;  %v4017_v45 = vld [vmem:[#allocation2 + $0xb0] sm:$0xff]  ;;  %v4071_v26 = vmax.f32 %v4067_v33, %v4011_v6  ;;  %v5483_v27 = vpack.c.bf16 %v4137_v3, %v4136_v13 }
 0x4c8   : > { %5478 = vmatpush3.bf16.msra.mxu0 %v5477_v25  ;;  %v4018_v28 = vld [vmem:[#allocation2 + $0xb8] sm:$0xff]  ;;  %v4019_v31 = vld [vmem:[#allocation2 + $0xc0] sm:$0xff]  ;;  %v4072_v30 = vmax.f32 %v4068_v44, %v4012_v42  ;;  %v4073_v46 = vmax.f32 %v4069_v10, %v4013_v21  ;;  %v4020_v22 = vld [vmem:[#allocation2 + $0xc8] sm:$0xff] }
 0x4c9   : > { %5479 = vmatprep.subr.bf16.mxu0 %v5635_v51  ;;  %v4074_v37 = vmax.f32 %v4070_v24, %v4014_v20  ;;  %v4021_v43 = vld [vmem:[#allocation2 + $0xd0] sm:$0xff]  ;;  %v4022_v48 = vld [vmem:[#allocation2 + $0xd8] sm:$0xff]  ;;  %v4075_v39 = vmax.f32 %v4071_v26, %v4015_v23  ;;  %v4023_v17 = vld [vmem:[#allocation2 + $0xe0] sm:$0xff] }
 0x4ca   : > { %v4138_v35 = vld [vmem:[%s7852_s8 + $0x50] sm:$0xff]  ;;  %v4139_v52 = vld [vmem:[%s7852_s8 + $0x58] sm:$0xff]  ;;  %v4076_v32 = vmax.f32 %v4072_v30, %v4016_v7  ;;  %v4077_v50 = vmax.f32 %v4073_v46, %v4017_v45  ;;  %v4024_v60 = vld [vmem:[#allocation2 + $0xe8] sm:$0xff] }
 0x4cb   : > { %v4078_v55 = vmax.f32 %v4074_v37, %v4018_v28  ;;  %v4025_v62 = vld [vmem:[#allocation2 + $0xf0] sm:$0xff]  ;;  %v4026_v11 = vld [vmem:[#allocation2 + $0xf8] sm:$0xff]  ;;  %v4079_v47 = vmax.f32 %v4075_v39, %v4019_v31  ;;  %v4027_v63 = vld [vmem:[#allocation2 + $0x100] sm:$0xff]  ;;  %v5486_v1 = vpack.c.bf16 %v4139_v52, %v4138_v35 }
 0x4cc   : > { %5481 = vmatpush3.bf16.msra.mxu0 %v5480_v19  ;;  %v4080_v61 = vmax.f32 %v4076_v32, %v4020_v22  ;;  %v4081_v53 = vmax.f32 %v4077_v50, %v4021_v43  ;;  %v4028_v16 = vld [vmem:[#allocation2 + $0x108] sm:$0xff]  ;;  %v4029_v4 = vld [vmem:[#allocation2 + $0x110] sm:$0xff]  ;;  %v4030_v25 = vld [vmem:[#allocation2 + $0x118] sm:$0xff] }
 0x4cd   : > { %5482 = vmatprep.subr.bf16.mxu0 %v5635_v51  ;;  %v4082_v0 = vmax.f32 %v4078_v55, %v4022_v48  ;;  %v4083_v57 = vmax.f32 %v4079_v47, %v4023_v17  ;;  %v4140_v5 = vld [vmem:[%s7852_s8 + $0x60] sm:$0xff]  ;;  %v4141_v38 = vld [vmem:[%s7852_s8 + $0x68] sm:$0xff]  ;;  %v4033_v12 = vld [vmem:[#allocation2 + $0x130] sm:$0xff] }
 0x4ce   : > { %v4031_v8 = vld [vmem:[#allocation2 + $0x120] sm:$0xff]  ;;  %v4084_v9 = vmax.f32 %v4080_v61, %v4024_v60  ;;  %v4085_v34 = vmax.f32 %v4081_v53, %v4025_v62  ;;  %v4032_v59 = vld [vmem:[#allocation2 + $0x128] sm:$0xff]  ;;  %v4034_v49 = vld [vmem:[#allocation2 + $0x138] sm:$0xff]  ;;  %v5489_v40 = vpack.c.bf16 %v4141_v38, %v4140_v5 }
 0x4cf   : > { %v4086_v54 = vmax.f32 %v4082_v0, %v4026_v11  ;;  %v4087_v2 = vmax.f32 %v4083_v57, %v4027_v63  ;;  %v4142_v14 = vld [vmem:[%s7852_s8 + $0x70] sm:$0xff]  ;;  %v4143_v36 = vld [vmem:[%s7852_s8 + $0x78] sm:$0xff]  ;;  %v4035_v58 = vld [vmem:[#allocation2 + $0x140] sm:$0xff] }
 0x4d0   : > { %5484 = vmatpush3.bf16.msra.mxu0 %v5483_v27  ;;  %v4088_v41 = vmax.f32 %v4084_v9, %v4028_v16  ;;  %v4089_v29 = vmax.f32 %v4085_v34, %v4029_v4  ;;  %v4036_v18 = vld [vmem:[#allocation2 + $0x148] sm:$0xff]  ;;  %v4037_v15 = vld [vmem:[#allocation2 + $0x150] sm:$0xff]  ;;  %v4038_v19 = vld [vmem:[#allocation2 + $0x158] sm:$0xff]  ;;  %v5492_v37 = vpack.c.bf16 %v4143_v36, %v4142_v14 }
 0x4d1   : > { %5485 = vmatprep.subr.bf16.mxu0 %v5635_v51  ;;  %v4090_v6 = vmax.f32 %v4086_v54, %v4030_v25  ;;  %v4091_v42 = vmax.f32 %v4087_v2, %v4031_v8  ;;  %v4039_v21 = vld [vmem:[#allocation2 + $0x160] sm:$0xff]  ;;  %v4040_v20 = vld [vmem:[#allocation2 + $0x168] sm:$0xff]  ;;  %v4041_v33 = vld [vmem:[#allocation2 + $0x170] sm:$0xff] }
 0x4d2   : > { %v4092_v13 = vmax.f32 %v4088_v41, %v4032_v59  ;;  %v4093_v3 = vmax.f32 %v4089_v29, %v4033_v12  ;;  %v4042_v44 = vld [vmem:[#allocation2 + $0x178] sm:$0xff]  ;;  %v4043_v10 = vld [vmem:[#allocation2 + $0x180] sm:$0xff]  ;;  %v4044_v24 = vld [vmem:[#allocation2 + $0x188] sm:$0xff] }
 0x4d3   : > { %v4094_v23 = vmax.f32 %v4090_v6, %v4034_v49  ;;  %v4095_v7 = vmax.f32 %v4091_v42, %v4035_v58  ;;  %v4045_v45 = vld [vmem:[#allocation2 + $0x190] sm:$0xff]  ;;  %v4046_v28 = vld [vmem:[#allocation2 + $0x198] sm:$0xff]  ;;  %v4222_v46 = vld [vmem:[%s7854_s10] sm:$0xff] }
 0x4d4   : > { %5487 = vmatpush3.bf16.msra.mxu0 %v5486_v1  ;;  %v4096_v26 = vmax.f32 %v4092_v13, %v4036_v18  ;;  %v4097_v31 = vmax.f32 %v4093_v3, %v4037_v15  ;;  %v4223_v22 = vld [vmem:[%s7854_s10 + $0x8] sm:$0xff]  ;;  %v4224_v43 = vld [vmem:[%s7854_s10 + $0x10] sm:$0xff]  ;;  %v4225_v48 = vld [vmem:[%s7854_s10 + $0x18] sm:$0xff] }
 0x4d5   : > { %5488 = vmatprep.subr.bf16.mxu0 %v5635_v51  ;;  %v4098_v30 = vmax.f32 %v4094_v23, %v4038_v19  ;;  %v4099_v27 = vmax.f32 %v4095_v7, %v4039_v21  ;;  %v4047_v39 = vld [vmem:[#allocation2 + $0x1a0] sm:$0xff]  ;;  %v5495_v32 = vpack.c.bf16 %v4223_v22, %v4222_v46  ;;  %v4048_v50 = vld [vmem:[#allocation2 + $0x1a8] sm:$0xff]  ;;  %v4049_v55 = vld [vmem:[#allocation2 + $0x1b0] sm:$0xff]  ;;  %v5498_v1 = vpack.c.bf16 %v4225_v48, %v4224_v43 }
 0x4d6   : > { %v4100_v35 = vmax.f32 %v4096_v26, %v4040_v20  ;;  %v4101_v52 = vmax.f32 %v4097_v31, %v4041_v33  ;;  %v4050_v60 = vld [vmem:[#allocation2 + $0x1b8] sm:$0xff]  ;;  %v4051_v11 = vld [vmem:[#allocation2 + $0x1c0] sm:$0xff]  ;;  %v4052_v47 = vld [vmem:[#allocation2 + $0x1c8] sm:$0xff] }
 0x4d7   : > { %v4102_v17 = vmax.f32 %v4098_v30, %v4042_v44  ;;  %v4103_v62 = vmax.f32 %v4099_v27, %v4043_v10  ;;  %v4053_v63 = vld [vmem:[#allocation2 + $0x1d0] sm:$0xff]  ;;  %5496 = vmatpush3.bf16.msra.mxu1 %v5495_v32  ;;  %v4054_v16 = vld [vmem:[#allocation2 + $0x1d8] sm:$0xff]  ;;  %v4226_v25 = vld [vmem:[%s7854_s10 + $0x20] sm:$0xff] }
 0x4d8   : > { %5490 = vmatpush3.bf16.msra.mxu0 %v5489_v40  ;;  %v4104_v61 = vmax.f32 %v4100_v35, %v4044_v24  ;;  %v4105_v53 = vmax.f32 %v4101_v52, %v4045_v45  ;;  %5497 = vmatprep.subr.bf16.mxu1 %v5635_v51  ;;  %v4227_v57 = vld [vmem:[%s7854_s10 + $0x28] sm:$0xff]  ;;  %v4055_v5 = vld [vmem:[#allocation2 + $0x1e0] sm:$0xff]  ;;  %v4057_v54 = vld [vmem:[#allocation2 + $0x1f0] sm:$0xff] }
 0x4d9   : > { %5491 = vmatprep.subr.bf16.mxu0 %v5635_v51  ;;  %v4106_v0 = vmax.f32 %v4102_v17, %v4046_v28  ;;  %v4107_v4 = vmax.f32 %v4103_v62, %v4047_v39  ;;  %v4056_v34 = vld [vmem:[#allocation2 + $0x1e8] sm:$0xff]  ;;  %v4058_v59 = vld [vmem:[#allocation2 + $0x1f8] sm:$0xff]  ;;  %v5501_v36 = vpack.c.bf16 %v4227_v57, %v4226_v25  ;;  %v4228_v41 = vld [vmem:[%s7854_s10 + $0x30] sm:$0xff] }
 0x4da   : > { %v4108_v38 = vmax.f32 %v4104_v61, %v4048_v50  ;;  %v4109_v8 = vmax.f32 %v4105_v53, %v4049_v55  ;;  %v4229_v29 = vld [vmem:[%s7854_s10 + $0x38] sm:$0xff]  ;;  %v4230_v21 = vld [vmem:[%s7854_s10 + $0x40] sm:$0xff]  ;;  %v4231_v20 = vld [vmem:[%s7854_s10 + $0x48] sm:$0xff] }
 0x4db   : > { %v4110_v9 = vmax.f32 %v4106_v0, %v4050_v60  ;;  %v4111_v12 = vmax.f32 %v4107_v4, %v4051_v11  ;;  %5499 = vmatpush3.bf16.msra.mxu1 %v5498_v1  ;;  %v5504_v42 = vpack.c.bf16 %v4229_v29, %v4228_v41  ;;  %v5507_v3 = vpack.c.bf16 %v4231_v20, %v4230_v21  ;;  %v4232_v23 = vld [vmem:[%s7854_s10 + $0x50] sm:$0xff]  ;;  %v4233_v44 = vld [vmem:[%s7854_s10 + $0x58] sm:$0xff]  ;;  %v4234_v45 = vld [vmem:[%s7854_s10 + $0x60] sm:$0xff] }
 0x4dc   : > { %5493 = vmatpush3.bf16.msra.mxu0 %v5492_v37  ;;  %v4112_v49 = vmax.f32 %v4108_v38, %v4052_v47  ;;  %v4113_v2 = vmax.f32 %v4109_v8, %v4053_v63  ;;  %5500 = vmatprep.subr.bf16.mxu1 %v5635_v51  ;;  %v5510_v7 = vpack.c.bf16 %v4233_v44, %v4232_v23  ;;  %v4235_v28 = vld [vmem:[%s7854_s10 + $0x68] sm:$0xff]  ;;  %v4236_v37 = vld [vmem:[%s7854_s10 + $0x70] sm:$0xff]  ;;  %v4237_v27 = vld [vmem:[%s7854_s10 + $0x78] sm:$0xff] }
 0x4dd   : > { %5518 = vmatprep.subr.bf16.mxu0 %v5635_v51  ;;  %v4114_v14 = vmax.f32 %v4110_v9, %v4054_v16  ;;  %v4115_v58 = vmax.f32 %v4111_v12, %v4055_v5  ;;  %v5513_v30 = vpack.c.bf16 %v4235_v28, %v4234_v45  ;;  %v5516_v22 = vpack.c.bf16 %v4237_v27, %v4236_v37  ;;  %v4316_v43 = vld [vmem:[%s7856_s12] sm:$0xff]  ;;  %v4317_v48 = vld [vmem:[%s7856_s12 + $0x8] sm:$0xff]  ;;  %v4319_v35 = vld [vmem:[%s7856_s12 + $0x18] sm:$0xff] }
 0x4de   : > { %v4116_v6 = vmax.f32 %v4112_v49, %v4056_v34  ;;  %v4117_v40 = vmax.f32 %v4113_v2, %v4057_v54  ;;  %v5519_v39 = vpack.c.bf16 %v4317_v48, %v4316_v43  ;;  %v4320_v17 = vld [vmem:[%s7856_s12 + $0x20] sm:$0xff]  ;;  %v4321_v32 = vld [vmem:[%s7856_s12 + $0x28] sm:$0xff]  ;;  %v4322_v55 = vld [vmem:[%s7856_s12 + $0x30] sm:$0xff] }
 0x4df   : > { %v4118_v18 = vmax.f32 %v4114_v14, %v4058_v59  ;;  %5502 = vmatpush3.bf16.msra.mxu1 %v5501_v36  ;;  %v5525_v50 = vpack.c.bf16 %v4321_v32, %v4320_v17  ;;  %v4323_v60 = vld [vmem:[%s7856_s12 + $0x38] sm:$0xff]  ;;  %v4324_v11 = vld [vmem:[%s7856_s12 + $0x40] sm:$0xff]  ;;  %v4325_v47 = vld [vmem:[%s7856_s12 + $0x48] sm:$0xff] }
 0x4e0   : > { %v4119_v15 = vmax.f32 %v4115_v58, %v4116_v6  ;;  %5503 = vmatprep.subr.bf16.mxu1 %v5635_v51  ;;  %v5528_v62 = vpack.c.bf16 %v4323_v60, %v4322_v55  ;;  %v5531_v63 = vpack.c.bf16 %v4325_v47, %v4324_v11  ;;  %v4326_v61 = vld [vmem:[%s7856_s12 + $0x50] sm:$0xff]  ;;  %v4327_v53 = vld [vmem:[%s7856_s12 + $0x58] sm:$0xff]  ;;  %v4328_v1 = vld [vmem:[%s7856_s12 + $0x60] sm:$0xff] }
 0x4e1   : > { %v4120_v19 = vmax.f32 %v4117_v40, %v4118_v18  ;;  %v5534_v0 = vpack.c.bf16 %v4327_v53, %v4326_v61  ;;  %v4329_v16 = vld [vmem:[%s7856_s12 + $0x68] sm:$0xff]  ;;  %v4605_v25 = vld [vmem:[%s7853_s9] ss:$0 sm:$0xff]  ;;  %v4330_v9 = vld [vmem:[%s7856_s12 + $0x70] sm:$0xff] }
 0x4e2   : > { %v5537_v4 = vpack.c.bf16 %v4329_v16, %v4328_v1  ;;  %v4331_v34 = vld [vmem:[%s7856_s12 + $0x78] sm:$0xff]  ;;  %v4607_v14 = vld [vmem:[%s7857_s13] ss:$0 sm:$0xff] }
 0x4e3   : > { %v4121_v33 = vmax.f32 %v4119_v15, %v4120_v19  ;;  %5505 = vmatpush3.bf16.msra.mxu1 %v5504_v42  ;;  %v5540_v54 = vpack.c.bf16 %v4331_v34, %v4330_v9 }
 0x4e4   : > { %5506 = vmatprep.subr.bf16.mxu1 %v5635_v51 }
 0x4e5   : > { %v4122_v13 = vrot.slane %v4121_v33, 4 }
 0x4e7   : > { %v4123_v10 = vmax.f32 %v4121_v33, %v4122_v13  ;;  %5508 = vmatpush3.bf16.msra.mxu1 %v5507_v3 }
 0x4e8   : > { %5509 = vmatprep.subr.bf16.mxu1 %v5635_v51 }
 0x4e9   : > { %v4124_v24 = vrot.slane %v4123_v10, 2 }
 0x4eb   : > { %v4125_v26 = vmax.f32 %v4123_v10, %v4124_v24  ;;  %5511 = vmatpush3.bf16.msra.mxu1 %v5510_v7 }
 0x4ec   : > { %5512 = vmatprep.subr.bf16.mxu1 %v5635_v51 }
 0x4ed   : > { %v4126_v31 = vrot.slane %v4125_v26, 1 }
 0x4ef   : > { %v4127_v46 = vmax.f32 %v4125_v26, %v4126_v31  ;;  %5514 = vmatpush3.bf16.msra.mxu1 %v5513_v30 }
 0x4f0   : > { %5515 = vmatprep.subr.bf16.mxu1 %v5635_v51 }
 0x4f1   : > { %5314 = vmatmul.mubr.f32.vlgmr.msra.gmra.mrb[0].mxu0 %v4127_v46 }
 0x4f2   : > { %5383 = vmatprep.mubr.msk.f32.mxu0 %vm5636_vm3, %v5637_v56  ;;  %v4318_v56 = vld [vmem:[%s7856_s12 + $0x10] sm:$0xff]  ;;  %5520 = vmatpush3.bf16.msra.mxu0 %v5519_v39 }
 0x4f3   : > { %5517 = vmatpush3.bf16.msra.mxu1 %v5516_v22  ;;  %v5522_v52 = vpack.c.bf16 %v4319_v35, %v4318_v56  ;;  %5521 = vmatprep.subr.bf16.mxu0 %v5635_v51 }
 0x4f6   : > { %5523 = vmatpush3.bf16.msra.mxu0 %v5522_v52 }
 0x4f7   : > { %5524 = vmatprep.subr.bf16.mxu0 %v5635_v51 }
 0x4fa   : > { %5526 = vmatpush3.bf16.msra.mxu0 %v5525_v50 }
 0x4fb   : > { %5527 = vmatprep.subr.bf16.mxu0 %v5635_v51 }
 0x4fe   : > { %5529 = vmatpush3.bf16.msra.mxu0 %v5528_v62 }
 0x4ff   : > { %5530 = vmatprep.subr.bf16.mxu0 %v5635_v51 }
 0x502   : > { %5532 = vmatpush3.bf16.msra.mxu0 %v5531_v63 }
 0x503   : > { %5533 = vmatprep.subr.bf16.mxu0 %v5635_v51 }
 0x506   : > { %5535 = vmatpush3.bf16.msra.mxu0 %v5534_v0 }
 0x507   : > { %5536 = vmatprep.subr.bf16.mxu0 %v5635_v51 }
 0x50a   : > { %5538 = vmatpush3.bf16.msra.mxu0 %v5537_v4 }
 0x50b   : > { %5539 = vmatprep.subr.bf16.mxu0 %v5635_v51  ;;  %v4606_v51 = vld [vmem:[%s7855_s11] ss:$0 sm:$0xff] }
 0x50e   : > { %5541 = vmatpush3.bf16.msra.mxu0 %v5540_v54 }
 0x5c4   : > { %v4217_v57 = vpop.f32.mrb[0].mxu0 }
 0x5c5   : > { %v4218_v5 = vadd.f32 %v4605_v25, %v4217_v57  ;;  %v5315_v38 = vpop.f32.mrb[1].mxu0 }
 0x5c7   : > { %v4221_v8 = vmax.f32 %v4218_v5, 0.0 }
 0x5c9   : > { %5349 = vmatmul.mubr.f32.vlgmr.msra.gmra.mrb[0].mxu1 %v4221_v8 }
 0x69c   : > { %v4311_v59 = vpop.f32.mrb[0].mxu1 }
 0x69d   : > { %v4312_v12 = vadd.f32 %v4606_v51, %v4311_v59  ;;  %v5350_v49 = vpop.f32.mrb[1].mxu1 }
 0x69f   : > { %v4315_v2 = vmax.f32 %v4312_v12, 0.0 }
 0x6a1   : > { %5384 = vmatmul.mubr.f32.vlgmr.msra.gmra.mrb[2].mxu0 %v4315_v2 }
 0x774   : > { %v4405_v36 = vpop.f32.mrb[2].mxu0 }
 0x775   : > { %v4406_v58 = vadd.f32 %v4607_v14, %v4405_v36  ;;  %v5385_v41 = vpop.f32.mrb[3].mxu0 }
 0x777   : > { %4409 = vst [vmem:[#allocation4] sm:$0xff] %v4406_v58 }
 0x778 PF: > { %p5568_p9 = scmp.eq.s32.totalorder %s5720_s30, 2  ;;  %s5638_s27 = smov [#allocation4]  }
 0x779   : > { %s4417_s28 = sshll.u32 %s5638_s27, 4  ;;  %s4418_s28 = int_to_ptr.vmem [resolvable:$true] %s4417_s28 }
 0x77a   : > { %s5590_s15 = scalar_lea.vmem %s4418_s28, 128  ;;  %p5597_p13 = scmp.lt.s32.totalorder %s4418_s28, %s4418_s28 }
 0x77b   : > { %p5591_p10 = scmp.ne.s32.totalorder %s4418_s28, %s5590_s15  ;;  %p5598_p0 = scmp.lt.s32.totalorder %s5590_s15, %s5590_s15 }
 0x77d   : > { %p5592_p11 = pnand %p5591_p10, %p5568_p9  ;;  %p5599_p1 = por %p5598_p0, %p5597_p13 }
 0x77f   : > { %p5593_p12 = pneg %p5592_p11 }
 0x781   : > { %p5600_p2 = pnand %p5599_p1, %p5593_p12 }
 0x783   : > { %5603 = shalt.err (!%p5600_p2)
}
 0x784   : > { %s5604_s21 = scalar_lea.hbm %s7858_s14, 128 }
 0x785   : > { %p5605_p3 = scmp.ne.s32.totalorder %s7858_s14, %s5604_s21  ;;  %p5610_p6 = scmp.lt.u32.totalorder %s5604_s21, %s7858_s14 }
 0x787   : > { %p5606_p4 = pnand %p5605_p3, %p5568_p9 }
 0x789   : > { %p5607_p5 = pneg %p5606_p4 }
 0x78b   : > { %p5612_p7 = pnand %p5610_p6, %p5607_p5 }
 0x78d   : > { %5615 = shalt.err (!%p5612_p7)
}
 0x78e   : > { %5565 = dma.vmem_to_hbm [thread:$0]  (%p5568_p9), %s4418_s28, 128, %s7858_s14, [#allocation5]  }
 0x78f   : > { %5621 = dma.done.wait (%p5568_p9), [#allocation5], 128  }
 0x790   : > { %5623 = vsyncadd (%p5568_p9), [#allocation5], 4294967168 }
 0x791 PF: > { %s25_s29 = sadd.s32 1, %s5626_s29  }
 0x792   : > { %p22_p8 = scmp.ge.s32.totalorder %s25_s29, 5  }
 0x794   :  { %24 = sbr.rel (!%p22_p8) target bundleno = 1 (0x1), region = 123 }
 0x79b   :  { %4430 = vsyncpa [#allocation5], 1 }
 0x79c   :  { %4432 = vsyncpa [#allocation5 + $0x1], 1 }

</bundles_post_ra>
